<compile_context>
chip_gen: v5e
topology: v5e:2x2
jax: 0.10.0
libtpu: 0.0.40
codegen_flags: <defaults>
</compile_context>

<pallas_src>
import jax
import jax.numpy as jnp
import numpy as np
from jax.experimental import pallas as pl
from jax.experimental.pallas import tpu as pltpu


# ----------------------------------------------------------------------------
# Pallas kernel: whole network for one image per grid step
# ----------------------------------------------------------------------------
def _pair_select_mats(n_out, n_in, dtype):
    """0/1 matrices selecting even / odd rows: se[p, 2p] = 1, so[p, 2p+1] = 1."""
    r = jax.lax.broadcasted_iota(jnp.int32, (n_out, n_in), 0)
    c = jax.lax.broadcasted_iota(jnp.int32, (n_out, n_in), 1)
    se = jnp.where(c == 2 * r, 1.0, 0.0).astype(dtype)
    so = jnp.where(c == 2 * r + 1, 1.0, 0.0).astype(dtype)
    return se, so


def _net_kernel(x_ref, m1e_ref, m1o_ref, b1_ref, m2e_ref, m2o_ref, b2_ref,
                wf1_ref, bf1_ref, wf2_ref, bf2_ref, o_ref):
    f32 = jnp.float32
    bf16 = jnp.bfloat16

    xb = x_ref[0].astype(bf16)                       # (28, 28)  rows=h, lanes=w

    # ---- conv1 (5x5, 1->20) with the W-direction 2x2 pool folded into weights
    x0 = xb[0:24, :]
    y1e = jnp.dot(x0, m1e_ref[0], preferred_element_type=f32)   # (24, 240)
    y1o = jnp.dot(x0, m1o_ref[0], preferred_element_type=f32)
    for i in range(1, 5):
        xi = xb[i:i + 24, :]
        y1e = y1e + jnp.dot(xi, m1e_ref[i], preferred_element_type=f32)
        y1o = y1o + jnp.dot(xi, m1o_ref[i], preferred_element_type=f32)
    yc1 = (jnp.maximum(y1e, y1o) + b1_ref[...]).astype(bf16)    # (24, 240)
    # H-direction pool: select even / odd rows via tiny 0/1 matmuls, then max
    se1, so1 = _pair_select_mats(12, 24, bf16)
    z1 = jnp.maximum(jnp.dot(se1, yc1, preferred_element_type=f32),
                     jnp.dot(so1, yc1, preferred_element_type=f32)).astype(bf16)
    # z1: (12, 240), layout [h, w*20 + c]

    # ---- conv2 (5x5, 20->50) with the W-direction pool folded into weights
    z0 = z1[0:8, :]
    y2e = jnp.dot(z0, m2e_ref[0], preferred_element_type=f32)   # (8, 200)
    y2o = jnp.dot(z0, m2o_ref[0], preferred_element_type=f32)
    for i in range(1, 5):
        zi = z1[i:i + 8, :]
        y2e = y2e + jnp.dot(zi, m2e_ref[i], preferred_element_type=f32)
        y2o = y2o + jnp.dot(zi, m2o_ref[i], preferred_element_type=f32)
    yc2 = (jnp.maximum(y2e, y2o) + b2_ref[...]).astype(bf16)    # (8, 200)
    se2, so2 = _pair_select_mats(4, 8, bf16)
    z2 = jnp.maximum(jnp.dot(se2, yc2, preferred_element_type=f32),
                     jnp.dot(so2, yc2, preferred_element_type=f32)).astype(bf16)
    # z2: (4, 200), layout [h, w*50 + c]

    # ---- fc1 + relu (PyTorch NCHW flatten folded into wf1's row permutation)
    h1 = bf1_ref[...]                                            # (1, 500) f32
    for r in range(4):
        h1 = h1 + jnp.dot(z2[r:r + 1, :], wf1_ref[r],
                          preferred_element_type=f32)
    h1 = jnp.maximum(h1, 0.0).astype(bf16)

    # ---- fc2 + log_softmax
    h2 = jnp.dot(h1, wf2_ref[...], preferred_element_type=f32) + bf2_ref[...]
    m = jnp.max(h2, axis=-1, keepdims=True)
    s = h2 - m
    lse = jnp.log(jnp.sum(jnp.exp(s), axis=-1, keepdims=True))
    o_ref[0] = (s - lse).astype(o_ref.dtype)                     # (1, 10)


# ----------------------------------------------------------------------------
# pallas_call wrapper
# ----------------------------------------------------------------------------
def net_forward(x_nchw, pp):
    B = x_nchw.shape[0]
    x = x_nchw.reshape(B, 28, 28)
    out = pl.pallas_call(
        _net_kernel,
        out_shape=jax.ShapeDtypeStruct((B, 1, 10), jnp.float32),
        grid=(B,),
        in_specs=[
            pl.BlockSpec((1, 28, 28), lambda b: (b, 0, 0)),    # image
            pl.BlockSpec((5, 28, 240), lambda b: (0, 0, 0)),   # conv1 band, even w
            pl.BlockSpec((5, 28, 240), lambda b: (0, 0, 0)),   # conv1 band, odd w
            pl.BlockSpec((1, 240), lambda b: (0, 0)),          # conv1 bias (tiled)
            pl.BlockSpec((5, 240, 200), lambda b: (0, 0, 0)),  # conv2 band, even w
            pl.BlockSpec((5, 240, 200), lambda b: (0, 0, 0)),  # conv2 band, odd w
            pl.BlockSpec((1, 200), lambda b: (0, 0)),          # conv2 bias (tiled)
            pl.BlockSpec((4, 200, 500), lambda b: (0, 0, 0)),  # fc1 weight (permuted)
            pl.BlockSpec((1, 500), lambda b: (0, 0)),          # fc1 bias
            pl.BlockSpec((500, 10), lambda b: (0, 0)),         # fc2 weight
            pl.BlockSpec((1, 10), lambda b: (0, 0)),           # fc2 bias
        ],
        out_specs=pl.BlockSpec((1, 1, 10), lambda b: (b, 0, 0)),
        compiler_params=pltpu.CompilerParams(
            dimension_semantics=("parallel",)),
    )(x, pp["m1e"], pp["m1o"], pp["b1p"], pp["m2e"], pp["m2o"], pp["b2p"],
      pp["wf1p"], pp["bf1"], pp["wf2p"], pp["bf2"])
    return out.reshape(B, 10)


# ----------------------------------------------------------------------------
# One-time weight pre-transforms (pure host-side data rearrangement)
# ----------------------------------------------------------------------------
def _conv_row_band_matrices(w, w_in):
    """w: (Cout, Cin, KH, KW).  Returns (KH, W_in*Cin, Wo*Cout) f32 such that
    Y[h, wo*Cout+co] = sum_i A[h+i, :] @ M[i], with A[r, win*Cin+ci] = x[ci, r, win]."""
    cout, cin, kh, kw = w.shape
    wo_n = w_in - kw + 1
    m = np.zeros((kh, w_in * cin, wo_n * cout), np.float32)
    for i in range(kh):
        for wo in range(wo_n):
            for j in range(kw):
                win = wo + j
                m[i, win * cin:(win + 1) * cin,
                  wo * cout:(wo + 1) * cout] = w[:, :, i, j].T
    return m


def prepare_params(p):
    w1 = np.asarray(p["w1"], np.float32)
    b1 = np.asarray(p["b1"], np.float32)
    w2 = np.asarray(p["w2"], np.float32)
    b2 = np.asarray(p["b2"], np.float32)
    wf1 = np.asarray(p["wf1"], np.float32)
    bf1 = np.asarray(p["bf1"], np.float32)
    wf2 = np.asarray(p["wf2"], np.float32)
    bf2 = np.asarray(p["bf2"], np.float32)

    m1 = _conv_row_band_matrices(w1, 28).reshape(5, 28, 24, 20)   # (i, win, wo, co)
    m2 = _conv_row_band_matrices(w2, 12).reshape(5, 240, 8, 50)
    # Split the output-w axis into even / odd so the 2x2 pool over w is a plain max.
    m1e = m1[:, :, 0::2, :].reshape(5, 28, 240)
    m1o = m1[:, :, 1::2, :].reshape(5, 28, 240)
    m2e = m2[:, :, 0::2, :].reshape(5, 240, 200)
    m2o = m2[:, :, 1::2, :].reshape(5, 240, 200)

    # fc1 weight with rows permuted from PyTorch's NCHW flatten (c*16 + h*4 + w)
    # to the kernel's (h, w*50 + c) activation layout, split by h.
    wf1p = wf1.reshape(500, 50, 4, 4).transpose(2, 3, 1, 0).reshape(4, 200, 500)

    bf = jnp.bfloat16
    return {
        "m1e": jnp.asarray(m1e, bf),
        "m1o": jnp.asarray(m1o, bf),
        "b1p": jnp.asarray(np.tile(b1, 12).reshape(1, 240), jnp.float32),
        "m2e": jnp.asarray(m2e, bf),
        "m2o": jnp.asarray(m2o, bf),
        "b2p": jnp.asarray(np.tile(b2, 4).reshape(1, 200), jnp.float32),
        "wf1p": jnp.asarray(wf1p, bf),
        "bf1": jnp.asarray(bf1.reshape(1, 500), jnp.float32),
        "wf2p": jnp.asarray(wf2.T, bf),                       # (500, 10)
        "bf2": jnp.asarray(bf2.reshape(1, 10), jnp.float32),
    }


# ----------------------------------------------------------------------------
# Deterministic parameter init (PyTorch default-style uniform bounds)
# ----------------------------------------------------------------------------
def init_params(key):
    ks = jax.random.split(key, 8)

    def u(k, shape, fan_in):
        bound = 1.0 / np.sqrt(fan_in)
        return jax.random.uniform(k, shape, jnp.float32, -bound, bound)

    return {
        "w1": u(ks[0], (20, 1, 5, 5), 1 * 5 * 5),
        "b1": u(ks[1], (20,), 1 * 5 * 5),
        "w2": u(ks[2], (50, 20, 5, 5), 20 * 5 * 5),
        "b2": u(ks[3], (50,), 20 * 5 * 5),
        "wf1": u(ks[4], (500, 800), 800),
        "bf1": u(ks[5], (500,), 800),
        "wf2": u(ks[6], (10, 500), 500),
        "bf2": u(ks[7], (10,), 500),
    }


if __name__ == "__main__":
    key = jax.random.PRNGKey(0)
    kx, kp = jax.random.split(key)
    # MNIST-shaped input: the fc1 dimension (50*4*4) forces 28x28 spatial.
    x = jax.random.normal(kx, (2, 1, 28, 28), dtype=jnp.float32)
    raw_params = init_params(kp)
    pp = prepare_params(raw_params)       # one-time weight re-layout

    fwd = jax.jit(net_forward)
    out = jax.block_until_ready(fwd(x, pp))

    out_np = np.asarray(out, np.float64)
    assert out.shape == (2, 10), out.shape
    assert np.all(np.isfinite(out_np))
    # log_softmax rows must exponentiate-sum to 1
    assert np.allclose(np.exp(out_np).sum(axis=1), 1.0, atol=1e-4)
    print("KERNEL_OK")
</pallas_src>

<mosaic_0001>
module attributes {stable_mosaic.version = 11 : i64} {
  func.func @_net_kernel(%arg0: i32, %arg1: memref<1x28x28xf32, #tpu.memory_space<vmem>>, %arg2: memref<5x28x240xbf16, #tpu.memory_space<vmem>>, %arg3: memref<5x28x240xbf16, #tpu.memory_space<vmem>>, %arg4: memref<1x240xf32, #tpu.memory_space<vmem>>, %arg5: memref<5x240x200xbf16, #tpu.memory_space<vmem>>, %arg6: memref<5x240x200xbf16, #tpu.memory_space<vmem>>, %arg7: memref<1x200xf32, #tpu.memory_space<vmem>>, %arg8: memref<4x200x500xbf16, #tpu.memory_space<vmem>>, %arg9: memref<1x500xf32, #tpu.memory_space<vmem>>, %arg10: memref<500x10xbf16, #tpu.memory_space<vmem>>, %arg11: memref<1x10xf32, #tpu.memory_space<vmem>>, %arg12: memref<1x1x10xf32, #tpu.memory_space<vmem>>) attributes {dimension_semantics = [#tpu.dimension_semantics<parallel>], iteration_bounds = array<i64: 2>, scalar_prefetch = 0 : i64, scratch_operands = 0 : i64, tpu.core_type = #tpu.core_type<tc>, window_params = [{transform_indices = @transform_0, window_bounds = array<i64: 1, 28, 28>}, {pipeline_mode = #tpu.pipeline_mode<synchronous>, transform_indices = @transform_1, window_bounds = array<i64: 5, 28, 240>}, {pipeline_mode = #tpu.pipeline_mode<synchronous>, transform_indices = @transform_2, window_bounds = array<i64: 5, 28, 240>}, {pipeline_mode = #tpu.pipeline_mode<synchronous>, transform_indices = @transform_3, window_bounds = array<i64: 1, 240>}, {pipeline_mode = #tpu.pipeline_mode<synchronous>, transform_indices = @transform_4, window_bounds = array<i64: 5, 240, 200>}, {pipeline_mode = #tpu.pipeline_mode<synchronous>, transform_indices = @transform_5, window_bounds = array<i64: 5, 240, 200>}, {pipeline_mode = #tpu.pipeline_mode<synchronous>, transform_indices = @transform_6, window_bounds = array<i64: 1, 200>}, {pipeline_mode = #tpu.pipeline_mode<synchronous>, transform_indices = @transform_7, window_bounds = array<i64: 4, 200, 500>}, {pipeline_mode = #tpu.pipeline_mode<synchronous>, transform_indices = @transform_8, window_bounds = array<i64: 1, 500>}, {pipeline_mode = #tpu.pipeline_mode<synchronous>, transform_indices = @transform_9, window_bounds = array<i64: 500, 10>}, {pipeline_mode = #tpu.pipeline_mode<synchronous>, transform_indices = @transform_10, window_bounds = array<i64: 1, 10>}, {transform_indices = @transform_11, window_bounds = array<i64: 1, 1, 10>}]} {
    %c0 = arith.constant 0 : index
    %c0_0 = arith.constant 0 : index
    %c0_1 = arith.constant 0 : index
    %0 = vector.load %arg1[%c0, %c0_0, %c0_1] : memref<1x28x28xf32, #tpu.memory_space<vmem>>, vector<1x28x28xf32>
    %1 = vector.shape_cast %0 : vector<1x28x28xf32> to vector<28x28xf32>
    %2 = arith.truncf %1 : vector<28x28xf32> to vector<28x28xbf16>
    %3 = vector.extract_strided_slice %2 {offsets = [0, 0], sizes = [24, 28], strides = [1, 1]} : vector<28x28xbf16> to vector<24x28xbf16>
    %c0_2 = arith.constant 0 : index
    %c0_3 = arith.constant 0 : index
    %c0_4 = arith.constant 0 : index
    %4 = vector.load %arg2[%c0_2, %c0_3, %c0_4] : memref<5x28x240xbf16, #tpu.memory_space<vmem>>, vector<1x28x240xbf16>
    %5 = vector.shape_cast %4 : vector<1x28x240xbf16> to vector<28x240xbf16>
    %cst = arith.constant dense<0.000000e+00> : vector<24x240xf32>
    %6 = tpu.matmul %3, %5, %cst {dimension_numbers = #tpu.dot_dimension_numbers<[1], [0], [0], [1], [0, 0, 1, 1], [], []>} : vector<24x28xbf16>, vector<28x240xbf16>, vector<24x240xf32> -> vector<24x240xf32>
    %c0_5 = arith.constant 0 : index
    %c0_6 = arith.constant 0 : index
    %c0_7 = arith.constant 0 : index
    %7 = vector.load %arg3[%c0_5, %c0_6, %c0_7] : memref<5x28x240xbf16, #tpu.memory_space<vmem>>, vector<1x28x240xbf16>
    %8 = vector.shape_cast %7 : vector<1x28x240xbf16> to vector<28x240xbf16>
    %cst_8 = arith.constant dense<0.000000e+00> : vector<24x240xf32>
    %9 = tpu.matmul %3, %8, %cst_8 {dimension_numbers = #tpu.dot_dimension_numbers<[1], [0], [0], [1], [0, 0, 1, 1], [], []>} : vector<24x28xbf16>, vector<28x240xbf16>, vector<24x240xf32> -> vector<24x240xf32>
    %10 = vector.extract_strided_slice %2 {offsets = [1, 0], sizes = [24, 28], strides = [1, 1]} : vector<28x28xbf16> to vector<24x28xbf16>
    %c1 = arith.constant 1 : index
    %c0_9 = arith.constant 0 : index
    %c0_10 = arith.constant 0 : index
    %11 = vector.load %arg2[%c1, %c0_9, %c0_10] : memref<5x28x240xbf16, #tpu.memory_space<vmem>>, vector<1x28x240xbf16>
    %12 = vector.shape_cast %11 : vector<1x28x240xbf16> to vector<28x240xbf16>
    %cst_11 = arith.constant dense<0.000000e+00> : vector<24x240xf32>
    %13 = tpu.matmul %10, %12, %cst_11 {dimension_numbers = #tpu.dot_dimension_numbers<[1], [0], [0], [1], [0, 0, 1, 1], [], []>} : vector<24x28xbf16>, vector<28x240xbf16>, vector<24x240xf32> -> vector<24x240xf32>
    %14 = arith.addf %6, %13 : vector<24x240xf32>
    %c1_12 = arith.constant 1 : index
    %c0_13 = arith.constant 0 : index
    %c0_14 = arith.constant 0 : index
    %15 = vector.load %arg3[%c1_12, %c0_13, %c0_14] : memref<5x28x240xbf16, #tpu.memory_space<vmem>>, vector<1x28x240xbf16>
    %16 = vector.shape_cast %15 : vector<1x28x240xbf16> to vector<28x240xbf16>
    %cst_15 = arith.constant dense<0.000000e+00> : vector<24x240xf32>
    %17 = tpu.matmul %10, %16, %cst_15 {dimension_numbers = #tpu.dot_dimension_numbers<[1], [0], [0], [1], [0, 0, 1, 1], [], []>} : vector<24x28xbf16>, vector<28x240xbf16>, vector<24x240xf32> -> vector<24x240xf32>
    %18 = arith.addf %9, %17 : vector<24x240xf32>
    %19 = vector.extract_strided_slice %2 {offsets = [2, 0], sizes = [24, 28], strides = [1, 1]} : vector<28x28xbf16> to vector<24x28xbf16>
    %c2 = arith.constant 2 : index
    %c0_16 = arith.constant 0 : index
    %c0_17 = arith.constant 0 : index
    %20 = vector.load %arg2[%c2, %c0_16, %c0_17] : memref<5x28x240xbf16, #tpu.memory_space<vmem>>, vector<1x28x240xbf16>
    %21 = vector.shape_cast %20 : vector<1x28x240xbf16> to vector<28x240xbf16>
    %cst_18 = arith.constant dense<0.000000e+00> : vector<24x240xf32>
    %22 = tpu.matmul %19, %21, %cst_18 {dimension_numbers = #tpu.dot_dimension_numbers<[1], [0], [0], [1], [0, 0, 1, 1], [], []>} : vector<24x28xbf16>, vector<28x240xbf16>, vector<24x240xf32> -> vector<24x240xf32>
    %23 = arith.addf %14, %22 : vector<24x240xf32>
    %c2_19 = arith.constant 2 : index
    %c0_20 = arith.constant 0 : index
    %c0_21 = arith.constant 0 : index
    %24 = vector.load %arg3[%c2_19, %c0_20, %c0_21] : memref<5x28x240xbf16, #tpu.memory_space<vmem>>, vector<1x28x240xbf16>
    %25 = vector.shape_cast %24 : vector<1x28x240xbf16> to vector<28x240xbf16>
    %cst_22 = arith.constant dense<0.000000e+00> : vector<24x240xf32>
    %26 = tpu.matmul %19, %25, %cst_22 {dimension_numbers = #tpu.dot_dimension_numbers<[1], [0], [0], [1], [0, 0, 1, 1], [], []>} : vector<24x28xbf16>, vector<28x240xbf16>, vector<24x240xf32> -> vector<24x240xf32>
    %27 = arith.addf %18, %26 : vector<24x240xf32>
    %28 = vector.extract_strided_slice %2 {offsets = [3, 0], sizes = [24, 28], strides = [1, 1]} : vector<28x28xbf16> to vector<24x28xbf16>
    %c3 = arith.constant 3 : index
    %c0_23 = arith.constant 0 : index
    %c0_24 = arith.constant 0 : index
    %29 = vector.load %arg2[%c3, %c0_23, %c0_24] : memref<5x28x240xbf16, #tpu.memory_space<vmem>>, vector<1x28x240xbf16>
    %30 = vector.shape_cast %29 : vector<1x28x240xbf16> to vector<28x240xbf16>
    %cst_25 = arith.constant dense<0.000000e+00> : vector<24x240xf32>
    %31 = tpu.matmul %28, %30, %cst_25 {dimension_numbers = #tpu.dot_dimension_numbers<[1], [0], [0], [1], [0, 0, 1, 1], [], []>} : vector<24x28xbf16>, vector<28x240xbf16>, vector<24x240xf32> -> vector<24x240xf32>
    %32 = arith.addf %23, %31 : vector<24x240xf32>
    %c3_26 = arith.constant 3 : index
    %c0_27 = arith.constant 0 : index
    %c0_28 = arith.constant 0 : index
    %33 = vector.load %arg3[%c3_26, %c0_27, %c0_28] : memref<5x28x240xbf16, #tpu.memory_space<vmem>>, vector<1x28x240xbf16>
    %34 = vector.shape_cast %33 : vector<1x28x240xbf16> to vector<28x240xbf16>
    %cst_29 = arith.constant dense<0.000000e+00> : vector<24x240xf32>
    %35 = tpu.matmul %28, %34, %cst_29 {dimension_numbers = #tpu.dot_dimension_numbers<[1], [0], [0], [1], [0, 0, 1, 1], [], []>} : vector<24x28xbf16>, vector<28x240xbf16>, vector<24x240xf32> -> vector<24x240xf32>
    %36 = arith.addf %27, %35 : vector<24x240xf32>
    %37 = vector.extract_strided_slice %2 {offsets = [4, 0], sizes = [24, 28], strides = [1, 1]} : vector<28x28xbf16> to vector<24x28xbf16>
    %c4 = arith.constant 4 : index
    %c0_30 = arith.constant 0 : index
    %c0_31 = arith.constant 0 : index
    %38 = vector.load %arg2[%c4, %c0_30, %c0_31] : memref<5x28x240xbf16, #tpu.memory_space<vmem>>, vector<1x28x240xbf16>
    %39 = vector.shape_cast %38 : vector<1x28x240xbf16> to vector<28x240xbf16>
    %cst_32 = arith.constant dense<0.000000e+00> : vector<24x240xf32>
    %40 = tpu.matmul %37, %39, %cst_32 {dimension_numbers = #tpu.dot_dimension_numbers<[1], [0], [0], [1], [0, 0, 1, 1], [], []>} : vector<24x28xbf16>, vector<28x240xbf16>, vector<24x240xf32> -> vector<24x240xf32>
    %41 = arith.addf %32, %40 : vector<24x240xf32>
    %c4_33 = arith.constant 4 : index
    %c0_34 = arith.constant 0 : index
    %c0_35 = arith.constant 0 : index
    %42 = vector.load %arg3[%c4_33, %c0_34, %c0_35] : memref<5x28x240xbf16, #tpu.memory_space<vmem>>, vector<1x28x240xbf16>
    %43 = vector.shape_cast %42 : vector<1x28x240xbf16> to vector<28x240xbf16>
    %cst_36 = arith.constant dense<0.000000e+00> : vector<24x240xf32>
    %44 = tpu.matmul %37, %43, %cst_36 {dimension_numbers = #tpu.dot_dimension_numbers<[1], [0], [0], [1], [0, 0, 1, 1], [], []>} : vector<24x28xbf16>, vector<28x240xbf16>, vector<24x240xf32> -> vector<24x240xf32>
    %45 = arith.addf %36, %44 : vector<24x240xf32>
    %46 = arith.maximumf %41, %45 : vector<24x240xf32>
    %c0_37 = arith.constant 0 : index
    %c0_38 = arith.constant 0 : index
    %47 = vector.load %arg4[%c0_37, %c0_38] : memref<1x240xf32, #tpu.memory_space<vmem>>, vector<1x240xf32>
    %48 = vector.broadcast %47 : vector<1x240xf32> to vector<24x240xf32>
    %49 = arith.addf %46, %48 : vector<24x240xf32>
    %50 = arith.truncf %49 : vector<24x240xf32> to vector<24x240xbf16>
    %51 = tpu.iota {dimensions = array<i32: 0>} : vector<12x24xi32>
    %52 = tpu.iota {dimensions = array<i32: 1>} : vector<12x24xi32>
    %c2_i32 = arith.constant 2 : i32
    %53 = vector.broadcast %c2_i32 : i32 to vector<12x24xi32>
    %54 = arith.muli %53, %51 : vector<12x24xi32>
    %55 = arith.cmpi eq, %52, %54 : vector<12x24xi32>
    %cst_39 = arith.constant 1.000000e+00 : f32
    %cst_40 = arith.constant 0.000000e+00 : f32
    %56 = vector.broadcast %cst_39 : f32 to vector<12x24xf32>
    %57 = vector.broadcast %cst_40 : f32 to vector<12x24xf32>
    %58 = arith.select %55, %56, %57 : vector<12x24xi1>, vector<12x24xf32>
    %59 = arith.truncf %58 : vector<12x24xf32> to vector<12x24xbf16>
    %c2_i32_41 = arith.constant 2 : i32
    %60 = vector.broadcast %c2_i32_41 : i32 to vector<12x24xi32>
    %61 = arith.muli %60, %51 : vector<12x24xi32>
    %c1_i32 = arith.constant 1 : i32
    %62 = vector.broadcast %c1_i32 : i32 to vector<12x24xi32>
    %63 = arith.addi %61, %62 : vector<12x24xi32>
    %64 = arith.cmpi eq, %52, %63 : vector<12x24xi32>
    %cst_42 = arith.constant 1.000000e+00 : f32
    %cst_43 = arith.constant 0.000000e+00 : f32
    %65 = vector.broadcast %cst_42 : f32 to vector<12x24xf32>
    %66 = vector.broadcast %cst_43 : f32 to vector<12x24xf32>
    %67 = arith.select %64, %65, %66 : vector<12x24xi1>, vector<12x24xf32>
    %68 = arith.truncf %67 : vector<12x24xf32> to vector<12x24xbf16>
    %cst_44 = arith.constant dense<0.000000e+00> : vector<12x240xf32>
    %69 = tpu.matmul %59, %50, %cst_44 {dimension_numbers = #tpu.dot_dimension_numbers<[1], [0], [0], [1], [0, 0, 1, 1], [], []>} : vector<12x24xbf16>, vector<24x240xbf16>, vector<12x240xf32> -> vector<12x240xf32>
    %cst_45 = arith.constant dense<0.000000e+00> : vector<12x240xf32>
    %70 = tpu.matmul %68, %50, %cst_45 {dimension_numbers = #tpu.dot_dimension_numbers<[1], [0], [0], [1], [0, 0, 1, 1], [], []>} : vector<12x24xbf16>, vector<24x240xbf16>, vector<12x240xf32> -> vector<12x240xf32>
    %71 = arith.maximumf %69, %70 : vector<12x240xf32>
    %72 = arith.truncf %71 : vector<12x240xf32> to vector<12x240xbf16>
    %73 = vector.extract_strided_slice %72 {offsets = [0, 0], sizes = [8, 240], strides = [1, 1]} : vector<12x240xbf16> to vector<8x240xbf16>
    %c0_46 = arith.constant 0 : index
    %c0_47 = arith.constant 0 : index
    %c0_48 = arith.constant 0 : index
    %74 = vector.load %arg5[%c0_46, %c0_47, %c0_48] : memref<5x240x200xbf16, #tpu.memory_space<vmem>>, vector<1x240x200xbf16>
    %75 = vector.shape_cast %74 : vector<1x240x200xbf16> to vector<240x200xbf16>
    %cst_49 = arith.constant dense<0.000000e+00> : vector<8x200xf32>
    %76 = tpu.matmul %73, %75, %cst_49 {dimension_numbers = #tpu.dot_dimension_numbers<[1], [0], [0], [1], [0, 0, 1, 1], [], []>} : vector<8x240xbf16>, vector<240x200xbf16>, vector<8x200xf32> -> vector<8x200xf32>
    %c0_50 = arith.constant 0 : index
    %c0_51 = arith.constant 0 : index
    %c0_52 = arith.constant 0 : index
    %77 = vector.load %arg6[%c0_50, %c0_51, %c0_52] : memref<5x240x200xbf16, #tpu.memory_space<vmem>>, vector<1x240x200xbf16>
    %78 = vector.shape_cast %77 : vector<1x240x200xbf16> to vector<240x200xbf16>
    %cst_53 = arith.constant dense<0.000000e+00> : vector<8x200xf32>
    %79 = tpu.matmul %73, %78, %cst_53 {dimension_numbers = #tpu.dot_dimension_numbers<[1], [0], [0], [1], [0, 0, 1, 1], [], []>} : vector<8x240xbf16>, vector<240x200xbf16>, vector<8x200xf32> -> vector<8x200xf32>
    %80 = vector.extract_strided_slice %72 {offsets = [1, 0], sizes = [8, 240], strides = [1, 1]} : vector<12x240xbf16> to vector<8x240xbf16>
    %c1_54 = arith.constant 1 : index
    %c0_55 = arith.constant 0 : index
    %c0_56 = arith.constant 0 : index
    %81 = vector.load %arg5[%c1_54, %c0_55, %c0_56] : memref<5x240x200xbf16, #tpu.memory_space<vmem>>, vector<1x240x200xbf16>
    %82 = vector.shape_cast %81 : vector<1x240x200xbf16> to vector<240x200xbf16>
    %cst_57 = arith.constant dense<0.000000e+00> : vector<8x200xf32>
    %83 = tpu.matmul %80, %82, %cst_57 {dimension_numbers = #tpu.dot_dimension_numbers<[1], [0], [0], [1], [0, 0, 1, 1], [], []>} : vector<8x240xbf16>, vector<240x200xbf16>, vector<8x200xf32> -> vector<8x200xf32>
    %84 = arith.addf %76, %83 : vector<8x200xf32>
    %c1_58 = arith.constant 1 : index
    %c0_59 = arith.constant 0 : index
    %c0_60 = arith.constant 0 : index
    %85 = vector.load %arg6[%c1_58, %c0_59, %c0_60] : memref<5x240x200xbf16, #tpu.memory_space<vmem>>, vector<1x240x200xbf16>
    %86 = vector.shape_cast %85 : vector<1x240x200xbf16> to vector<240x200xbf16>
    %cst_61 = arith.constant dense<0.000000e+00> : vector<8x200xf32>
    %87 = tpu.matmul %80, %86, %cst_61 {dimension_numbers = #tpu.dot_dimension_numbers<[1], [0], [0], [1], [0, 0, 1, 1], [], []>} : vector<8x240xbf16>, vector<240x200xbf16>, vector<8x200xf32> -> vector<8x200xf32>
    %88 = arith.addf %79, %87 : vector<8x200xf32>
    %89 = vector.extract_strided_slice %72 {offsets = [2, 0], sizes = [8, 240], strides = [1, 1]} : vector<12x240xbf16> to vector<8x240xbf16>
    %c2_62 = arith.constant 2 : index
    %c0_63 = arith.constant 0 : index
    %c0_64 = arith.constant 0 : index
    %90 = vector.load %arg5[%c2_62, %c0_63, %c0_64] : memref<5x240x200xbf16, #tpu.memory_space<vmem>>, vector<1x240x200xbf16>
    %91 = vector.shape_cast %90 : vector<1x240x200xbf16> to vector<240x200xbf16>
    %cst_65 = arith.constant dense<0.000000e+00> : vector<8x200xf32>
    %92 = tpu.matmul %89, %91, %cst_65 {dimension_numbers = #tpu.dot_dimension_numbers<[1], [0], [0], [1], [0, 0, 1, 1], [], []>} : vector<8x240xbf16>, vector<240x200xbf16>, vector<8x200xf32> -> vector<8x200xf32>
    %93 = arith.addf %84, %92 : vector<8x200xf32>
    %c2_66 = arith.constant 2 : index
    %c0_67 = arith.constant 0 : index
    %c0_68 = arith.constant 0 : index
    %94 = vector.load %arg6[%c2_66, %c0_67, %c0_68] : memref<5x240x200xbf16, #tpu.memory_space<vmem>>, vector<1x240x200xbf16>
    %95 = vector.shape_cast %94 : vector<1x240x200xbf16> to vector<240x200xbf16>
    %cst_69 = arith.constant dense<0.000000e+00> : vector<8x200xf32>
    %96 = tpu.matmul %89, %95, %cst_69 {dimension_numbers = #tpu.dot_dimension_numbers<[1], [0], [0], [1], [0, 0, 1, 1], [], []>} : vector<8x240xbf16>, vector<240x200xbf16>, vector<8x200xf32> -> vector<8x200xf32>
    %97 = arith.addf %88, %96 : vector<8x200xf32>
    %98 = vector.extract_strided_slice %72 {offsets = [3, 0], sizes = [8, 240], strides = [1, 1]} : vector<12x240xbf16> to vector<8x240xbf16>
    %c3_70 = arith.constant 3 : index
    %c0_71 = arith.constant 0 : index
    %c0_72 = arith.constant 0 : index
    %99 = vector.load %arg5[%c3_70, %c0_71, %c0_72] : memref<5x240x200xbf16, #tpu.memory_space<vmem>>, vector<1x240x200xbf16>
    %100 = vector.shape_cast %99 : vector<1x240x200xbf16> to vector<240x200xbf16>
    %cst_73 = arith.constant dense<0.000000e+00> : vector<8x200xf32>
    %101 = tpu.matmul %98, %100, %cst_73 {dimension_numbers = #tpu.dot_dimension_numbers<[1], [0], [0], [1], [0, 0, 1, 1], [], []>} : vector<8x240xbf16>, vector<240x200xbf16>, vector<8x200xf32> -> vector<8x200xf32>
    %102 = arith.addf %93, %101 : vector<8x200xf32>
    %c3_74 = arith.constant 3 : index
    %c0_75 = arith.constant 0 : index
    %c0_76 = arith.constant 0 : index
    %103 = vector.load %arg6[%c3_74, %c0_75, %c0_76] : memref<5x240x200xbf16, #tpu.memory_space<vmem>>, vector<1x240x200xbf16>
    %104 = vector.shape_cast %103 : vector<1x240x200xbf16> to vector<240x200xbf16>
    %cst_77 = arith.constant dense<0.000000e+00> : vector<8x200xf32>
    %105 = tpu.matmul %98, %104, %cst_77 {dimension_numbers = #tpu.dot_dimension_numbers<[1], [0], [0], [1], [0, 0, 1, 1], [], []>} : vector<8x240xbf16>, vector<240x200xbf16>, vector<8x200xf32> -> vector<8x200xf32>
    %106 = arith.addf %97, %105 : vector<8x200xf32>
    %107 = vector.extract_strided_slice %72 {offsets = [4, 0], sizes = [8, 240], strides = [1, 1]} : vector<12x240xbf16> to vector<8x240xbf16>
    %c4_78 = arith.constant 4 : index
    %c0_79 = arith.constant 0 : index
    %c0_80 = arith.constant 0 : index
    %108 = vector.load %arg5[%c4_78, %c0_79, %c0_80] : memref<5x240x200xbf16, #tpu.memory_space<vmem>>, vector<1x240x200xbf16>
    %109 = vector.shape_cast %108 : vector<1x240x200xbf16> to vector<240x200xbf16>
    %cst_81 = arith.constant dense<0.000000e+00> : vector<8x200xf32>
    %110 = tpu.matmul %107, %109, %cst_81 {dimension_numbers = #tpu.dot_dimension_numbers<[1], [0], [0], [1], [0, 0, 1, 1], [], []>} : vector<8x240xbf16>, vector<240x200xbf16>, vector<8x200xf32> -> vector<8x200xf32>
    %111 = arith.addf %102, %110 : vector<8x200xf32>
    %c4_82 = arith.constant 4 : index
    %c0_83 = arith.constant 0 : index
    %c0_84 = arith.constant 0 : index
    %112 = vector.load %arg6[%c4_82, %c0_83, %c0_84] : memref<5x240x200xbf16, #tpu.memory_space<vmem>>, vector<1x240x200xbf16>
    %113 = vector.shape_cast %112 : vector<1x240x200xbf16> to vector<240x200xbf16>
    %cst_85 = arith.constant dense<0.000000e+00> : vector<8x200xf32>
    %114 = tpu.matmul %107, %113, %cst_85 {dimension_numbers = #tpu.dot_dimension_numbers<[1], [0], [0], [1], [0, 0, 1, 1], [], []>} : vector<8x240xbf16>, vector<240x200xbf16>, vector<8x200xf32> -> vector<8x200xf32>
    %115 = arith.addf %106, %114 : vector<8x200xf32>
    %116 = arith.maximumf %111, %115 : vector<8x200xf32>
    %c0_86 = arith.constant 0 : index
    %c0_87 = arith.constant 0 : index
    %117 = vector.load %arg7[%c0_86, %c0_87] : memref<1x200xf32, #tpu.memory_space<vmem>>, vector<1x200xf32>
    %118 = vector.broadcast %117 : vector<1x200xf32> to vector<8x200xf32>
    %119 = arith.addf %116, %118 : vector<8x200xf32>
    %120 = arith.truncf %119 : vector<8x200xf32> to vector<8x200xbf16>
    %121 = tpu.iota {dimensions = array<i32: 0>} : vector<4x8xi32>
    %122 = tpu.iota {dimensions = array<i32: 1>} : vector<4x8xi32>
    %c2_i32_88 = arith.constant 2 : i32
    %123 = vector.broadcast %c2_i32_88 : i32 to vector<4x8xi32>
    %124 = arith.muli %123, %121 : vector<4x8xi32>
    %125 = arith.cmpi eq, %122, %124 : vector<4x8xi32>
    %cst_89 = arith.constant 1.000000e+00 : f32
    %cst_90 = arith.constant 0.000000e+00 : f32
    %126 = vector.broadcast %cst_89 : f32 to vector<4x8xf32>
    %127 = vector.broadcast %cst_90 : f32 to vector<4x8xf32>
    %128 = arith.select %125, %126, %127 : vector<4x8xi1>, vector<4x8xf32>
    %129 = arith.truncf %128 : vector<4x8xf32> to vector<4x8xbf16>
    %c2_i32_91 = arith.constant 2 : i32
    %130 = vector.broadcast %c2_i32_91 : i32 to vector<4x8xi32>
    %131 = arith.muli %130, %121 : vector<4x8xi32>
    %c1_i32_92 = arith.constant 1 : i32
    %132 = vector.broadcast %c1_i32_92 : i32 to vector<4x8xi32>
    %133 = arith.addi %131, %132 : vector<4x8xi32>
    %134 = arith.cmpi eq, %122, %133 : vector<4x8xi32>
    %cst_93 = arith.constant 1.000000e+00 : f32
    %cst_94 = arith.constant 0.000000e+00 : f32
    %135 = vector.broadcast %cst_93 : f32 to vector<4x8xf32>
    %136 = vector.broadcast %cst_94 : f32 to vector<4x8xf32>
    %137 = arith.select %134, %135, %136 : vector<4x8xi1>, vector<4x8xf32>
    %138 = arith.truncf %137 : vector<4x8xf32> to vector<4x8xbf16>
    %cst_95 = arith.constant dense<0.000000e+00> : vector<4x200xf32>
    %139 = tpu.matmul %129, %120, %cst_95 {dimension_numbers = #tpu.dot_dimension_numbers<[1], [0], [0], [1], [0, 0, 1, 1], [], []>} : vector<4x8xbf16>, vector<8x200xbf16>, vector<4x200xf32> -> vector<4x200xf32>
    %cst_96 = arith.constant dense<0.000000e+00> : vector<4x200xf32>
    %140 = tpu.matmul %138, %120, %cst_96 {dimension_numbers = #tpu.dot_dimension_numbers<[1], [0], [0], [1], [0, 0, 1, 1], [], []>} : vector<4x8xbf16>, vector<8x200xbf16>, vector<4x200xf32> -> vector<4x200xf32>
    %141 = arith.maximumf %139, %140 : vector<4x200xf32>
    %142 = arith.truncf %141 : vector<4x200xf32> to vector<4x200xbf16>
    %c0_97 = arith.constant 0 : index
    %c0_98 = arith.constant 0 : index
    %143 = vector.load %arg9[%c0_97, %c0_98] : memref<1x500xf32, #tpu.memory_space<vmem>>, vector<1x500xf32>
    %144 = vector.extract_strided_slice %142 {offsets = [0, 0], sizes = [1, 200], strides = [1, 1]} : vector<4x200xbf16> to vector<1x200xbf16>
    %c0_99 = arith.constant 0 : index
    %c0_100 = arith.constant 0 : index
    %c0_101 = arith.constant 0 : index
    %145 = vector.load %arg8[%c0_99, %c0_100, %c0_101] : memref<4x200x500xbf16, #tpu.memory_space<vmem>>, vector<1x200x500xbf16>
    %146 = vector.shape_cast %145 : vector<1x200x500xbf16> to vector<200x500xbf16>
    %cst_102 = arith.constant dense<0.000000e+00> : vector<1x500xf32>
    %147 = tpu.matmul %144, %146, %cst_102 {dimension_numbers = #tpu.dot_dimension_numbers<[1], [0], [0], [1], [0, 0, 1, 1], [], []>} : vector<1x200xbf16>, vector<200x500xbf16>, vector<1x500xf32> -> vector<1x500xf32>
    %148 = arith.addf %143, %147 : vector<1x500xf32>
    %149 = vector.extract_strided_slice %142 {offsets = [1, 0], sizes = [1, 200], strides = [1, 1]} : vector<4x200xbf16> to vector<1x200xbf16>
    %c1_103 = arith.constant 1 : index
    %c0_104 = arith.constant 0 : index
    %c0_105 = arith.constant 0 : index
    %150 = vector.load %arg8[%c1_103, %c0_104, %c0_105] : memref<4x200x500xbf16, #tpu.memory_space<vmem>>, vector<1x200x500xbf16>
    %151 = vector.shape_cast %150 : vector<1x200x500xbf16> to vector<200x500xbf16>
    %cst_106 = arith.constant dense<0.000000e+00> : vector<1x500xf32>
    %152 = tpu.matmul %149, %151, %cst_106 {dimension_numbers = #tpu.dot_dimension_numbers<[1], [0], [0], [1], [0, 0, 1, 1], [], []>} : vector<1x200xbf16>, vector<200x500xbf16>, vector<1x500xf32> -> vector<1x500xf32>
    %153 = arith.addf %148, %152 : vector<1x500xf32>
    %154 = vector.extract_strided_slice %142 {offsets = [2, 0], sizes = [1, 200], strides = [1, 1]} : vector<4x200xbf16> to vector<1x200xbf16>
    %c2_107 = arith.constant 2 : index
    %c0_108 = arith.constant 0 : index
    %c0_109 = arith.constant 0 : index
    %155 = vector.load %arg8[%c2_107, %c0_108, %c0_109] : memref<4x200x500xbf16, #tpu.memory_space<vmem>>, vector<1x200x500xbf16>
    %156 = vector.shape_cast %155 : vector<1x200x500xbf16> to vector<200x500xbf16>
    %cst_110 = arith.constant dense<0.000000e+00> : vector<1x500xf32>
    %157 = tpu.matmul %154, %156, %cst_110 {dimension_numbers = #tpu.dot_dimension_numbers<[1], [0], [0], [1], [0, 0, 1, 1], [], []>} : vector<1x200xbf16>, vector<200x500xbf16>, vector<1x500xf32> -> vector<1x500xf32>
    %158 = arith.addf %153, %157 : vector<1x500xf32>
    %159 = vector.extract_strided_slice %142 {offsets = [3, 0], sizes = [1, 200], strides = [1, 1]} : vector<4x200xbf16> to vector<1x200xbf16>
    %c3_111 = arith.constant 3 : index
    %c0_112 = arith.constant 0 : index
    %c0_113 = arith.constant 0 : index
    %160 = vector.load %arg8[%c3_111, %c0_112, %c0_113] : memref<4x200x500xbf16, #tpu.memory_space<vmem>>, vector<1x200x500xbf16>
    %161 = vector.shape_cast %160 : vector<1x200x500xbf16> to vector<200x500xbf16>
    %cst_114 = arith.constant dense<0.000000e+00> : vector<1x500xf32>
    %162 = tpu.matmul %159, %161, %cst_114 {dimension_numbers = #tpu.dot_dimension_numbers<[1], [0], [0], [1], [0, 0, 1, 1], [], []>} : vector<1x200xbf16>, vector<200x500xbf16>, vector<1x500xf32> -> vector<1x500xf32>
    %163 = arith.addf %158, %162 : vector<1x500xf32>
    %cst_115 = arith.constant 0.000000e+00 : f32
    %164 = vector.broadcast %cst_115 : f32 to vector<1x500xf32>
    %165 = arith.maximumf %163, %164 : vector<1x500xf32>
    %166 = arith.truncf %165 : vector<1x500xf32> to vector<1x500xbf16>
    %c0_116 = arith.constant 0 : index
    %c0_117 = arith.constant 0 : index
    %167 = vector.load %arg10[%c0_116, %c0_117] : memref<500x10xbf16, #tpu.memory_space<vmem>>, vector<500x10xbf16>
    %cst_118 = arith.constant dense<0.000000e+00> : vector<1x10xf32>
    %168 = tpu.matmul %166, %167, %cst_118 {dimension_numbers = #tpu.dot_dimension_numbers<[1], [0], [0], [1], [0, 0, 1, 1], [], []>} : vector<1x500xbf16>, vector<500x10xbf16>, vector<1x10xf32> -> vector<1x10xf32>
    %c0_119 = arith.constant 0 : index
    %c0_120 = arith.constant 0 : index
    %169 = vector.load %arg11[%c0_119, %c0_120] : memref<1x10xf32, #tpu.memory_space<vmem>>, vector<1x10xf32>
    %170 = arith.addf %168, %169 : vector<1x10xf32>
    %cst_121 = arith.constant dense<0xFF800000> : vector<1xf32>
    %171 = vector.multi_reduction <maximumf>, %170, %cst_121 [1] : vector<1x10xf32> to vector<1xf32>
    %172 = vector.shape_cast %171 : vector<1xf32> to vector<1x1xf32>
    %173 = vector.broadcast %172 : vector<1x1xf32> to vector<1x10xf32>
    %174 = arith.subf %170, %173 : vector<1x10xf32>
    %175 = math.exp %174 : vector<1x10xf32>
    %cst_122 = arith.constant dense<0.000000e+00> : vector<1xf32>
    %176 = vector.multi_reduction <add>, %175, %cst_122 [1] : vector<1x10xf32> to vector<1xf32>
    %177 = vector.shape_cast %176 : vector<1xf32> to vector<1x1xf32>
    %178 = math.log %177 : vector<1x1xf32>
    %179 = vector.broadcast %178 : vector<1x1xf32> to vector<1x10xf32>
    %180 = arith.subf %174, %179 : vector<1x10xf32>
    %c0_123 = arith.constant 0 : index
    %c0_124 = arith.constant 0 : index
    %c0_125 = arith.constant 0 : index
    %181 = vector.load %arg12[%c0_123, %c0_124, %c0_125] : memref<1x1x10xf32, #tpu.memory_space<vmem>>, vector<1x1x10xf32>
    %182 = vector.shape_cast %181 : vector<1x1x10xf32> to vector<1x10xf32>
    %183 = vector.shape_cast %180 : vector<1x10xf32> to vector<1x1x10xf32>
    tpu.vector_store %arg12[%c0_123, %c0_124, %c0_125], %183 {strides = array<i32>} : memref<1x1x10xf32, #tpu.memory_space<vmem>>, vector<1x1x10xf32>,
    return
  }
  func.func @transform_0(%arg0: i32) -> (i32, i32, i32) {
    %c0_i32 = arith.constant 0 : i32
    %c0_i32_0 = arith.constant 0 : i32
    %c0_i32_1 = arith.constant 0 : i32
    return %arg0, %c0_i32, %c0_i32_0 : i32, i32, i32
  }
  func.func @transform_1(%arg0: i32) -> (i32, i32, i32) {
    %c0_i32 = arith.constant 0 : i32
    %c0_i32_0 = arith.constant 0 : i32
    %c0_i32_1 = arith.constant 0 : i32
    %c0_i32_2 = arith.constant 0 : i32
    return %c0_i32, %c0_i32_0, %c0_i32_1 : i32, i32, i32
  }
  func.func @transform_2(%arg0: i32) -> (i32, i32, i32) {
    %c0_i32 = arith.constant 0 : i32
    %c0_i32_0 = arith.constant 0 : i32
    %c0_i32_1 = arith.constant 0 : i32
    %c0_i32_2 = arith.constant 0 : i32
    return %c0_i32, %c0_i32_0, %c0_i32_1 : i32, i32, i32
  }
  func.func @transform_3(%arg0: i32) -> (i32, i32) {
    %c0_i32 = arith.constant 0 : i32
    %c0_i32_0 = arith.constant 0 : i32
    %c0_i32_1 = arith.constant 0 : i32
    return %c0_i32, %c0_i32_0 : i32, i32
  }
  func.func @transform_4(%arg0: i32) -> (i32, i32, i32) {
    %c0_i32 = arith.constant 0 : i32
    %c0_i32_0 = arith.constant 0 : i32
    %c0_i32_1 = arith.constant 0 : i32
    %c0_i32_2 = arith.constant 0 : i32
    return %c0_i32, %c0_i32_0, %c0_i32_1 : i32, i32, i32
  }
  func.func @transform_5(%arg0: i32) -> (i32, i32, i32) {
    %c0_i32 = arith.constant 0 : i32
    %c0_i32_0 = arith.constant 0 : i32
    %c0_i32_1 = arith.constant 0 : i32
    %c0_i32_2 = arith.constant 0 : i32
    return %c0_i32, %c0_i32_0, %c0_i32_1 : i32, i32, i32
  }
  func.func @transform_6(%arg0: i32) -> (i32, i32) {
    %c0_i32 = arith.constant 0 : i32
    %c0_i32_0 = arith.constant 0 : i32
    %c0_i32_1 = arith.constant 0 : i32
    return %c0_i32, %c0_i32_0 : i32, i32
  }
  func.func @transform_7(%arg0: i32) -> (i32, i32, i32) {
    %c0_i32 = arith.constant 0 : i32
    %c0_i32_0 = arith.constant 0 : i32
    %c0_i32_1 = arith.constant 0 : i32
    %c0_i32_2 = arith.constant 0 : i32
    return %c0_i32, %c0_i32_0, %c0_i32_1 : i32, i32, i32
  }
  func.func @transform_8(%arg0: i32) -> (i32, i32) {
    %c0_i32 = arith.constant 0 : i32
    %c0_i32_0 = arith.constant 0 : i32
    %c0_i32_1 = arith.constant 0 : i32
    return %c0_i32, %c0_i32_0 : i32, i32
  }
  func.func @transform_9(%arg0: i32) -> (i32, i32) {
    %c0_i32 = arith.constant 0 : i32
    %c0_i32_0 = arith.constant 0 : i32
    %c0_i32_1 = arith.constant 0 : i32
    return %c0_i32, %c0_i32_0 : i32, i32
  }
  func.func @transform_10(%arg0: i32) -> (i32, i32) {
    %c0_i32 = arith.constant 0 : i32
    %c0_i32_0 = arith.constant 0 : i32
    %c0_i32_1 = arith.constant 0 : i32
    return %c0_i32, %c0_i32_0 : i32, i32
  }
  func.func @transform_11(%arg0: i32) -> (i32, i32, i32) {
    %c0_i32 = arith.constant 0 : i32
    %c0_i32_0 = arith.constant 0 : i32
    %c0_i32_1 = arith.constant 0 : i32
    return %arg0, %c0_i32, %c0_i32_0 : i32, i32, i32
  }
}

</mosaic_0001>

<bundles_post_ra>
// kernel: net_forward.1
= control target key start
LH: loop header
LB: loop body
LE: loop exit
PB: predicated region body
PF: predicated region fallthrough
CT: control target
= control target key end

     0   :  { %16 = vsyncpa [#allocation3], 0  ;;  %s13228_s0 = inlined_call_operand.vmem [shape: f32[2,28,28], index: 0, kind: input, shape index: {}]   ;;  %s13229_s1 = inlined_call_operand.vmem [shape: bf16[5,28,240], index: 1, kind: input, shape index: {}]   ;;  %s13230_s2 = inlined_call_operand.vmem [shape: bf16[5,28,240], index: 2, kind: input, shape index: {}]   ;;  %s13231_s3 = inlined_call_operand.vmem [shape: f32[1,240], index: 3, kind: input, shape index: {}]   ;;  %s13232_s4 = inlined_call_operand.vmem [shape: bf16[5,240,200], index: 4, kind: input, shape index: {}]   ;;  %s13233_s5 = inlined_call_operand.vmem [shape: bf16[5,240,200], index: 5, kind: input, shape index: {}]   ;;  %s13234_s6 = inlined_call_operand.vmem [shape: f32[1,200], index: 6, kind: input, shape index: {}]   ;;  %s13235_s7 = inlined_call_operand.vmem [shape: bf16[4,200,500], index: 7, kind: input, shape index: {}]   ;;  %s13236_s8 = inlined_call_operand.vmem [shape: f32[1,500], index: 8, kind: input, shape index: {}]   ;;  %s13237_s9 = inlined_call_operand.vmem [shape: bf16[500,10], index: 9, kind: input, shape index: {}]   ;;  %s13238_s10 = inlined_call_operand.vmem [shape: f32[1,10], index: 10, kind: input, shape index: {}]   ;;  %s13239_s11 = inlined_call_operand.hbm [shape: f32[2,1,10], index: 11, kind: output, shape index: {}]  }
   0x1   :  { %18 = vsyncpa [#allocation3 + $0x1], 0  ;;  %s9403_s17 = smov 0   ;;  %s9405_s18 = smov 0  }
   0x2   :  { %s9407_s19 = smov 0   ;;  %s9409_s20 = smov 0  }
   0x3 LB: > { %13241 = sst [smem:[#allocation5_spill]] %s9336_s19  ;;  %s9424_s21 = sadd.s32 4294967295, %s9340_s20   ;;  %s9340_s20 = sphi %s9409_s20, %s13253_s20   ;;  %s9336_s19 = sphi %s9407_s19, %s13250_s19   ;;  %s9332_s18 = sphi %s9405_s18, %s13252_s18   ;;  %s9328_s17 = sphi %s9403_s17, %s13251_s17  }
   0x4   : > { %s5903_s22 = sadd.s32 4294967294, %s9340_s20   ;;  %s9428_s23 = sadd.s32 1, %s9340_s20  }
   0x5   : > { %s267_s24 = sadd.s32 1, %s9336_s19  ;;  %s264_s25 = ssub.s32 %s9340_s20, %s9428_s23 }
   0x6   : > { %p277_p0 = scmp.ne.s32.totalorder %s9336_s19, %s9332_s18  ;;  %p265_p1 = scmp.eq.s32.totalorder %s264_s25, 0 }
   0x7   : > { %p278_p2 = scmp.eq.s32.totalorder %s9424_s21, 1  ;;  %p283_p3 = scmp.ne.s32.totalorder %s9332_s18, %s9328_s17 }
   0x8   : > { %p284_p4 = scmp.eq.s32.totalorder %s5903_s22, 1  ;;  %p5906_p7 = scmp.ge.s32.totalorder %s9340_s20, 1 }
   0x9   : > { %s9439_s26 = scalar_select %p265_p1, %s9336_s19, %s267_s24  }
   0xa   : > { %p9441_p5 = por %p278_p2, %p277_p0  ;;  %p9445_p6 = por %p284_p4, %p283_p3 }
   0xb   : > { %13242 = sst [smem:[#allocation6_spill]] %s9439_s26  ;;  %p340_p8 = scmp.lt.s32.totalorder %s9340_s20, 3 }
   0xd   : > { %p341_p9 = pnand %p5906_p7, %p340_p8 }
   0xe   : > { %p379_p10 = scmp.lt.s32.totalorder (!%p341_p9), %s9424_s21, 1  ;;  %s5844_s15 = scalar_lea.hbm (!%p341_p9), %s13239_s11, %s9424_s21 }
   0xf   : > { %344 = sbr.rel (%p341_p9) target bundleno = 1711 (0x6af), region = 64  ;;  %s5848_s24 = sshll.u32 (!%p341_p9), %s5844_s15, 4  ;;  %s5849_s24 = int_to_ptr.hbm [resolvable:$true] %s5848_s24 }
  0x14   : > { %v5943_v0 = vld [vmem:[%s13229_s1 + $0x10] sm:$0xf]  ;;  %v8674_v1 = vld [vmem:[%s13229_s1 + $0x14] sm:$0x30]  ;;  %vm457_vm0 = vcmask 1045504   ;;  %s380_s25 = scalar_select %p379_p10, %s9424_s21, 1 }
  0x15   : > { %v5944_v2 = vor.u32 %v8674_v1, %v5943_v0  ;;  %v8673_v3 = vld [vmem:[%s13229_s1 + $0x14] sm:$0xf]  ;;  %v5945_v4 = vld [vmem:[%s13229_s1 + $0x18] sm:$0x30]  ;;  %v5935_v5 = vld [vmem:[%s13229_s1] sm:$0xf] }
  0x16   : > { %v5948_v6 = vor.u32 %v8673_v3, %v5945_v4  ;;  %v8672_v7 = vld [vmem:[%s13229_s1 + $0x4] sm:$0xf0]  ;;  %v8671_v8 = vld [vmem:[%s13229_s1 + $0x4] sm:$0xf]  ;;  %v5937_v9 = vld [vmem:[%s13229_s1 + $0x8] sm:$0xf0] }
  0x17   : > { %v525_v10 = vsel %vm457_vm0, %v5944_v2, 0  ;;  %v5923_v11 = vld [vmem:[%s13229_s1 + $0x30] sm:$0xf]  ;;  %v8682_v12 = vld [vmem:[%s13229_s1 + $0x34] sm:$0x30]  ;;  %v5936_v14 = vor.u32 %v8672_v7, %v5935_v5  ;;  %v5940_v18 = vor.u32 %v8671_v8, %v5937_v9  ;;  %s8670_s13 = sshll.u32 %s380_s25, 5 }
  0x18   : > { %536 = vmatpush.bf16.msra.mxu2 %v525_v10  ;;  %v528_v13 = vsel %vm457_vm0, %v5948_v6, 0  ;;  %v5924_v15 = vor.u32 %v8682_v12, %v5923_v11  ;;  %v8681_v16 = vld [vmem:[%s13229_s1 + $0x34] sm:$0xf]  ;;  %v5925_v17 = vld [vmem:[%s13229_s1 + $0x38] sm:$0x30]  ;;  %s383_s30 = scalar_lea.vmem %s13228_s0, %s8670_s13  ;;  %vm450_vm1 = vcmask 228352  }
  0x19   : > { %554 = vmatpush.bf16.msra.mxu3 %v528_v13  ;;  %v5928_v19 = vor.u32 %v8681_v16, %v5925_v17  ;;  %v5915_v20 = vld [vmem:[%s13229_s1 + $0x20] sm:$0xf]  ;;  %v8680_v21 = vld [vmem:[%s13229_s1 + $0x24] sm:$0xf0]  ;;  %v8679_v23 = vld [vmem:[%s13229_s1 + $0x24] sm:$0xf] }
  0x1a   : > { %v459_v22 = vsel %vm457_vm0, %v5924_v15, 0  ;;  %v5917_v24 = vld [vmem:[%s13229_s1 + $0x28] sm:$0xf0]  ;;  %v385_v26 = vld [vmem:[%s383_s30] sm:$0xff]  ;;  %v5916_v28 = vor.u32 %v8680_v21, %v5915_v20  ;;  %v387_v30 = vld [vmem:[%s383_s30 + $0x10] sm:$0xff]  ;;  %vm696_vm3 = vcmask 1046528  }
  0x1b   : > { %470 = vmatpush.bf16.msra.mxu0 %v459_v22  ;;  %v462_v25 = vsel %vm457_vm0, %v5928_v19, 0  ;;  %v386_v27 = vld [vmem:[%s383_s30 + $0x8] sm:$0xff]  ;;  %v5920_v29 = vor.u32 %v8679_v23, %v5917_v24  ;;  %v389_v31 = vpack.c.bf16 %v385_v26, %v385_v26  ;;  %v388_v33 = vld [vmem:[%s383_s30 + $0x18] sm:$0xf]  ;;  %v391_v34 = vpack.c.bf16 %v387_v30, %v387_v30  ;;  %v5987_v35 = vld [vmem:[%s13230_s2 + $0x10] sm:$0xf] }
  0x1c   : > { %537 = vmatpush.bf16.msra.mxu2 %v5936_v14  ;;  %488 = vmatpush.bf16.msra.mxu1 %v462_v25  ;;  %v390_v32 = vpack.c.bf16 %v386_v27, %v386_v27  ;;  %v8678_v36 = vld [vmem:[%s13230_s2 + $0x14] sm:$0x30]  ;;  %v392_v37 = vpack.c.bf16 %v388_v33, %v388_v33  ;;  %v8677_v39 = vld [vmem:[%s13230_s2 + $0x14] sm:$0xf]  ;;  %v5989_v40 = vld [vmem:[%s13230_s2 + $0x18] sm:$0x30] }
  0x1d   : > { %555 = vmatpush.bf16.msra.mxu3 %v5940_v18  ;;  %v5988_v38 = vor.u32 %v8678_v36, %v5987_v35  ;;  %v5979_v41 = vld [vmem:[%s13230_s2] sm:$0xf]  ;;  %v410_v42 = vunpack.c.l.b16 %v389_v31  ;;  %v412_v44 = vunpack.c.l.b16 %v391_v34  ;;  %v5992_v45 = vor.u32 %v8677_v39, %v5989_v40  ;;  %v8676_v46 = vld [vmem:[%s13230_s2 + $0x4] sm:$0xf0]  ;;  %v8675_v47 = vld [vmem:[%s13230_s2 + $0x4] sm:$0xf] }
  0x1e   : > { %v411_v43 = vunpack.c.l.b16 %v390_v32  ;;  %v5981_v48 = vld [vmem:[%s13230_s2 + $0x8] sm:$0xf0]  ;;  %v413_v49 = vunpack.c.l.b16 %v392_v37  ;;  %v5967_v51 = vld [vmem:[%s13230_s2 + $0x30] sm:$0xf]  ;;  %v8686_v52 = vld [vmem:[%s13230_s2 + $0x34] sm:$0x30]  ;;  %v5980_v55 = vor.u32 %v8676_v46, %v5979_v41 }
  0x1f   : > { %471 = vmatpush.bf16.msra.mxu0 %v5916_v28  ;;  %v650_v50 = vsel %vm457_vm0, %v5988_v38, 0  ;;  %v653_v54 = vsel %vm457_vm0, %v5992_v45, 0  ;;  %v5968_v56 = vor.u32 %v8686_v52, %v5967_v51  ;;  %v8685_v57 = vld [vmem:[%s13230_s2 + $0x34] sm:$0xf]  ;;  %v5969_v58 = vld [vmem:[%s13230_s2 + $0x38] sm:$0x30]  ;;  %v5984_v60 = vor.u32 %v8675_v47, %v5981_v48 }
  0x20   : > { %v9539_v53 = vpack.c.b16 %v411_v43, %v410_v42  ;;  %489 = vmatpush.bf16.msra.mxu1 %v5920_v29  ;;  %661 = vmatpush.bf16.msrb.mxu2 %v650_v50  ;;  %v9548_v59 = vpack.c.b16 %v413_v49, %v412_v44  ;;  %vm416_vm2 = vsmask.f32 7424  ;;  %v5972_v61 = vor.u32 %v8685_v57, %v5969_v58  ;;  %v5959_v1 = vld [vmem:[%s13230_s2 + $0x20] sm:$0xf]  ;;  %v8684_v5 = vld [vmem:[%s13230_s2 + $0x24] sm:$0xf0] }
  0x21   : > { %679 = vmatpush.bf16.msrb.mxu3 %v653_v54  ;;  %v590_v0 = vsel %vm457_vm0, %v5968_v56, 0  ;;  %v5960_v7 = vor.u32 %v8684_v5, %v5959_v1  ;;  %v8683_v8 = vld [vmem:[%s13230_s2 + $0x24] sm:$0xf]  ;;  %v5961_v9 = vld [vmem:[%s13230_s2 + $0x28] sm:$0xf0]  ;;  %v500_v17 = vpack.c.b16 %v412_v44, %v412_v44  ;;  %vm1196_vm5 = vcmask 1043456  }
  0x22   : > { %5949 = vmatmul.msk.bf16.vlgmr.msra.gmra.mxu2 %vm450_vm1, %v9539_v53  ;;  %5951 = vmatmul.msk.bf16.vlgmr.msra.gmra.mxu3 %vm450_vm1, %v9539_v53  ;;  %v418_v62 = vshrl.u32 %v9539_v53, 16  ;;  %v420_v63 = vshll.u32 %v9539_v53, 16  ;;  %v425_v2 = vshll.u32 %v9548_v59, 16  ;;  %v429_v3 = vshrl.u32 %v9548_v59, 16  ;;  %v6035_v19 = vld [vmem:[%s13230_s2 + $0x50] sm:$0xf] }
  0x23   : > { %601 = vmatpush.bf16.msrb.mxu0 %v590_v0  ;;  %v593_v4 = vsel %vm457_vm0, %v5972_v61, 0  ;;  %v5964_v13 = vor.u32 %v8683_v8, %v5961_v9  ;;  %v8694_v20 = vld [vmem:[%s13230_s2 + $0x54] sm:$0x30]  ;;  %v8693_v21 = vld [vmem:[%s13230_s2 + $0x54] sm:$0xf]  ;;  %v697_v51 = vrot.slane %v9539_v53, 1 }
  0x24   : > { %v422_v6 = vrot.slane %v420_v63, 1  ;;  %662 = vmatpush.bf16.msrb.mxu2 %v5980_v55  ;;  %619 = vmatpush.bf16.msrb.mxu1 %v593_v4  ;;  %v427_v10 = vrot.slane %v425_v2, 1  ;;  %v853_v11 = vrot.slane %v425_v2, 2  ;;  %v852_v12 = vrot.slane %v429_v3, 1  ;;  %v6037_v23 = vld [vmem:[%s13230_s2 + $0x58] sm:$0x30] }
  0x25   : > { %680 = vmatpush.bf16.msrb.mxu3 %v5984_v60  ;;  %v6036_v22 = vor.u32 %v8694_v20, %v6035_v19  ;;  %v6040_v24 = vor.u32 %v8693_v21, %v6037_v23  ;;  %v6027_v25 = vld [vmem:[%s13230_s2 + $0x40] sm:$0xf]  ;;  %v8692_v26 = vld [vmem:[%s13230_s2 + $0x44] sm:$0xf0]  ;;  %v8691_v27 = vld [vmem:[%s13230_s2 + $0x44] sm:$0xf] }
  0x26   : > { %v423_v14 = vor.u32 %v422_v6, %v418_v62  ;;  %v9576_v15 = vor.u32 %v853_v11, %v852_v12  ;;  %v431_v18 = vor.u32 %v429_v3, %v427_v10  ;;  %v6029_v29 = vld [vmem:[%s13230_s2 + $0x48] sm:$0xf0]  ;;  %v6011_v30 = vld [vmem:[%s13229_s1 + $0x50] sm:$0xf]  ;;  %v6028_v32 = vor.u32 %v8692_v26, %v6027_v25  ;;  %v8690_v33 = vld [vmem:[%s13229_s1 + $0x54] sm:$0x30] }
  0x27   : > { %602 = vmatpush.bf16.msrb.mxu0 %v5960_v7  ;;  %v796_v28 = vsel %vm457_vm0, %v6036_v22, 0  ;;  %v799_v31 = vsel %vm457_vm0, %v6040_v24, 0  ;;  %v8689_v34 = vld [vmem:[%s13229_s1 + $0x54] sm:$0xf]  ;;  %v6032_v35 = vor.u32 %v8691_v27, %v6029_v29  ;;  %v6012_v36 = vor.u32 %v8690_v33, %v6011_v30  ;;  %v6013_v37 = vld [vmem:[%s13229_s1 + $0x58] sm:$0x30] }
  0x28   : > { %v428_v16 = vsel %vm416_vm2, %v423_v14, %v427_v10  ;;  %620 = vmatpush.bf16.msrb.mxu1 %v5964_v13  ;;  %807 = vmatpush.bf16.msra.mxu2 %v796_v28  ;;  %v6016_v38 = vor.u32 %v8689_v34, %v6013_v37  ;;  %v6003_v41 = vld [vmem:[%s13229_s1 + $0x40] sm:$0xf]  ;;  %v8688_v42 = vld [vmem:[%s13229_s1 + $0x44] sm:$0xf0]  ;;  %v8687_v43 = vld [vmem:[%s13229_s1 + $0x44] sm:$0xf] }
  0x29   : > { %5929 = vmatmul.msk.bf16.vlgmr.msra.gmra.mxu0 %vm450_vm1, %v428_v16  ;;  %5931 = vmatmul.msk.bf16.vlgmr.msra.gmra.mxu1 %vm450_vm1, %v428_v16  ;;  %v725_v39 = vsel %vm457_vm0, %v6012_v36, 0  ;;  %v6004_v44 = vor.u32 %v8688_v42, %v6003_v41  ;;  %v6005_v45 = vld [vmem:[%s13229_s1 + $0x48] sm:$0xf0]  ;;  %v6083_v47 = vld [vmem:[%s13230_s2 + $0x70] sm:$0xf]  ;;  %v849_v50 = vrot.slane %v418_v62, 1 }
  0x2a   : > { %825 = vmatpush.bf16.msra.mxu3 %v799_v31  ;;  %v728_v40 = vsel %vm457_vm0, %v6016_v38, 0  ;;  %v6008_v46 = vor.u32 %v8687_v43, %v6005_v45  ;;  %v8702_v48 = vld [vmem:[%s13230_s2 + $0x74] sm:$0x30]  ;;  %v8701_v49 = vld [vmem:[%s13230_s2 + $0x74] sm:$0xf]  ;;  %v850_v0 = vrot.slane %v420_v63, 2 }
  0x2b   : > { %736 = vmatpush.bf16.msra.mxu0 %v725_v39  ;;  %v6084_v52 = vor.u32 %v8702_v48, %v6083_v47  ;;  %v6085_v54 = vld [vmem:[%s13230_s2 + $0x78] sm:$0x30]  ;;  %v6075_v56 = vld [vmem:[%s13230_s2 + $0x60] sm:$0xf]  ;;  %v8700_v57 = vld [vmem:[%s13230_s2 + $0x64] sm:$0xf0] }
  0x2c   : > { %808 = vmatpush.bf16.msra.mxu2 %v6028_v32  ;;  %754 = vmatpush.bf16.msra.mxu1 %v728_v40  ;;  %v6088_v55 = vor.u32 %v8701_v49, %v6085_v54  ;;  %v8699_v58 = vld [vmem:[%s13230_s2 + $0x64] sm:$0xf]  ;;  %v6077_v61 = vld [vmem:[%s13230_s2 + $0x68] sm:$0xf0]  ;;  %v6059_v62 = vld [vmem:[%s13229_s1 + $0x70] sm:$0xf]  ;;  %v6076_v3 = vor.u32 %v8700_v57, %v6075_v56  ;;  %v851_v8 = vor.u32 %v850_v0, %v849_v50 }
  0x2d   : > { %v952_v60 = vsel %vm457_vm0, %v6084_v52, 0  ;;  %v698_v1 = vrot.slane %v9548_v59, 1  ;;  %v8698_v4 = vld [vmem:[%s13229_s1 + $0x74] sm:$0x30]  ;;  %v8697_v5 = vld [vmem:[%s13229_s1 + $0x74] sm:$0xf]  ;;  %v6080_v6 = vor.u32 %v8699_v58, %v6077_v61 }
  0x2e   : > { %826 = vmatpush.bf16.msra.mxu3 %v6032_v35  ;;  %v955_v2 = vsel %vm457_vm0, %v6088_v55, 0  ;;  %v6060_v7 = vor.u32 %v8698_v4, %v6059_v62  ;;  %v6061_v63 = vld [vmem:[%s13229_s1 + $0x78] sm:$0x30]  ;;  %vm848_vm4 = vsmask.f32 6400  ;;  %v1005_v49 = vrot.slane %v9539_v53, 2 }
  0x2f   : > { %737 = vmatpush.bf16.msra.mxu0 %v6004_v44  ;;  %v6064_v9 = vor.u32 %v8697_v5, %v6061_v63  ;;  %v855_v11 = vsel %vm848_vm4, %v851_v8, %v9576_v15  ;;  %v699_v12 = vsel %vm696_vm3, %v697_v51, %v698_v1  ;;  %v6051_v14 = vld [vmem:[%s13229_s1 + $0x60] sm:$0xf]  ;;  %v6053_v19 = vld [vmem:[%s13229_s1 + $0x68] sm:$0xf0]  ;;  %v6131_v21 = vld [vmem:[%s13230_s2 + $0x90] sm:$0xf] }
  0x30   : > { %755 = vmatpush.bf16.msra.mxu1 %v6008_v46  ;;  %v881_v10 = vsel %vm457_vm0, %v6060_v7, 0  ;;  %v8710_v22 = vld [vmem:[%s13230_s2 + $0x94] sm:$0x30]  ;;  %v8709_v23 = vld [vmem:[%s13230_s2 + $0x94] sm:$0xf]  ;;  %v1006_v50 = vrot.slane %v9548_v59, 2 }
  0x31   : > { %v884_v13 = vsel %vm457_vm0, %v6064_v9, 0  ;;  %v6132_v24 = vor.u32 %v8710_v22, %v6131_v21  ;;  %v6133_v25 = vld [vmem:[%s13230_s2 + $0x98] sm:$0x30]  ;;  %v6123_v27 = vld [vmem:[%s13230_s2 + $0x80] sm:$0xf]  ;;  %vm1192_vm10 = vcmask 195584  }
  0x32   : > { %5950 = vmatmul.msk.bf16.gmra.mxu2 %vm450_vm1, %v500_v17  ;;  %5952 = vmatmul.msk.bf16.gmra.mxu3 %vm450_vm1, %v500_v17  ;;  %v6136_v26 = vor.u32 %v8709_v23, %v6133_v25  ;;  %v8708_v28 = vld [vmem:[%s13230_s2 + $0x84] sm:$0xf0]  ;;  %v8707_v29 = vld [vmem:[%s13230_s2 + $0x84] sm:$0xf]  ;;  %v6125_v31 = vld [vmem:[%s13230_s2 + $0x88] sm:$0xf0]  ;;  %v1007_v51 = vsel %vm457_vm0, %v1005_v49, %v1006_v50 }
  0x33   : > { %v1104_v30 = vsel %vm457_vm0, %v6132_v24, 0  ;;  %v6107_v32 = vld [vmem:[%s13229_s1 + $0x90] sm:$0xf]  ;;  %v6124_v34 = vor.u32 %v8708_v28, %v6123_v27  ;;  %v8706_v35 = vld [vmem:[%s13229_s1 + $0x94] sm:$0x30]  ;;  %v6128_v37 = vor.u32 %v8707_v29, %v6125_v31  ;;  %vm1532_vm11 = vcmask 916480  }
  0x34   : > { %v1107_v33 = vsel %vm457_vm0, %v6136_v26, 0  ;;  %v8705_v36 = vld [vmem:[%s13229_s1 + $0x94] sm:$0xf]  ;;  %v6108_v38 = vor.u32 %v8706_v35, %v6107_v32  ;;  %v6109_v39 = vld [vmem:[%s13229_s1 + $0x98] sm:$0x30]  ;;  %vm3677_vm12 = vcmask 64512  }
  0x35   : > { %v6112_v40 = vor.u32 %v8705_v36, %v6109_v39  ;;  %v6099_v43 = vld [vmem:[%s13229_s1 + $0x80] sm:$0xf]  ;;  %v8704_v44 = vld [vmem:[%s13229_s1 + $0x84] sm:$0xf0]  ;;  %v8703_v45 = vld [vmem:[%s13229_s1 + $0x84] sm:$0xf] }
  0x36   : > { %v1033_v41 = vsel %vm457_vm0, %v6108_v38, 0  ;;  %v6100_v46 = vor.u32 %v8704_v44, %v6099_v43  ;;  %v6101_v47 = vld [vmem:[%s13229_s1 + $0x88] sm:$0xf0]  ;;  %vm4052_vm13 = vcmask 588800   ;;  %vm4179_vm14 = vcmask 1040384   ;;  %s377_s13 = sand.u32 1, %s9332_s18  }
  0x37   : > { %v1036_v42 = vsel %vm457_vm0, %v6112_v40, 0  ;;  %v6104_v48 = vor.u32 %v8703_v45, %v6101_v47  ;;  %vm4181_vm15 = vcmask 1042434   ;;  %vm4183_vm0 = vcmask 1041408   ;;  %s378_s16 = scalar_lea.vmem [#allocation2], %s377_s13  ;;  %s5836_s29 = scalar_lea.sflag [#allocation3], %s377_s13 }
  0x38   : > { %vm5821_vm2 = vcmask 73728   ;;  %s5846_s22 = sshll.u32 %s378_s16, 4  ;;  %s9292_s30 = sshra.s32 %s5849_s24, 4  ;;  %s5847_s22 = int_to_ptr.vmem [resolvable:$true] %s5846_s22  ;;  %s9293_s30 = int_to_ptr.hbm [resolvable:$true] %s9292_s30 }
  0x39   : > { %5930 = vmatmul.msk.bf16.gmra.mxu0 %vm450_vm1, %v431_v18  ;;  %5932 = vmatmul.msk.bf16.gmra.mxu1 %vm450_vm1, %v431_v18  ;;  %s9294_s26 = scalar_lea.hbm %s9293_s30, 1  ;;  %s9298_s25 = scalar_lea.hbm %s13239_s11, 2 }
  0x3a   : > { %p9295_p11 = scmp.ne.s32.totalorder %s9293_s30, %s9294_s26  ;;  %p9299_p0 = scmp.lt.s32.totalorder %s9293_s30, %s13239_s11 }
  0x3b   : > { %p9300_p1 = scmp.lt.s32.totalorder %s9298_s25, %s9294_s26 }
  0x3c   : > { %p9296_p12 = pnand %p9295_p11, %p9441_p5 }
  0x3d   : > { %p9301_p2 = por %p9300_p1, %p9299_p0 }
  0x3e   : > { %p9297_p13 = pneg %p9296_p12 }
  0x40   : > { %p9302_p3 = pnand %p9301_p2, %p9297_p13 }
  0x42   : > { %5993 = vmatmul.msk.bf16.vlgmr.msrb.gmra.mxu2 %vm450_vm1, %v9539_v53  ;;  %5995 = vmatmul.msk.bf16.vlgmr.msrb.gmra.mxu3 %vm450_vm1, %v9539_v53 }
  0x43   : > { %963 = vmatpush.bf16.msrb.mxu2 %v952_v60  ;;  %981 = vmatpush.bf16.msrb.mxu3 %v955_v2 }
  0x47   : > { %964 = vmatpush.bf16.msrb.mxu2 %v6076_v3  ;;  %982 = vmatpush.bf16.msrb.mxu3 %v6080_v6 }
  0x49   : > { %5973 = vmatmul.msk.bf16.vlgmr.msrb.gmra.mxu0 %vm450_vm1, %v428_v16  ;;  %5975 = vmatmul.msk.bf16.vlgmr.msrb.gmra.mxu1 %vm450_vm1, %v428_v16  ;;  %v8696_v16 = vld [vmem:[%s13229_s1 + $0x64] sm:$0xf0] }
  0x4a   : > { %892 = vmatpush.bf16.msrb.mxu0 %v881_v10  ;;  %910 = vmatpush.bf16.msrb.mxu1 %v884_v13 }
  0x52   : > { %5994 = vmatmul.msk.bf16.gmra.mxu2 %vm450_vm1, %v500_v17  ;;  %5996 = vmatmul.msk.bf16.gmra.mxu3 %vm450_vm1, %v500_v17  ;;  %v8695_v17 = vld [vmem:[%s13229_s1 + $0x64] sm:$0xf] }
  0x53   : > { %v6056_v20 = vor.u32 %v8695_v17, %v6053_v19 }
  0x55   : > { %911 = vmatpush.bf16.msrb.mxu1 %v6056_v20 }
  0x59   : > { %5974 = vmatmul.msk.bf16.gmra.mxu0 %vm450_vm1, %v431_v18  ;;  %5976 = vmatmul.msk.bf16.gmra.mxu1 %vm450_vm1, %v431_v18  ;;  %v6052_v18 = vor.u32 %v8696_v16, %v6051_v14 }
  0x5b   : > { %893 = vmatpush.bf16.msrb.mxu0 %v6052_v18 }
  0x62   : > { %6041 = vmatmul.msk.bf16.vlgmr.msra.gmra.mxu2 %vm450_vm1, %v699_v12  ;;  %6043 = vmatmul.msk.bf16.vlgmr.msra.gmra.mxu3 %vm450_vm1, %v699_v12 }
  0x63   : > { %1115 = vmatpush.bf16.msra.mxu2 %v1104_v30  ;;  %1133 = vmatpush.bf16.msra.mxu3 %v1107_v33 }
  0x67   : > { %1116 = vmatpush.bf16.msra.mxu2 %v6124_v34  ;;  %1134 = vmatpush.bf16.msra.mxu3 %v6128_v37 }
  0x69   : > { %6017 = vmatmul.msk.bf16.vlgmr.msra.gmra.mxu0 %vm450_vm1, %v699_v12  ;;  %6019 = vmatmul.msk.bf16.vlgmr.msra.gmra.mxu1 %vm450_vm1, %v699_v12 }
  0x6a   : > { %1044 = vmatpush.bf16.msra.mxu0 %v1033_v41  ;;  %1062 = vmatpush.bf16.msra.mxu1 %v1036_v42 }
  0x6e   : > { %1045 = vmatpush.bf16.msra.mxu0 %v6100_v46  ;;  %1063 = vmatpush.bf16.msra.mxu1 %v6104_v48 }
  0x72   : > { %6042 = vmatmul.msk.bf16.gmra.mxu2 %vm450_vm1, %v698_v1  ;;  %6044 = vmatmul.msk.bf16.gmra.mxu3 %vm450_vm1, %v698_v1 }
  0x79   : > { %6018 = vmatmul.msk.bf16.gmra.mxu0 %vm450_vm1, %v698_v1  ;;  %6020 = vmatmul.msk.bf16.gmra.mxu1 %vm450_vm1, %v698_v1 }
  0x82   : > { %6089 = vmatmul.msk.bf16.vlgmr.msrb.gmra.mxu2 %vm450_vm1, %v855_v11  ;;  %6091 = vmatmul.msk.bf16.vlgmr.msrb.gmra.mxu3 %vm450_vm1, %v855_v11 }
  0x89   : > { %6065 = vmatmul.msk.bf16.vlgmr.msrb.gmra.mxu0 %vm450_vm1, %v855_v11  ;;  %6067 = vmatmul.msk.bf16.vlgmr.msrb.gmra.mxu1 %vm450_vm1, %v855_v11 }
  0x92   : > { %6090 = vmatmul.msk.bf16.gmra.mxu2 %vm450_vm1, %v9576_v15  ;;  %6092 = vmatmul.msk.bf16.gmra.mxu3 %vm450_vm1, %v9576_v15 }
  0x99   : > { %6066 = vmatmul.msk.bf16.gmra.mxu0 %vm450_vm1, %v9576_v15  ;;  %6068 = vmatmul.msk.bf16.gmra.mxu1 %vm450_vm1, %v9576_v15 }
  0xa2   : > { %6137 = vmatmul.msk.bf16.vlgmr.msra.gmra.mxu2 %vm450_vm1, %v1007_v51  ;;  %6139 = vmatmul.msk.bf16.vlgmr.msra.gmra.mxu3 %vm450_vm1, %v1007_v51 }
  0xa5   : > { %v539_v52 = vpop.f32.mrf.mxu2  ;;  %v557_v54 = vpop.f32.mrf.mxu3 }
  0xa6   : > { %v473_v55 = vpop.f32.mrf.mxu0  ;;  %v491_v56 = vpop.f32.mrf.mxu1 }
  0xa7   : > { %v540_v57 = vadd.f32 %v539_v52, %v473_v55  ;;  %v558_v58 = vadd.f32 %v557_v54, %v491_v56 }
  0xa9   : > { %6113 = vmatmul.msk.bf16.vlgmr.msra.gmra.mxu0 %vm450_vm1, %v1007_v51  ;;  %6115 = vmatmul.msk.bf16.vlgmr.msra.gmra.mxu1 %vm450_vm1, %v1007_v51 }
  0xad   : > { %v9786_v15 = vpop.f32.mrf.mxu2  ;;  %v9788_v53 = vpop.f32.mrf.mxu3 }
  0xae   : > { %v9790_v59 = vpop.f32.mrf.mxu0  ;;  %v9792_v60 = vpop.f32.mrf.mxu1 }
  0xb2   : > { %6138 = vmatmul.msk.bf16.gmra.mxu2 %vm450_vm1, %v1006_v50  ;;  %6140 = vmatmul.msk.bf16.gmra.mxu3 %vm450_vm1, %v1006_v50 }
  0xb5   : > { %v544_v61 = vpop.f32.mrf.mxu2  ;;  %v562_v62 = vpop.f32.mrf.mxu3 }
  0xb6   : > { %v478_v0 = vpop.f32.mrf.mxu0  ;;  %v496_v1 = vpop.f32.mrf.mxu1 }
  0xb7   : > { %v9796_v2 = vadd.f32 %v544_v61, %v478_v0  ;;  %v9798_v3 = vadd.f32 %v562_v62, %v496_v1 }
  0xb9   : > { %6114 = vmatmul.msk.bf16.gmra.mxu0 %vm450_vm1, %v1006_v50  ;;  %6116 = vmatmul.msk.bf16.gmra.mxu1 %vm450_vm1, %v1006_v50  ;;  %vm5762_vm1 = vcmask 949248  }
  0xbd   : > { %v546_v4 = vpop.f32.mrf.mxu2  ;;  %v564_v5 = vpop.f32.mrf.mxu3 }
  0xbe   : > { %v480_v6 = vpop.f32.mrf.mxu0  ;;  %v498_v7 = vpop.f32.mrf.mxu1 }
  0xc5   : > { %v664_v63 = vpop.f32.mrf.mxu2  ;;  %v682_v8 = vpop.f32.mrf.mxu3 }
  0xc6   : > { %v604_v9 = vpop.f32.mrf.mxu0  ;;  %v622_v10 = vpop.f32.mrf.mxu1 }
  0xc7   : > { %v665_v11 = vadd.f32 %v664_v63, %v604_v9  ;;  %v683_v12 = vadd.f32 %v682_v8, %v622_v10 }
  0xcd   : > { %v9802_v13 = vpop.f32.mrf.mxu2  ;;  %v9804_v14 = vpop.f32.mrf.mxu3 }
  0xce   : > { %v9806_v16 = vpop.f32.mrf.mxu0  ;;  %v9808_v17 = vpop.f32.mrf.mxu1 }
  0xd5   : > { %v669_v18 = vpop.f32.mrf.mxu2  ;;  %v687_v19 = vpop.f32.mrf.mxu3 }
  0xd6   : > { %v609_v20 = vpop.f32.mrf.mxu0  ;;  %v627_v21 = vpop.f32.mrf.mxu1 }
  0xd7   : > { %v9810_v22 = vadd.f32 %v669_v18, %v609_v20  ;;  %v9812_v23 = vadd.f32 %v687_v19, %v627_v21 }
  0xdd   : > { %v671_v24 = vpop.f32.mrf.mxu2  ;;  %v689_v25 = vpop.f32.mrf.mxu3 }
  0xde   : > { %v611_v26 = vpop.f32.mrf.mxu0  ;;  %v629_v27 = vpop.f32.mrf.mxu1 }
  0xdf   : > { %v1173_v26 = vlaneseq }
  0xe5   : > { %v810_v28 = vpop.f32.mrf.mxu2  ;;  %v828_v29 = vpop.f32.mrf.mxu3 }
  0xe6   : > { %v837_v30 = vadd.f32 %v810_v28, %v665_v11  ;;  %v838_v31 = vadd.f32 %v828_v29, %v683_v12  ;;  %v739_v32 = vpop.f32.mrf.mxu0  ;;  %v757_v33 = vpop.f32.mrf.mxu1  ;;  %v1174_v29 = vshrl.u32 %v1173_v26, 7 }
  0xe7   : > { %v766_v34 = vadd.f32 %v739_v32, %v540_v57  ;;  %v767_v35 = vadd.f32 %v757_v33, %v558_v58  ;;  %v542_v33 = vadd.f32 %v9786_v15, %v9790_v59 }
  0xed   : > { %v812_v36 = vpop.f32.mrf.mxu2  ;;  %v830_v37 = vpop.f32.mrf.mxu3 }
  0xee   : > { %v741_v38 = vpop.f32.mrf.mxu0  ;;  %v759_v39 = vpop.f32.mrf.mxu1 }
  0xf5   : > { %v815_v40 = vpop.f32.mrf.mxu2  ;;  %v833_v41 = vpop.f32.mrf.mxu3 }
  0xf6   : > { %v744_v42 = vpop.f32.mrf.mxu0  ;;  %v762_v43 = vpop.f32.mrf.mxu1 }
  0xfd   : > { %v817_v44 = vpop.f32.mrf.mxu2  ;;  %v835_v45 = vpop.f32.mrf.mxu3 }
  0xfe   : > { %v746_v46 = vpop.f32.mrf.mxu0  ;;  %v764_v47 = vpop.f32.mrf.mxu1 }
  0xff   : > { %v768_v46 = vadd.f32 %v741_v38, %v542_v33 }
 0x105   : > { %v966_v48 = vpop.f32.mrf.mxu2  ;;  %v984_v49 = vpop.f32.mrf.mxu3 }
 0x106   : > { %v895_v50 = vpop.f32.mrf.mxu0  ;;  %v913_v51 = vpop.f32.mrf.mxu1  ;;  %v993_v6 = vadd.f32 %v966_v48, %v837_v30  ;;  %v994_v7 = vadd.f32 %v984_v49, %v838_v31  ;;  %v667_v30 = vadd.f32 %v9802_v13, %v9806_v16  ;;  %v1175_v48 = vadd.s32 8, %v1174_v29 }
 0x107   : > { %v922_v63 = vadd.f32 %v895_v50, %v766_v34  ;;  %v923_v8 = vadd.f32 %v913_v51, %v767_v35  ;;  %v560_v34 = vadd.f32 %v9788_v53, %v9792_v60  ;;  %v685_v35 = vadd.f32 %v9804_v14, %v9808_v17 }
 0x108   : > { %v839_v44 = vadd.f32 %v812_v36, %v667_v30  ;;  %v841_v49 = vadd.f32 %v815_v40, %v9810_v22  ;;  %v842_v13 = vadd.f32 %v833_v41, %v9812_v23  ;;  %v770_v16 = vadd.f32 %v744_v42, %v9796_v2  ;;  %v1157_v2 = vld [vmem:[%s13231_s3] sm:$0x3] }
 0x109   : > { %v840_v45 = vadd.f32 %v830_v37, %v685_v35  ;;  %v769_v47 = vadd.f32 %v759_v39, %v560_v34  ;;  %v771_v50 = vadd.f32 %v762_v43, %v9798_v3  ;;  %v1179_v22 = vmul.u32 2, %v1175_v48  ;;  %v6289_v35 = vld [vmem:[%s13232_s4 + $0x1d0] sm:$0xf] }
 0x10d   : > { %v968_v52 = vpop.f32.mrf.mxu2  ;;  %v986_v54 = vpop.f32.mrf.mxu3 }
 0x10e   : > { %v897_v55 = vpop.f32.mrf.mxu0  ;;  %v915_v56 = vpop.f32.mrf.mxu1  ;;  %v995_v15 = vadd.f32 %v968_v52, %v839_v44  ;;  %v996_v59 = vadd.f32 %v986_v54, %v840_v45  ;;  %v8800_v44 = vld [vmem:[%s13232_s4 + $0x1d4] sm:$0xf0] }
 0x10f   : > { %v924_v51 = vadd.f32 %v897_v55, %v768_v46  ;;  %v925_v53 = vadd.f32 %v915_v56, %v769_v47  ;;  %v1177_v55 = vand.u32 127, %v1173_v26  ;;  %v1159_v56 = vperm.slane %v1157_v2, 0  ;;  %v6267_v26 = vld [vmem:[%s13232_s4 + $0x1a8] sm:$0xf0] }
 0x110   : > { %v9342_v47 = vmov 0.0  }
 0x111   : > { %vm9845_vm7 = vcmp.eq.s32.totalorder %v1177_v55, %v1179_v22 }
 0x115   : > { %v971_v57 = vpop.f32.mrf.mxu2  ;;  %v989_v58 = vpop.f32.mrf.mxu3 }
 0x116   : > { %v900_v61 = vpop.f32.mrf.mxu0  ;;  %v918_v62 = vpop.f32.mrf.mxu1  ;;  %v997_v60 = vadd.f32 %v971_v57, %v841_v49  ;;  %v1160_v57 = vperm.slane %v1157_v2, 1  ;;  %v1183_v49 = vsel %vm9845_vm7, 1.0, %v9342_v47  ;;  %v8797_v2 = vld [vmem:[%s13232_s4 + $0x1c4] sm:$0xf] }
 0x117   : > { %v926_v14 = vadd.f32 %v900_v61, %v770_v16  ;;  %v927_v17 = vadd.f32 %v918_v62, %v771_v50  ;;  %v6290_v16 = vor.u32 %v8800_v44, %v6289_v35  ;;  %v6235_v50 = vld [vmem:[%s13232_s4 + $0x168] sm:$0xf0] }
 0x118   : > { %v6203_v44 = vld [vmem:[%s13232_s4 + $0x128] sm:$0xf0] }
 0x11d   : > { %v973_v0 = vpop.f32.mrf.mxu2  ;;  %v991_v1 = vpop.f32.mrf.mxu3 }
 0x11e   : > { %v902_v4 = vpop.f32.mrf.mxu0  ;;  %v920_v5 = vpop.f32.mrf.mxu1  ;;  %v998_v0 = vadd.f32 %v989_v58, %v842_v13  ;;  %v1178_v1 = vmul.u32 2, %v1174_v29 }
 0x120   : > { %v1185_v5 = vadd.s32 1, %v1178_v1  ;;  %vm9841_vm6 = vcmp.eq.s32.totalorder %v1177_v55, %v1178_v1 }
 0x121   : > { %v9871_v48 = vsel %vm9841_vm6, 1.0, %v9342_v47 }
 0x122   : > { %vm1187_vm8 = vcmp.eq.s32.totalorder %v1177_v55, %v1185_v5  ;;  %v8794_v5 = vld [vmem:[%s13232_s4 + $0x1a4] sm:$0xf0] }
 0x123   : > { %v9876_v13 = vsel %vm1187_vm8, 1.0, %v9342_v47 }
 0x125   : > { %v1118_v9 = vpop.f32.mrf.mxu2  ;;  %v1136_v10 = vpop.f32.mrf.mxu3 }
 0x126   : > { %v9814_v11 = vadd.f32 %v1118_v9, %v993_v6  ;;  %v9816_v12 = vadd.f32 %v1136_v10, %v994_v7  ;;  %v1047_v18 = vpop.f32.mrf.mxu0  ;;  %v1065_v19 = vpop.f32.mrf.mxu1  ;;  %v1186_v6 = vadd.s32 1, %v1179_v22  ;;  %v6227_v22 = vld [vmem:[%s13232_s4 + $0x158] sm:$0xf0] }
 0x127   : > { %v9818_v20 = vadd.f32 %v1047_v18, %v922_v63  ;;  %v9820_v21 = vadd.f32 %v1065_v19, %v923_v8 }
 0x128   : > { %vm1188_vm9 = vcmp.eq.s32.totalorder %v1177_v55, %v1186_v6 }
 0x129   : > { %v1151_v24 = vmax.f32 %v9818_v20, %v9814_v11  ;;  %v1152_v25 = vmax.f32 %v9820_v21, %v9816_v12  ;;  %v1190_v11 = vsel %vm1188_vm9, 1.0, %v9342_v47  ;;  %v6225_v12 = vld [vmem:[%s13232_s4 + $0x150] sm:$0xf]  ;;  %v8785_v20 = vld [vmem:[%s13232_s4 + $0x164] sm:$0xf] }
 0x12a   : > { %v8776_v47 = vld [vmem:[%s13232_s4 + $0x114] sm:$0xf0] }
 0x12b   : > { %v1163_v45 = vadd.f32 %v1159_v56, %v1151_v24  ;;  %v1164_v46 = vadd.f32 %v1160_v57, %v1152_v25 }
 0x12d   : > { %v1120_v27 = vpop.f32.mrf.mxu2  ;;  %v1138_v28 = vpop.f32.mrf.mxu3 }
 0x12e   : > { %v1049_v31 = vpop.f32.mrf.mxu0  ;;  %v1067_v32 = vpop.f32.mrf.mxu1  ;;  %v1147_v36 = vadd.f32 %v1120_v27, %v995_v15  ;;  %v1148_v37 = vadd.f32 %v1138_v28, %v996_v59  ;;  %v8799_v15 = vld [vmem:[%s13232_s4 + $0x1d4] sm:$0xf]  ;;  %v6291_v59 = vld [vmem:[%s13232_s4 + $0x1d8] sm:$0xf0] }
 0x12f   : > { %v1076_v23 = vadd.f32 %v1049_v31, %v924_v51  ;;  %v1077_v3 = vadd.f32 %v1067_v32, %v925_v53  ;;  %v6233_v31 = vld [vmem:[%s13232_s4 + $0x160] sm:$0xf]  ;;  %v8786_v32 = vld [vmem:[%s13232_s4 + $0x164] sm:$0xf0]  ;;  %v1184_v51 = vpack.c.bf16 %v1183_v49, %v9871_v48  ;;  %v8784_v53 = vld [vmem:[%s13232_s4 + $0x154] sm:$0xf0] }
 0x130   : > { %v6234_v25 = vor.u32 %v8786_v32, %v6233_v31  ;;  %v6193_v31 = vld [vmem:[%s13232_s4 + $0x110] sm:$0xf]  ;;  %v8777_v32 = vld [vmem:[%s13232_s4 + $0x124] sm:$0xf]  ;;  %v6249_v49 = vld [vmem:[%s13232_s4 + $0x180] sm:$0xf] }
 0x131   : > { %v1153_v62 = vmax.f32 %v1076_v23, %v1147_v36  ;;  %v1154_v4 = vmax.f32 %v1077_v3, %v1148_v37  ;;  %v6217_v36 = vld [vmem:[%s13232_s4 + $0x140] sm:$0xf]  ;;  %v8783_v37 = vld [vmem:[%s13232_s4 + $0x154] sm:$0xf]  ;;  %v6283_v23 = vld [vmem:[%s13232_s4 + $0x1c8] sm:$0xf0] }
 0x132   : > { %v8782_v3 = vld [vmem:[%s13232_s4 + $0x144] sm:$0xf0] }
 0x133   : > { %v1165_v27 = vadd.f32 %v1159_v56, %v1153_v62  ;;  %v1166_v28 = vadd.f32 %v1160_v57, %v1154_v4  ;;  %v6218_v55 = vor.u32 %v8782_v3, %v6217_v36  ;;  %v8780_v62 = vld [vmem:[%s13232_s4 + $0x134] sm:$0xf0]  ;;  %v6265_v4 = vld [vmem:[%s13232_s4 + $0x1a0] sm:$0xf] }
 0x134   : > { %v8726_v3 = vld [vmem:[%s13232_s4 + $0x74] sm:$0xf0] }
 0x135   : > { %v1123_v38 = vpop.f32.mrf.mxu2  ;;  %v1141_v39 = vpop.f32.mrf.mxu3  ;;  %v1169_v21 = vpack.c.bf16 %v1165_v27, %v1163_v45  ;;  %v1170_v24 = vpack.c.bf16 %v1166_v28, %v1164_v46  ;;  %v8778_v27 = vld [vmem:[%s13232_s4 + $0x124] sm:$0xf0]  ;;  %v6257_v28 = vld [vmem:[%s13232_s4 + $0x190] sm:$0xf]  ;;  %v8791_v45 = vld [vmem:[%s13232_s4 + $0x194] sm:$0xf] }
 0x136   : > { %v1149_v40 = vadd.f32 %v1123_v38, %v997_v60  ;;  %v1150_v41 = vadd.f32 %v1141_v39, %v998_v0  ;;  %v1052_v42 = vpop.f32.mrf.mxu0  ;;  %v1070_v43 = vpop.f32.mrf.mxu1  ;;  %v6281_v60 = vld [vmem:[%s13232_s4 + $0x1c0] sm:$0xf]  ;;  %v8798_v0 = vld [vmem:[%s13232_s4 + $0x1c4] sm:$0xf0]  ;;  %v6294_v38 = vor.u32 %v8799_v15, %v6291_v59  ;;  %v6226_v39 = vor.u32 %v8784_v53, %v6225_v12  ;;  %v6259_v46 = vld [vmem:[%s13232_s4 + $0x198] sm:$0xf0] }
 0x137   : > { %v1078_v52 = vadd.f32 %v1052_v42, %v926_v14  ;;  %v1079_v54 = vadd.f32 %v1070_v43, %v927_v17  ;;  %v1191_v14 = vpack.c.bf16 %v1190_v11, %v9876_v13  ;;  %v6238_v17 = vor.u32 %v8785_v20, %v6235_v50  ;;  %v6209_v43 = vld [vmem:[%s13232_s4 + $0x130] sm:$0xf]  ;;  %v8790_v11 = vld [vmem:[%s13232_s4 + $0x184] sm:$0xf0]  ;;  %v6185_v20 = vld [vmem:[%s13232_s4 + $0x100] sm:$0xf] }
 0x138   : > { %v6282_v1 = vor.u32 %v8798_v0, %v6281_v60  ;;  %v6230_v42 = vor.u32 %v8783_v37, %v6227_v22  ;;  %v6206_v12 = vor.u32 %v8777_v32, %v6203_v44  ;;  %v6195_v50 = vld [vmem:[%s13232_s4 + $0x118] sm:$0xf0]  ;;  %v8789_v15 = vld [vmem:[%s13232_s4 + $0x184] sm:$0xf]  ;;  %v6251_v59 = vld [vmem:[%s13232_s4 + $0x188] sm:$0xf0] }
 0x139   : > { %v1155_v58 = vmax.f32 %v1078_v52, %v1149_v40  ;;  %v1156_v61 = vmax.f32 %v1079_v54, %v1150_v41  ;;  %v6273_v40 = vld [vmem:[%s13232_s4 + $0x1b0] sm:$0xf]  ;;  %v8796_v41 = vld [vmem:[%s13232_s4 + $0x1b4] sm:$0xf0]  ;;  %v8781_v52 = vld [vmem:[%s13232_s4 + $0x144] sm:$0xf]  ;;  %v6286_v54 = vor.u32 %v8797_v2, %v6283_v23 }
 0x13a   : > { %v6241_v53 = vld [vmem:[%s13232_s4 + $0x170] sm:$0xf]  ;;  %v8788_v60 = vld [vmem:[%s13232_s4 + $0x174] sm:$0xf0]  ;;  %v8773_v37 = vld [vmem:[%s13232_s4 + $0x104] sm:$0xf] }
 0x13b   : > { %v1167_v7 = vadd.f32 %v1159_v56, %v1155_v58  ;;  %v1168_v63 = vadd.f32 %v1160_v57, %v1156_v61  ;;  %v6274_v56 = vor.u32 %v8796_v41, %v6273_v40  ;;  %v6219_v57 = vld [vmem:[%s13232_s4 + $0x148] sm:$0xf0]  ;;  %v8795_v58 = vld [vmem:[%s13232_s4 + $0x1b4] sm:$0xf]  ;;  %v6275_v61 = vld [vmem:[%s13232_s4 + $0x1b8] sm:$0xf0]  ;;  %v6242_v36 = vor.u32 %v8788_v60, %v6241_v53 }
 0x13c   : > { %v6222_v6 = vor.u32 %v8781_v52, %v6219_v57  ;;  %v6278_v8 = vor.u32 %v8795_v58, %v6275_v61  ;;  %v6355_v23 = vld [vmem:[%s13232_s4 + $0x70] sm:$0xf]  ;;  %v8725_v40 = vld [vmem:[%s13232_s4 + $0x74] sm:$0xf]  ;;  %v6243_v57 = vld [vmem:[%s13232_s4 + $0x178] sm:$0xf0] }
 0x13d   : > { %v1171_v9 = vpack.c.bf16 %v1167_v7, %v1167_v7  ;;  %v1172_v10 = vpack.c.bf16 %v1168_v63, %v1168_v63  ;;  %v1125_v18 = vpop.f32.mrf.mxu2  ;;  %v1143_v19 = vpop.f32.mrf.mxu3  ;;  %v6201_v7 = vld [vmem:[%s13232_s4 + $0x120] sm:$0xf]  ;;  %v8779_v63 = vld [vmem:[%s13232_s4 + $0x134] sm:$0xf]  ;;  %v6356_v41 = vor.u32 %v8726_v3, %v6355_v23  ;;  %v8724_v61 = vld [vmem:[%s13232_s4 + $0x64] sm:$0xf0] }
 0x13e   : > { %v1054_v29 = vpop.f32.mrf.mxu0  ;;  %v1072_v30 = vpop.f32.mrf.mxu1  ;;  %v6211_v18 = vld [vmem:[%s13232_s4 + $0x138] sm:$0xf0]  ;;  %v8793_v19 = vld [vmem:[%s13232_s4 + $0x1a4] sm:$0xf]  ;;  %v8771_v52 = vld [vmem:[%s13232_s4 + $0xf4] sm:$0xf] }
 0x13f   : > { %v1198_v33 = vsel %vm1196_vm5, %v1171_v9, 0  ;;  %v1201_v34 = vsel %vm1196_vm5, %v1172_v10, 0  ;;  %v6210_v9 = vor.u32 %v8780_v62, %v6209_v43  ;;  %v6266_v10 = vor.u32 %v8794_v5, %v6265_v4  ;;  %v8792_v29 = vld [vmem:[%s13232_s4 + $0x194] sm:$0xf0]  ;;  %v6347_v58 = vld [vmem:[%s13232_s4 + $0x60] sm:$0xf] }
 0x140   : > { %1209 = vmatpush.bf16.msrb.mxu0 %v1198_v33  ;;  %1223 = vmatpush.bf16.msrb.mxu1 %v1201_v34  ;;  %v6214_v30 = vor.u32 %v8779_v63, %v6211_v18  ;;  %v6258_v35 = vor.u32 %v8792_v29, %v6257_v28  ;;  %v6348_v4 = vor.u32 %v8724_v61, %v6347_v58  ;;  %v6411_v5 = vld [vmem:[%s13232_s4 + $0xe0] sm:$0xf]  ;;  %v6403_v28 = vld [vmem:[%s13232_s4 + $0xd0] sm:$0xf]  ;;  %v6341_v32 = vld [vmem:[%s13232_s4 + $0x58] sm:$0xf0] }
 0x141   : > { %1240 = vmatpush.bf16.msrb.mxu2 %v1198_v33  ;;  %1254 = vmatpush.bf16.msrb.mxu3 %v1201_v34  ;;  %v6270_v33 = vor.u32 %v8793_v19, %v6267_v26  ;;  %v6202_v34 = vor.u32 %v8778_v27, %v6201_v7  ;;  %v8723_v7 = vld [vmem:[%s13232_s4 + $0x64] sm:$0xf]  ;;  %v6339_v26 = vld [vmem:[%s13232_s4 + $0x50] sm:$0xf]  ;;  %v8722_v27 = vld [vmem:[%s13232_s4 + $0x54] sm:$0xf0] }
 0x142   : > { %v6340_v29 = vor.u32 %v8722_v27, %v6339_v26  ;;  %v6405_v44 = vld [vmem:[%s13232_s4 + $0xd8] sm:$0xf0]  ;;  %v6387_v53 = vld [vmem:[%s13232_s4 + $0xb0] sm:$0xf]  ;;  %v6379_v23 = vld [vmem:[%s13232_s4 + $0xa0] sm:$0xf] }
 0x143   : > { %v8714_v58 = vld [vmem:[%s13232_s4 + $0x14] sm:$0xf0]  ;;  %v6371_v61 = vld [vmem:[%s13232_s4 + $0x90] sm:$0xf]  ;;  %v6363_v26 = vld [vmem:[%s13232_s4 + $0x80] sm:$0xf] }
 0x144   : > { %1210 = vmatpush.bf16.msrb.mxu0 %v1169_v21  ;;  %1224 = vmatpush.bf16.msrb.mxu1 %v1170_v24 }
 0x145   : > { %1241 = vmatpush.bf16.msrb.mxu2 %v1169_v21  ;;  %1255 = vmatpush.bf16.msrb.mxu3 %v1170_v24  ;;  %v8775_v21 = vld [vmem:[%s13232_s4 + $0x114] sm:$0xf]  ;;  %v6262_v24 = vor.u32 %v8791_v45, %v6259_v46  ;;  %v6331_v46 = vld [vmem:[%s13232_s4 + $0x40] sm:$0xf] }
 0x146   : > { %v6198_v0 = vor.u32 %v8775_v21, %v6195_v50  ;;  %v6333_v21 = vld [vmem:[%s13232_s4 + $0x48] sm:$0xf0] }
 0x147   : > { %6141 = vmatmul.msk.bf16.vlgmr.msrb.gmra.mxu0 %vm1192_vm10, %v1184_v51  ;;  %6142 = vmatmul.msk.bf16.vlgmr.msrb.gmra.mxu1 %vm1192_vm10, %v1184_v51  ;;  %v8774_v51 = vld [vmem:[%s13232_s4 + $0x104] sm:$0xf0]  ;;  %v6397_v50 = vld [vmem:[%s13232_s4 + $0xc8] sm:$0xf0] }
 0x148   : > { %1536 = vmatpush.bf16.msra.mxu0 %v6234_v25  ;;  %1550 = vmatpush.bf16.msra.mxu1 %v6290_v16  ;;  %v6194_v25 = vor.u32 %v8776_v47, %v6193_v31  ;;  %v6250_v16 = vor.u32 %v8790_v11, %v6249_v49  ;;  %v8721_v31 = vld [vmem:[%s13232_s4 + $0x54] sm:$0xf]  ;;  %v8720_v47 = vld [vmem:[%s13232_s4 + $0x44] sm:$0xf0]  ;;  %v6395_v49 = vld [vmem:[%s13232_s4 + $0xc0] sm:$0xf] }
 0x149   : > { %6143 = vmatmul.msk.bf16.vlgmr.msrb.gmra.mxu2 %vm1192_vm10, %v1191_v14  ;;  %6144 = vmatmul.msk.bf16.vlgmr.msrb.gmra.mxu3 %vm1192_vm10, %v1191_v14  ;;  %v6254_v14 = vor.u32 %v8789_v15, %v6251_v59  ;;  %v6332_v11 = vor.u32 %v8720_v47, %v6331_v46  ;;  %v6323_v59 = vld [vmem:[%s13232_s4 + $0x30] sm:$0xf] }
 0x14a   : > { %1562 = vmatpush.bf16.msra.mxu2 %v6238_v17  ;;  %1576 = vmatpush.bf16.msra.mxu3 %v6294_v38  ;;  %v6186_v17 = vor.u32 %v8774_v51, %v6185_v20  ;;  %v6187_v38 = vld [vmem:[%s13232_s4 + $0x108] sm:$0xf0]  ;;  %v8719_v20 = vld [vmem:[%s13232_s4 + $0x44] sm:$0xf]  ;;  %v8718_v51 = vld [vmem:[%s13232_s4 + $0x34] sm:$0xf0] }
 0x14b   : > { %v6190_v22 = vor.u32 %v8773_v37, %v6187_v38  ;;  %v6324_v60 = vor.u32 %v8718_v51, %v6323_v59  ;;  %v8733_v38 = vld [vmem:[%s13232_s4 + $0xb4] sm:$0xf] }
 0x14c   : > { %1537 = vmatpush.bf16.msra.mxu0 %v6226_v39  ;;  %1551 = vmatpush.bf16.msra.mxu1 %v6282_v1  ;;  %v6177_v39 = vld [vmem:[%s13232_s4 + $0xf0] sm:$0xf]  ;;  %v8772_v1 = vld [vmem:[%s13232_s4 + $0xf4] sm:$0xf0] }
 0x14d   : > { %v6178_v2 = vor.u32 %v8772_v1, %v6177_v39  ;;  %v6389_v39 = vld [vmem:[%s13232_s4 + $0xb8] sm:$0xf0] }
 0x14e   : > { %1563 = vmatpush.bf16.msra.mxu2 %v6230_v42  ;;  %1577 = vmatpush.bf16.msra.mxu3 %v6286_v54  ;;  %v6357_v42 = vld [vmem:[%s13232_s4 + $0x78] sm:$0xf0]  ;;  %v6392_v1 = vor.u32 %v8733_v38, %v6389_v39 }
 0x14f   : > { %v6360_v43 = vor.u32 %v8725_v40, %v6357_v42  ;;  %v6179_v54 = vld [vmem:[%s13232_s4 + $0xf8] sm:$0xf0]  ;;  %v8732_v40 = vld [vmem:[%s13232_s4 + $0xa4] sm:$0xf0]  ;;  %v6317_v42 = vld [vmem:[%s13232_s4 + $0x28] sm:$0xf0] }
 0x150   : > { %1538 = vmatpush.bf16.msra.mxu0 %v6218_v55  ;;  %1552 = vmatpush.bf16.msra.mxu1 %v6274_v56  ;;  %v8787_v55 = vld [vmem:[%s13232_s4 + $0x174] sm:$0xf]  ;;  %v6182_v56 = vor.u32 %v8771_v52, %v6179_v54  ;;  %v8731_v54 = vld [vmem:[%s13232_s4 + $0xa4] sm:$0xf] }
 0x151   : > { %v6246_v62 = vor.u32 %v8787_v55, %v6243_v57  ;;  %v6381_v55 = vld [vmem:[%s13232_s4 + $0xa8] sm:$0xf0]  ;;  %v6307_v57 = vld [vmem:[%s13232_s4 + $0x10] sm:$0xf] }
 0x152   : > { %1564 = vmatpush.bf16.msra.mxu2 %v6222_v6  ;;  %1578 = vmatpush.bf16.msra.mxu3 %v6278_v8  ;;  %v8740_v6 = vld [vmem:[%s13232_s4 + $0xe4] sm:$0xf0]  ;;  %v6349_v8 = vld [vmem:[%s13232_s4 + $0x68] sm:$0xf0] }
 0x153   : > { %v6412_v63 = vor.u32 %v8740_v6, %v6411_v5  ;;  %v6352_v18 = vor.u32 %v8723_v7, %v6349_v8  ;;  %v8713_v5 = vld [vmem:[%s13232_s4 + $0x14] sm:$0xf]  ;;  %v6309_v6 = vld [vmem:[%s13232_s4 + $0x18] sm:$0xf0] }
 0x154   : > { %1539 = vmatpush.bf16.msra.mxu0 %v6210_v9  ;;  %1553 = vmatpush.bf16.msra.mxu1 %v6266_v10  ;;  %v8739_v9 = vld [vmem:[%s13232_s4 + $0xe4] sm:$0xf]  ;;  %v6413_v10 = vld [vmem:[%s13232_s4 + $0xe8] sm:$0xf0]  ;;  %v8729_v8 = vld [vmem:[%s13232_s4 + $0x94] sm:$0xf] }
 0x155   : > { %v6416_v19 = vor.u32 %v8739_v9, %v6413_v10  ;;  %v6373_v9 = vld [vmem:[%s13232_s4 + $0x98] sm:$0xf0] }
 0x156   : > { %1565 = vmatpush.bf16.msra.mxu2 %v6214_v30  ;;  %1579 = vmatpush.bf16.msra.mxu3 %v6270_v33  ;;  %v8738_v30 = vld [vmem:[%s13232_s4 + $0xd4] sm:$0xf0]  ;;  %v6376_v10 = vor.u32 %v8729_v8, %v6373_v9  ;;  %v8828_v8 = vld [vmem:[%s13233_s5 + $0x1c4] sm:$0xf0]  ;;  %v8813_v9 = vld [vmem:[%s13233_s5 + $0x154] sm:$0xf] }
 0x157   : > { %v6404_v33 = vor.u32 %v8738_v30, %v6403_v28  ;;  %v8728_v28 = vld [vmem:[%s13232_s4 + $0x84] sm:$0xf0]  ;;  %v6301_v30 = vld [vmem:[%s13232_s4 + $0x8] sm:$0xf0] }
 0x158   : > { %1540 = vmatpush.bf16.msra.mxu0 %v6202_v34  ;;  %1554 = vmatpush.bf16.msra.mxu1 %v6258_v35  ;;  %v6344_v34 = vor.u32 %v8721_v31, %v6341_v32  ;;  %v8737_v35 = vld [vmem:[%s13232_s4 + $0xd4] sm:$0xf]  ;;  %v6364_v31 = vor.u32 %v8728_v28, %v6363_v26  ;;  %v6557_v26 = vld [vmem:[%s13233_s5 + $0x1c8] sm:$0xf0] }
 0x159   : > { %v6408_v45 = vor.u32 %v8737_v35, %v6405_v44 }
 0x15a   : > { %1566 = vmatpush.bf16.msra.mxu2 %v6206_v12  ;;  %1580 = vmatpush.bf16.msra.mxu3 %v6262_v24  ;;  %v8736_v12 = vld [vmem:[%s13232_s4 + $0xc4] sm:$0xf0] }
 0x15b   : > { %v6396_v24 = vor.u32 %v8736_v12, %v6395_v49 }
 0x15c   : > { %1541 = vmatpush.bf16.msra.mxu0 %v6194_v25  ;;  %1555 = vmatpush.bf16.msra.mxu1 %v6250_v16  ;;  %v6336_v25 = vor.u32 %v8719_v20, %v6333_v21  ;;  %v8735_v16 = vld [vmem:[%s13232_s4 + $0xc4] sm:$0xf] }
 0x15d   : > { %v6400_v15 = vor.u32 %v8735_v16, %v6397_v50 }
 0x15e   : > { %1567 = vmatpush.bf16.msra.mxu2 %v6198_v0  ;;  %1581 = vmatpush.bf16.msra.mxu3 %v6254_v14  ;;  %v8734_v0 = vld [vmem:[%s13232_s4 + $0xb4] sm:$0xf0]  ;;  %v8717_v14 = vld [vmem:[%s13232_s4 + $0x34] sm:$0xf] }
 0x160   : > { %1542 = vmatpush.bf16.msra.mxu0 %v6186_v17  ;;  %1556 = vmatpush.bf16.msra.mxu1 %v6242_v36  ;;  %v6325_v17 = vld [vmem:[%s13232_s4 + $0x38] sm:$0xf0]  ;;  %v6388_v36 = vor.u32 %v8734_v0, %v6387_v53 }
 0x161   : > { %v6328_v37 = vor.u32 %v8717_v14, %v6325_v17  ;;  %v6507_v17 = vld [vmem:[%s13233_s5 + $0x160] sm:$0xf] }
 0x162   : > { %1568 = vmatpush.bf16.msra.mxu2 %v6190_v22  ;;  %1582 = vmatpush.bf16.msra.mxu3 %v6246_v62  ;;  %v6315_v22 = vld [vmem:[%s13232_s4 + $0x20] sm:$0xf]  ;;  %v6308_v62 = vor.u32 %v8714_v58, %v6307_v57 }
 0x164   : > { %1543 = vmatpush.bf16.msra.mxu0 %v6178_v2  ;;  %1744 = vmatpush.bf16.msrb.mxu1 %v6356_v41  ;;  %v8716_v2 = vld [vmem:[%s13232_s4 + $0x24] sm:$0xf0]  ;;  %v8715_v41 = vld [vmem:[%s13232_s4 + $0x24] sm:$0xf] }
 0x165   : > { %v6316_v3 = vor.u32 %v8716_v2, %v6315_v22  ;;  %v6320_v52 = vor.u32 %v8715_v41, %v6317_v42  ;;  %v8815_v22 = vld [vmem:[%s13233_s5 + $0x164] sm:$0xf] }
 0x166   : > { %1569 = vmatpush.bf16.msra.mxu2 %v6182_v56  ;;  %1758 = vmatpush.bf16.msrb.mxu3 %v6412_v63  ;;  %v6384_v56 = vor.u32 %v8731_v54, %v6381_v55  ;;  %v6312_v63 = vor.u32 %v8713_v5, %v6309_v6 }
 0x168   : > { %1770 = vmatpush.bf16.msrb.mxu0 %v6360_v43  ;;  %1745 = vmatpush.bf16.msrb.mxu1 %v6348_v4  ;;  %v6380_v43 = vor.u32 %v8732_v40, %v6379_v23  ;;  %v8730_v4 = vld [vmem:[%s13232_s4 + $0x94] sm:$0xf0]  ;;  %v8829_v40 = vld [vmem:[%s13233_s5 + $0x1d4] sm:$0xf] }
 0x169   : > { %v6372_v7 = vor.u32 %v8730_v4, %v6371_v61  ;;  %v8814_v4 = vld [vmem:[%s13233_s5 + $0x154] sm:$0xf0] }
 0x16a   : > { %1784 = vmatpush.bf16.msrb.mxu2 %v6416_v19  ;;  %1759 = vmatpush.bf16.msrb.mxu3 %v6404_v33  ;;  %v8712_v19 = vld [vmem:[%s13232_s4 + $0x4] sm:$0xf0]  ;;  %v8727_v33 = vld [vmem:[%s13232_s4 + $0x84] sm:$0xf] }
 0x16c   : > { %1771 = vmatpush.bf16.msrb.mxu0 %v6352_v18  ;;  %1746 = vmatpush.bf16.msrb.mxu1 %v6340_v29  ;;  %v6299_v18 = vld [vmem:[%s13232_s4] sm:$0xf]  ;;  %v8711_v29 = vld [vmem:[%s13232_s4 + $0x4] sm:$0xf] }
 0x16d   : > { %v6300_v27 = vor.u32 %v8712_v19, %v6299_v18  ;;  %v6304_v32 = vor.u32 %v8711_v29, %v6301_v30  ;;  %v6501_v18 = vld [vmem:[%s13233_s5 + $0x158] sm:$0xf0]  ;;  %v8827_v19 = vld [vmem:[%s13233_s5 + $0x1c4] sm:$0xf]  ;;  %v6491_v30 = vld [vmem:[%s13233_s5 + $0x140] sm:$0xf] }
 0x16e   : > { %1785 = vmatpush.bf16.msrb.mxu2 %v6408_v45  ;;  %1760 = vmatpush.bf16.msrb.mxu3 %v6396_v24 }
 0x170   : > { %1772 = vmatpush.bf16.msrb.mxu0 %v6344_v34  ;;  %1747 = vmatpush.bf16.msrb.mxu1 %v6332_v11  ;;  %v6365_v34 = vld [vmem:[%s13232_s4 + $0x88] sm:$0xf0] }
 0x171   : > { %v6368_v35 = vor.u32 %v8727_v33, %v6365_v34  ;;  %v6560_v33 = vor.u32 %v8827_v19, %v6557_v26  ;;  %v6547_v34 = vld [vmem:[%s13233_s5 + $0x1b0] sm:$0xf] }
 0x172   : > { %1786 = vmatpush.bf16.msrb.mxu2 %v6400_v15  ;;  %1761 = vmatpush.bf16.msrb.mxu3 %v6388_v36  ;;  %v8816_v36 = vld [vmem:[%s13233_s5 + $0x164] sm:$0xf0]  ;;  %v6515_v19 = vld [vmem:[%s13233_s5 + $0x170] sm:$0xf] }
 0x173   : > { %v6508_v58 = vor.u32 %v8816_v36, %v6507_v17 }
 0x174   : > { %1773 = vmatpush.bf16.msrb.mxu0 %v6336_v25  ;;  %1748 = vmatpush.bf16.msrb.mxu1 %v6324_v60 }
 0x176   : > { %1787 = vmatpush.bf16.msrb.mxu2 %v6392_v1  ;;  %1762 = vmatpush.bf16.msrb.mxu3 %v6380_v43  ;;  %v8830_v1 = vld [vmem:[%s13233_s5 + $0x1d4] sm:$0xf0] }
 0x178   : > { %1774 = vmatpush.bf16.msrb.mxu0 %v6328_v37  ;;  %1749 = vmatpush.bf16.msrb.mxu1 %v6316_v3  ;;  %v6563_v37 = vld [vmem:[%s13233_s5 + $0x1d0] sm:$0xf]  ;;  %v6509_v3 = vld [vmem:[%s13233_s5 + $0x168] sm:$0xf0] }
 0x179   : > { %v6564_v61 = vor.u32 %v8830_v1, %v6563_v37  ;;  %v6512_v6 = vor.u32 %v8815_v22, %v6509_v3  ;;  %v6475_v37 = vld [vmem:[%s13233_s5 + $0x120] sm:$0xf]  ;;  %v6531_v22 = vld [vmem:[%s13233_s5 + $0x190] sm:$0xf]  ;;  %v6477_v3 = vld [vmem:[%s13233_s5 + $0x128] sm:$0xf0] }
 0x17a   : > { %1788 = vmatpush.bf16.msrb.mxu2 %v6384_v56  ;;  %1763 = vmatpush.bf16.msrb.mxu3 %v6372_v7 }
 0x17c   : > { %1775 = vmatpush.bf16.msrb.mxu0 %v6320_v52  ;;  %1750 = vmatpush.bf16.msrb.mxu1 %v6308_v62  ;;  %v6565_v52 = vld [vmem:[%s13233_s5 + $0x1d8] sm:$0xf0]  ;;  %v6499_v62 = vld [vmem:[%s13233_s5 + $0x150] sm:$0xf] }
 0x17d   : > { %v6568_v7 = vor.u32 %v8829_v40, %v6565_v52  ;;  %v6500_v28 = vor.u32 %v8814_v4, %v6499_v62  ;;  %v8821_v40 = vld [vmem:[%s13233_s5 + $0x194] sm:$0xf]  ;;  %v6469_v4 = vld [vmem:[%s13233_s5 + $0x118] sm:$0xf0] }
 0x17e   : > { %1789 = vmatpush.bf16.msrb.mxu2 %v6376_v10  ;;  %1764 = vmatpush.bf16.msrb.mxu3 %v6364_v31  ;;  %v8812_v31 = vld [vmem:[%s13233_s5 + $0x144] sm:$0xf0]  ;;  %v8805_v62 = vld [vmem:[%s13233_s5 + $0x114] sm:$0xf] }
 0x17f   : > { %v6472_v26 = vor.u32 %v8805_v62, %v6469_v4  ;;  %v6605_v4 = vld [vmem:[%s13233_s5 + $0x40] sm:$0xf] }
 0x180   : > { %1776 = vmatpush.bf16.msrb.mxu0 %v6312_v63  ;;  %1751 = vmatpush.bf16.msrb.mxu1 %v6300_v27  ;;  %v6555_v63 = vld [vmem:[%s13233_s5 + $0x1c0] sm:$0xf] }
 0x181   : > { %v6556_v29 = vor.u32 %v8828_v8, %v6555_v63 }
 0x182   : > { %1790 = vmatpush.bf16.msrb.mxu2 %v6368_v35  ;;  %v8826_v35 = vld [vmem:[%s13233_s5 + $0x1b4] sm:$0xf0] }
 0x184   : > { %1777 = vmatpush.bf16.msrb.mxu0 %v6304_v32  ;;  %v6504_v32 = vor.u32 %v8813_v9, %v6501_v18  ;;  %v6459_v9 = vld [vmem:[%s13233_s5 + $0x100] sm:$0xf]  ;;  %v8804_v18 = vld [vmem:[%s13233_s5 + $0x104] sm:$0xf0] }
 0x1c4   : > { %v1212_v44 = vpop.f32.mrf.mxu0  ;;  %v1226_v45 = vpop.f32.mrf.mxu1 }
 0x1cc   : > { %v1243_v46 = vpop.f32.mrf.mxu2  ;;  %v1257_v47 = vpop.f32.mrf.mxu3 }
 0x1cd   : > { %v1262_v49 = vmax.f32 %v1212_v44, %v1243_v46  ;;  %v1263_v11 = vmax.f32 %v1226_v45, %v1257_v47  ;;  %v1214_v12 = vpop.f32.mrf.mxu0  ;;  %v1228_v20 = vpop.f32.mrf.mxu1  ;;  %v8811_v44 = vld [vmem:[%s13233_s5 + $0x144] sm:$0xf]  ;;  %v6493_v45 = vld [vmem:[%s13233_s5 + $0x148] sm:$0xf0]  ;;  %v8825_v46 = vld [vmem:[%s13233_s5 + $0x1b4] sm:$0xf] }
 0x1ce   : > { %v6549_v47 = vld [vmem:[%s13233_s5 + $0x1b8] sm:$0xf0] }
 0x1cf   : > { %v1266_v25 = vpack.c.bf16 %v1263_v11, %v1262_v49  ;;  %v6492_v49 = vor.u32 %v8812_v31, %v6491_v30  ;;  %v6548_v11 = vor.u32 %v8826_v35, %v6547_v34  ;;  %v8803_v30 = vld [vmem:[%s13233_s5 + $0x104] sm:$0xf]  ;;  %v6461_v31 = vld [vmem:[%s13233_s5 + $0x108] sm:$0xf0]  ;;  %v6629_v34 = vld [vmem:[%s13233_s5 + $0x70] sm:$0xf] }
 0x1d0   : > { %v8756_v35 = vld [vmem:[%s13233_s5 + $0x74] sm:$0xf0] }
 0x1d1   : > { %v10233_v59 = vunpack.c.l.b16 %v1266_v25  ;;  %v10235_v51 = vunpack.c.h.b16 %v1266_v25  ;;  %v6539_v25 = vld [vmem:[%s13233_s5 + $0x1a0] sm:$0xf] }
 0x1d4   : > { %v1245_v21 = vpop.f32.mrf.mxu2  ;;  %v1259_v24 = vpop.f32.mrf.mxu3 }
 0x1d5   : > { %v1264_v16 = vmax.f32 %v1214_v12, %v1245_v21  ;;  %v1265_v50 = vmax.f32 %v1228_v20, %v1259_v24  ;;  %v6483_v12 = vld [vmem:[%s13233_s5 + $0x130] sm:$0xf]  ;;  %v8810_v20 = vld [vmem:[%s13233_s5 + $0x134] sm:$0xf0]  ;;  %v6496_v21 = vor.u32 %v8811_v44, %v6493_v45  ;;  %v6552_v24 = vor.u32 %v8825_v46, %v6549_v47  ;;  %v8755_v44 = vld [vmem:[%s13233_s5 + $0x74] sm:$0xf] }
 0x1d6   : > { %v6484_v17 = vor.u32 %v8810_v20, %v6483_v12  ;;  %v6631_v45 = vld [vmem:[%s13233_s5 + $0x78] sm:$0xf0]  ;;  %v6460_v46 = vor.u32 %v8804_v18, %v6459_v9  ;;  %v8802_v20 = vld [vmem:[%s13233_s5 + $0xf4] sm:$0xf0]  ;;  %v8749_v9 = vld [vmem:[%s13233_s5 + $0x44] sm:$0xf] }
 0x1d7   : > { %v1267_v15 = vpack.c.bf16 %v1265_v50, %v1264_v16  ;;  %v8824_v16 = vld [vmem:[%s13233_s5 + $0x1a4] sm:$0xf0]  ;;  %v8809_v50 = vld [vmem:[%s13233_s5 + $0x134] sm:$0xf]  ;;  %v6607_v18 = vld [vmem:[%s13233_s5 + $0x48] sm:$0xf0] }
 0x1d8   : > { %v6540_v36 = vor.u32 %v8824_v16, %v6539_v25  ;;  %v6630_v25 = vor.u32 %v8756_v35, %v6629_v34  ;;  %v6634_v16 = vor.u32 %v8755_v44, %v6631_v45  ;;  %v8747_v34 = vld [vmem:[%s13233_s5 + $0x34] sm:$0xf]  ;;  %v6599_v35 = vld [vmem:[%s13233_s5 + $0x38] sm:$0xf0] }
 0x1d9   : > { %v1363_v53 = vunpack.c.l.b16 %v1267_v15  ;;  %v1364_v60 = vunpack.c.h.b16 %v1267_v15  ;;  %v6485_v15 = vld [vmem:[%s13233_s5 + $0x138] sm:$0xf0]  ;;  %v8763_v44 = vld [vmem:[%s13233_s5 + $0xb4] sm:$0xf] }
 0x1da   : > { %v6663_v45 = vld [vmem:[%s13233_s5 + $0xb8] sm:$0xf0] }
 0x1db   : > { %v10238_v0 = vpack.c.b16 %v1363_v53, %v10233_v59  ;;  %v10241_v14 = vpack.c.b16 %v1364_v60, %v10235_v51  ;;  %v8823_v53 = vld [vmem:[%s13233_s5 + $0x1a4] sm:$0xf]  ;;  %v6541_v60 = vld [vmem:[%s13233_s5 + $0x1a8] sm:$0xf0] }
 0x1dc   : > { %v6544_v1 = vor.u32 %v8823_v53, %v6541_v60  ;;  %v8770_v53 = vld [vmem:[%s13233_s5 + $0xe4] sm:$0xf0] }
 0x1dd   : > { %v1377_v38 = vshll.u32 %v10241_v14, 16  ;;  %v1368_v39 = vshrl.u32 %v10238_v0, 16  ;;  %v1370_v2 = vshll.u32 %v10238_v0, 16  ;;  %v1375_v23 = vshrl.u32 %v10241_v14, 16  ;;  %v8754_v60 = vld [vmem:[%s13233_s5 + $0x64] sm:$0xf0] }
 0x1df   : > { %v2742_v41 = vrot.slane %v1377_v38, 2  ;;  %v2738_v42 = vrot.slane %v1368_v39, 1  ;;  %v1379_v43 = vrot.slane %v1377_v38, 1  ;;  %v1372_v54 = vrot.slane %v1370_v2, 1  ;;  %v8808_v38 = vld [vmem:[%s13233_s5 + $0x124] sm:$0xf0] }
 0x1e0   : > { %v2739_v55 = vrot.slane %v1370_v2, 2  ;;  %v2741_v56 = vrot.slane %v1375_v23, 1  ;;  %v8822_v2 = vld [vmem:[%s13233_s5 + $0x194] sm:$0xf0]  ;;  %v6476_v52 = vor.u32 %v8808_v38, %v6475_v37  ;;  %v8769_v38 = vld [vmem:[%s13233_s5 + $0xe4] sm:$0xf] }
 0x1e1   : > { %v10271_v57 = vor.u32 %v1379_v43, %v1375_v23  ;;  %v10279_v5 = vor.u32 %v1372_v54, %v1368_v39  ;;  %v6488_v39 = vor.u32 %v8809_v50, %v6485_v15  ;;  %v8807_v23 = vld [vmem:[%s13233_s5 + $0x124] sm:$0xf]  ;;  %v10387_v43 = vpack.c.b16 %v10235_v51, %v10235_v51  ;;  %v6523_v51 = vld [vmem:[%s13233_s5 + $0x180] sm:$0xf] }
 0x1e2   : > { %v10290_v10 = vor.u32 %v2742_v41, %v2741_v56  ;;  %v10305_v27 = vor.u32 %v2739_v55, %v2738_v42  ;;  %v6533_v41 = vld [vmem:[%s13233_s5 + $0x198] sm:$0xf0]  ;;  %v10383_v42 = vpack.c.b16 %v10233_v59, %v10233_v59  ;;  %v6532_v54 = vor.u32 %v8822_v2, %v6531_v22  ;;  %v6467_v55 = vld [vmem:[%s13233_s5 + $0x110] sm:$0xf]  ;;  %v8806_v56 = vld [vmem:[%s13233_s5 + $0x114] sm:$0xf0] }
 0x1e3   : > { %6295 = vmatmul.msk.bf16.vlgmr.msra.gmra.mxu1 %vm1532_vm11, %v10271_v57  ;;  %6296 = vmatmul.msk.bf16.vlgmr.msra.gmra.mxu3 %vm1532_vm11, %v10271_v57  ;;  %v6480_v59 = vor.u32 %v8807_v23, %v6477_v3  ;;  %v6468_v63 = vor.u32 %v8806_v56, %v6467_v55  ;;  %v6621_v50 = vld [vmem:[%s13233_s5 + $0x60] sm:$0xf]  ;;  %v6613_v3 = vld [vmem:[%s13233_s5 + $0x50] sm:$0xf]  ;;  %v8751_v55 = vld [vmem:[%s13233_s5 + $0x54] sm:$0xf] }
 0x1e4   : > { %1544 = vmatmul.bf16.vlgmr.msra.gmra.mxu0 %v10279_v5  ;;  %1570 = vmatmul.bf16.vlgmr.msra.gmra.mxu2 %v10279_v5  ;;  %v6685_v15 = vld [vmem:[%s13233_s5 + $0xe0] sm:$0xf]  ;;  %v6622_v2 = vor.u32 %v8754_v60, %v6621_v50  ;;  %v6615_v56 = vld [vmem:[%s13233_s5 + $0x58] sm:$0xf0]  ;;  %v8761_v50 = vld [vmem:[%s13233_s5 + $0xa4] sm:$0xf] }
 0x1e5   : > { %1977 = vmatpush.bf16.msra.mxu3 %v6508_v58  ;;  %1991 = vmatpush.bf16.msra.mxu1 %v6564_v61  ;;  %v6536_v58 = vor.u32 %v8821_v40, %v6533_v41  ;;  %v8820_v61 = vld [vmem:[%s13233_s5 + $0x184] sm:$0xf0]  ;;  %v6686_v22 = vor.u32 %v8770_v53, %v6685_v15  ;;  %v6677_v40 = vld [vmem:[%s13233_s5 + $0xd0] sm:$0xf]  ;;  %v8768_v41 = vld [vmem:[%s13233_s5 + $0xd4] sm:$0xf0]  ;;  %v6618_v62 = vor.u32 %v8751_v55, %v6615_v56 }
 0x1e6   : > { %2003 = vmatpush.bf16.msra.mxu2 %v6512_v6  ;;  %2017 = vmatpush.bf16.msra.mxu0 %v6568_v7  ;;  %v8819_v6 = vld [vmem:[%s13233_s5 + $0x184] sm:$0xf]  ;;  %v6525_v7 = vld [vmem:[%s13233_s5 + $0x188] sm:$0xf0]  ;;  %v6524_v8 = vor.u32 %v8820_v61, %v6523_v51  ;;  %v6678_v51 = vor.u32 %v8768_v41, %v6677_v40  ;;  %v6573_v41 = vld [vmem:[%s13233_s5] sm:$0xf] }
 0x1e7   : > { %v6655_v15 = vld [vmem:[%s13233_s5 + $0xa8] sm:$0xf0]  ;;  %v6637_v56 = vld [vmem:[%s13233_s5 + $0x80] sm:$0xf] }
 0x1e9   : > { %1978 = vmatpush.bf16.msra.mxu3 %v6500_v28  ;;  %1992 = vmatpush.bf16.msra.mxu1 %v6556_v29  ;;  %v6528_v28 = vor.u32 %v8819_v6, %v6525_v7  ;;  %v8818_v29 = vld [vmem:[%s13233_s5 + $0x174] sm:$0xf0]  ;;  %v6669_v6 = vld [vmem:[%s13233_s5 + $0xc0] sm:$0xf]  ;;  %v8766_v7 = vld [vmem:[%s13233_s5 + $0xc4] sm:$0xf0] }
 0x1ea   : > { %2004 = vmatpush.bf16.msra.mxu2 %v6504_v32  ;;  %2018 = vmatpush.bf16.msra.mxu0 %v6560_v33  ;;  %v8817_v32 = vld [vmem:[%s13233_s5 + $0x174] sm:$0xf]  ;;  %v6517_v33 = vld [vmem:[%s13233_s5 + $0x178] sm:$0xf0]  ;;  %v6516_v47 = vor.u32 %v8818_v29, %v6515_v19  ;;  %v8765_v19 = vld [vmem:[%s13233_s5 + $0xc4] sm:$0xf] }
 0x1eb   : > { %v6520_v12 = vor.u32 %v8817_v32, %v6517_v33  ;;  %v8764_v32 = vld [vmem:[%s13233_s5 + $0xb4] sm:$0xf0] }
 0x1ec   : > { %v8748_v33 = vld [vmem:[%s13233_s5 + $0x34] sm:$0xf0] }
 0x1ed   : > { %1979 = vmatpush.bf16.msra.mxu3 %v6492_v49  ;;  %1993 = vmatpush.bf16.msra.mxu1 %v6548_v11  ;;  %v6451_v49 = vld [vmem:[%s13233_s5 + $0xf0] sm:$0xf]  ;;  %v6464_v11 = vor.u32 %v8803_v30, %v6461_v31  ;;  %v6610_v30 = vor.u32 %v8749_v9, %v6607_v18  ;;  %v8860_v9 = vld [vmem:[%s13232_s4 + $0x2c4] sm:$0xf0]  ;;  %v8845_v18 = vld [vmem:[%s13232_s4 + $0x254] sm:$0xf] }
 0x1ee   : > { %2005 = vmatpush.bf16.msra.mxu2 %v6496_v21  ;;  %2019 = vmatpush.bf16.msra.mxu0 %v6552_v24  ;;  %v8801_v21 = vld [vmem:[%s13233_s5 + $0xf4] sm:$0xf]  ;;  %v6453_v24 = vld [vmem:[%s13233_s5 + $0xf8] sm:$0xf0]  ;;  %v6452_v37 = vor.u32 %v8802_v20, %v6451_v49  ;;  %v6661_v31 = vld [vmem:[%s13233_s5 + $0xb0] sm:$0xf]  ;;  %v6602_v49 = vor.u32 %v8747_v34, %v6599_v35 }
 0x1ef   : > { %v8762_v20 = vld [vmem:[%s13233_s5 + $0xa4] sm:$0xf0]  ;;  %v6829_v35 = vld [vmem:[%s13232_s4 + $0x2b0] sm:$0xf] }
 0x1f0   : > { %v8844_v34 = vld [vmem:[%s13232_s4 + $0x244] sm:$0xf0] }
 0x1f1   : > { %1980 = vmatpush.bf16.msra.mxu3 %v6484_v17  ;;  %1994 = vmatpush.bf16.msra.mxu1 %v6540_v36  ;;  %v8753_v17 = vld [vmem:[%s13233_s5 + $0x64] sm:$0xf]  ;;  %v6623_v36 = vld [vmem:[%s13233_s5 + $0x68] sm:$0xf0] }
 0x1f2   : > { %2006 = vmatpush.bf16.msra.mxu2 %v6488_v39  ;;  %2020 = vmatpush.bf16.msra.mxu0 %v6544_v1  ;;  %v6687_v39 = vld [vmem:[%s13233_s5 + $0xe8] sm:$0xf0]  ;;  %v6456_v1 = vor.u32 %v8801_v21, %v6453_v24  ;;  %v6626_v23 = vor.u32 %v8753_v17, %v6623_v36  ;;  %v6666_v21 = vor.u32 %v8763_v44, %v6663_v45  ;;  %v8746_v24 = vld [vmem:[%s13233_s5 + $0x24] sm:$0xf0]  ;;  %v6581_v36 = vld [vmem:[%s13233_s5 + $0x10] sm:$0xf] }
 0x1f3   : > { %1752 = vmatmul.bf16.vlgmr.msrb.gmra.mxu1 %v10383_v42  ;;  %6417 = vmatmul.msk.bf16.vlgmr.msrb.gmra.mxu3 %vm1532_vm11, %v10387_v43  ;;  %v8858_v45 = vld [vmem:[%s13232_s4 + $0x2b4] sm:$0xf0] }
 0x1f4   : > { %1778 = vmatmul.bf16.vlgmr.msrb.gmra.mxu0 %v10383_v42  ;;  %6418 = vmatmul.msk.bf16.vlgmr.msrb.gmra.mxu2 %vm1532_vm11, %v10387_v43 }
 0x1f5   : > { %1981 = vmatpush.bf16.msra.mxu3 %v6476_v52  ;;  %1995 = vmatpush.bf16.msra.mxu1 %v6532_v54  ;;  %v6690_v52 = vor.u32 %v8769_v38, %v6687_v39  ;;  %v8752_v54 = vld [vmem:[%s13233_s5 + $0x54] sm:$0xf0]  ;;  %v6658_v39 = vor.u32 %v8761_v50, %v6655_v15  ;;  %v8856_v15 = vld [vmem:[%s13232_s4 + $0x2a4] sm:$0xf0] }
 0x1f6   : > { %2007 = vmatpush.bf16.msra.mxu2 %v6480_v59  ;;  %2021 = vmatpush.bf16.msra.mxu0 %v6536_v58  ;;  %v8767_v59 = vld [vmem:[%s13233_s5 + $0xd4] sm:$0xf]  ;;  %v6679_v58 = vld [vmem:[%s13233_s5 + $0xd8] sm:$0xf0]  ;;  %v6614_v61 = vor.u32 %v8752_v54, %v6613_v3  ;;  %v8760_v38 = vld [vmem:[%s13233_s5 + $0x94] sm:$0xf0] }
 0x1f7   : > { %v6647_v3 = vld [vmem:[%s13233_s5 + $0x98] sm:$0xf0] }
 0x1f9   : > { %1982 = vmatpush.bf16.msra.mxu3 %v6468_v63  ;;  %1996 = vmatpush.bf16.msra.mxu1 %v6524_v8  ;;  %v6682_v63 = vor.u32 %v8767_v59, %v6679_v58  ;;  %v8750_v8 = vld [vmem:[%s13233_s5 + $0x44] sm:$0xf0]  ;;  %v8741_v58 = vld [vmem:[%s13233_s5 + $0x4] sm:$0xf] }
 0x1fa   : > { %2008 = vmatpush.bf16.msra.mxu2 %v6472_v26  ;;  %2022 = vmatpush.bf16.msra.mxu0 %v6528_v28  ;;  %v6671_v26 = vld [vmem:[%s13233_s5 + $0xc8] sm:$0xf0]  ;;  %v6670_v28 = vor.u32 %v8766_v7, %v6669_v6  ;;  %v6606_v29 = vor.u32 %v8750_v8, %v6605_v4  ;;  %v8758_v59 = vld [vmem:[%s13233_s5 + $0x84] sm:$0xf0]  ;;  %v6781_v6 = vld [vmem:[%s13232_s4 + $0x250] sm:$0xf] }
 0x1fb   : > { %v6639_v4 = vld [vmem:[%s13233_s5 + $0x88] sm:$0xf0]  ;;  %v8846_v7 = vld [vmem:[%s13232_s4 + $0x254] sm:$0xf0]  ;;  %v6638_v8 = vor.u32 %v8758_v59, %v6637_v56  ;;  %v6749_v56 = vld [vmem:[%s13232_s4 + $0x210] sm:$0xf] }
 0x1fc   : > { %v8838_v59 = vld [vmem:[%s13232_s4 + $0x214] sm:$0xf0] }
 0x1fd   : > { %1983 = vmatpush.bf16.msra.mxu3 %v6460_v46  ;;  %1997 = vmatpush.bf16.msra.mxu1 %v6516_v47  ;;  %v6662_v46 = vor.u32 %v8764_v32, %v6661_v31  ;;  %v6782_v31 = vor.u32 %v8846_v7, %v6781_v6  ;;  %v8851_v6 = vld [vmem:[%s13232_s4 + $0x284] sm:$0xf]  ;;  %v6807_v7 = vld [vmem:[%s13232_s4 + $0x288] sm:$0xf0] }
 0x1fe   : > { %2009 = vmatpush.bf16.msra.mxu2 %v6464_v11  ;;  %2023 = vmatpush.bf16.msra.mxu0 %v6520_v12  ;;  %v6589_v11 = vld [vmem:[%s13233_s5 + $0x20] sm:$0xf] }
 0x1ff   : > { %v6653_v12 = vld [vmem:[%s13233_s5 + $0xa0] sm:$0xf]  ;;  %v6590_v60 = vor.u32 %v8746_v24, %v6589_v11  ;;  %v6831_v11 = vld [vmem:[%s13232_s4 + $0x2b8] sm:$0xf0]  ;;  %v6765_v24 = vld [vmem:[%s13232_s4 + $0x230] sm:$0xf] }
 0x200   : > { %v6654_v53 = vor.u32 %v8762_v20, %v6653_v12  ;;  %v6830_v20 = vor.u32 %v8858_v45, %v6829_v35  ;;  %v6789_v45 = vld [vmem:[%s13232_s4 + $0x260] sm:$0xf] }
 0x201   : > { %2179 = vmatpush.bf16.msrb.mxu1 %v6630_v25  ;;  %1984 = vmatpush.bf16.msra.mxu3 %v6452_v37  ;;  %v8745_v25 = vld [vmem:[%s13233_s5 + $0x24] sm:$0xf]  ;;  %v6645_v37 = vld [vmem:[%s13233_s5 + $0x90] sm:$0xf] }
 0x202   : > { %2205 = vmatpush.bf16.msrb.mxu0 %v6634_v16  ;;  %2010 = vmatpush.bf16.msra.mxu2 %v6456_v1  ;;  %v6591_v16 = vld [vmem:[%s13233_s5 + $0x28] sm:$0xf0]  ;;  %v8744_v1 = vld [vmem:[%s13233_s5 + $0x14] sm:$0xf0]  ;;  %v6646_v40 = vor.u32 %v8760_v38, %v6645_v37 }
 0x203   : > { %6569 = vmatmul.msk.bf16.vlgmr.msra.gmra.mxu1 %vm1532_vm11, %v10271_v57  ;;  %v6594_v17 = vor.u32 %v8745_v25, %v6591_v16  ;;  %v6582_v54 = vor.u32 %v8744_v1, %v6581_v36  ;;  %v8842_v25 = vld [vmem:[%s13232_s4 + $0x234] sm:$0xf0]  ;;  %v6821_v16 = vld [vmem:[%s13232_s4 + $0x2a0] sm:$0xf]  ;;  %v6823_v36 = vld [vmem:[%s13232_s4 + $0x2a8] sm:$0xf0] }
 0x204   : > { %1985 = vmatmul.bf16.vlgmr.msra.gmra.mxu3 %v10279_v5  ;;  %6570 = vmatmul.msk.bf16.vlgmr.msra.gmra.mxu0 %vm1532_vm11, %v10271_v57  ;;  %v6674_v57 = vor.u32 %v8765_v19, %v6671_v26  ;;  %v6783_v19 = vld [vmem:[%s13232_s4 + $0x258] sm:$0xf0]  ;;  %v6766_v37 = vor.u32 %v8842_v25, %v6765_v24  ;;  %v6822_v38 = vor.u32 %v8856_v15, %v6821_v16  ;;  %v8840_v1 = vld [vmem:[%s13232_s4 + $0x224] sm:$0xf0]  ;;  %v8876_v24 = vld [vmem:[%s13233_s5 + $0x254] sm:$0xf0] }
 0x205   : > { %2193 = vmatpush.bf16.msrb.mxu3 %v6686_v22  ;;  %2180 = vmatpush.bf16.msrb.mxu1 %v6622_v2  ;;  %v8743_v22 = vld [vmem:[%s13233_s5 + $0x14] sm:$0xf]  ;;  %v6583_v2 = vld [vmem:[%s13233_s5 + $0x18] sm:$0xf0] }
 0x206   : > { %2206 = vmatpush.bf16.msrb.mxu0 %v6626_v23  ;;  %2219 = vmatpush.bf16.msrb.mxu2 %v6690_v52  ;;  %v8759_v23 = vld [vmem:[%s13233_s5 + $0x94] sm:$0xf]  ;;  %v8742_v52 = vld [vmem:[%s13233_s5 + $0x4] sm:$0xf0]  ;;  %v6586_v55 = vor.u32 %v8743_v22, %v6583_v2  ;;  %v6813_v22 = vld [vmem:[%s13232_s4 + $0x290] sm:$0xf] }
 0x207   : > { %2011 = vmatmul.bf16.vlgmr.msra.gmra.mxu2 %v10279_v5  ;;  %v6597_v5 = vld [vmem:[%s13233_s5 + $0x30] sm:$0xf]  ;;  %v6574_v26 = vor.u32 %v8742_v52, %v6573_v41  ;;  %v8854_v2 = vld [vmem:[%s13232_s4 + $0x294] sm:$0xf0]  ;;  %v6815_v41 = vld [vmem:[%s13232_s4 + $0x298] sm:$0xf0] }
 0x208   : > { %v6598_v47 = vor.u32 %v8748_v33, %v6597_v5  ;;  %v6773_v33 = vld [vmem:[%s13232_s4 + $0x240] sm:$0xf]  ;;  %v8875_v16 = vld [vmem:[%s13233_s5 + $0x254] sm:$0xf] }
 0x209   : > { %2194 = vmatpush.bf16.msrb.mxu3 %v6678_v51  ;;  %2181 = vmatpush.bf16.msrb.mxu1 %v6614_v61  ;;  %v6650_v51 = vor.u32 %v8759_v23, %v6647_v3  ;;  %v6575_v61 = vld [vmem:[%s13233_s5 + $0x8] sm:$0xf0]  ;;  %v6774_v12 = vor.u32 %v8844_v34, %v6773_v33  ;;  %v8839_v23 = vld [vmem:[%s13232_s4 + $0x224] sm:$0xf]  ;;  %v6733_v33 = vld [vmem:[%s13232_s4 + $0x1f0] sm:$0xf] }
 0x20a   : > { %2207 = vmatpush.bf16.msrb.mxu0 %v6618_v62  ;;  %2220 = vmatpush.bf16.msrb.mxu2 %v6682_v63  ;;  %v8757_v62 = vld [vmem:[%s13233_s5 + $0x84] sm:$0xf]  ;;  %v6837_v63 = vld [vmem:[%s13232_s4 + $0x2c0] sm:$0xf]  ;;  %v6759_v3 = vld [vmem:[%s13232_s4 + $0x228] sm:$0xf0] }
 0x20b   : > { %v6642_v5 = vor.u32 %v8757_v62, %v6639_v4  ;;  %v6838_v32 = vor.u32 %v8860_v9, %v6837_v63  ;;  %v8837_v62 = vld [vmem:[%s13232_s4 + $0x214] sm:$0xf]  ;;  %v6751_v4 = vld [vmem:[%s13232_s4 + $0x218] sm:$0xf0]  ;;  %v6750_v63 = vor.u32 %v8838_v59, %v6749_v56 }
 0x20c   : > { %v6754_v9 = vor.u32 %v8837_v62, %v6751_v4  ;;  %v6981_v4 = vld [vmem:[%s13233_s5 + $0x2b0] sm:$0xf] }
 0x20d   : > { %2195 = vmatpush.bf16.msrb.mxu3 %v6670_v28  ;;  %2182 = vmatpush.bf16.msrb.mxu1 %v6606_v29  ;;  %v6578_v28 = vor.u32 %v8741_v58, %v6575_v61  ;;  %v8859_v29 = vld [vmem:[%s13232_s4 + $0x2c4] sm:$0xf]  ;;  %v6805_v58 = vld [vmem:[%s13232_s4 + $0x280] sm:$0xf]  ;;  %v8852_v61 = vld [vmem:[%s13232_s4 + $0x284] sm:$0xf0] }
 0x20e   : > { %2208 = vmatpush.bf16.msrb.mxu0 %v6610_v30  ;;  %2221 = vmatpush.bf16.msrb.mxu2 %v6674_v57  ;;  %v6839_v30 = vld [vmem:[%s13232_s4 + $0x2c8] sm:$0xf0]  ;;  %v6786_v57 = vor.u32 %v8845_v18, %v6783_v19  ;;  %v6741_v18 = vld [vmem:[%s13232_s4 + $0x200] sm:$0xf]  ;;  %v8836_v19 = vld [vmem:[%s13232_s4 + $0x204] sm:$0xf0] }
 0x20f   : > { %v6842_v44 = vor.u32 %v8859_v29, %v6839_v30  ;;  %v8850_v29 = vld [vmem:[%s13232_s4 + $0x274] sm:$0xf0]  ;;  %v8835_v30 = vld [vmem:[%s13232_s4 + $0x204] sm:$0xf] }
 0x211   : > { %2196 = vmatpush.bf16.msrb.mxu3 %v6662_v46  ;;  %2183 = vmatpush.bf16.msrb.mxu1 %v6598_v47  ;;  %v8843_v46 = vld [vmem:[%s13232_s4 + $0x244] sm:$0xf]  ;;  %v6775_v47 = vld [vmem:[%s13232_s4 + $0x248] sm:$0xf0] }
 0x212   : > { %2209 = vmatpush.bf16.msrb.mxu0 %v6602_v49  ;;  %2222 = vmatpush.bf16.msrb.mxu2 %v6666_v21  ;;  %v8857_v49 = vld [vmem:[%s13232_s4 + $0x2b4] sm:$0xf]  ;;  %v6778_v21 = vor.u32 %v8843_v46, %v6775_v47  ;;  %v8848_v46 = vld [vmem:[%s13232_s4 + $0x264] sm:$0xf0] }
 0x213   : > { %v6834_v50 = vor.u32 %v8857_v49, %v6831_v11  ;;  %v8833_v49 = vld [vmem:[%s13232_s4 + $0x1f4] sm:$0xf]  ;;  %v6735_v11 = vld [vmem:[%s13232_s4 + $0x1f8] sm:$0xf0]  ;;  %v6790_v15 = vor.u32 %v8848_v46, %v6789_v45  ;;  %v6901_v46 = vld [vmem:[%s13233_s5 + $0x210] sm:$0xf] }
 0x215   : > { %2197 = vmatpush.bf16.msrb.mxu3 %v6654_v53  ;;  %2184 = vmatpush.bf16.msrb.mxu1 %v6590_v60  ;;  %v8841_v53 = vld [vmem:[%s13232_s4 + $0x234] sm:$0xf]  ;;  %v6767_v60 = vld [vmem:[%s13232_s4 + $0x238] sm:$0xf0] }
 0x216   : > { %2210 = vmatpush.bf16.msrb.mxu0 %v6594_v17  ;;  %2223 = vmatpush.bf16.msrb.mxu2 %v6658_v39  ;;  %v8855_v17 = vld [vmem:[%s13232_s4 + $0x2a4] sm:$0xf]  ;;  %v6770_v39 = vor.u32 %v8841_v53, %v6767_v60  ;;  %v6738_v53 = vor.u32 %v8833_v49, %v6735_v11  ;;  %v6725_v60 = vld [vmem:[%s13232_s4 + $0x1e0] sm:$0xf] }
 0x219   : > { %2198 = vmatpush.bf16.msrb.mxu3 %v6646_v40  ;;  %2185 = vmatpush.bf16.msrb.mxu1 %v6582_v54  ;;  %v8853_v40 = vld [vmem:[%s13232_s4 + $0x294] sm:$0xf]  ;;  %v6814_v54 = vor.u32 %v8854_v2, %v6813_v22  ;;  %v8890_v2 = vld [vmem:[%s13233_s5 + $0x2c4] sm:$0xf0] }
 0x21a   : > { %2211 = vmatpush.bf16.msrb.mxu0 %v6586_v55  ;;  %2224 = vmatpush.bf16.msrb.mxu2 %v6650_v51  ;;  %v6762_v55 = vor.u32 %v8839_v23, %v6759_v3  ;;  %v6818_v51 = vor.u32 %v8853_v40, %v6815_v41  ;;  %v8873_v23 = vld [vmem:[%s13233_s5 + $0x244] sm:$0xf]  ;;  %v6927_v40 = vld [vmem:[%s13233_s5 + $0x248] sm:$0xf0] }
 0x21b   : > { %v8889_v41 = vld [vmem:[%s13233_s5 + $0x2c4] sm:$0xf] }
 0x21d   : > { %2199 = vmatpush.bf16.msrb.mxu3 %v6638_v8  ;;  %2186 = vmatpush.bf16.msrb.mxu1 %v6574_v26  ;;  %v6806_v8 = vor.u32 %v8852_v61, %v6805_v58  ;;  %v6797_v26 = vld [vmem:[%s13232_s4 + $0x270] sm:$0xf]  ;;  %v6930_v61 = vor.u32 %v8873_v23, %v6927_v40 }
 0x21e   : > { %2212 = vmatpush.bf16.msrb.mxu0 %v6578_v28  ;;  %2225 = vmatpush.bf16.msrb.mxu2 %v6642_v5  ;;  %v6810_v28 = vor.u32 %v8851_v6, %v6807_v7  ;;  %v6743_v5 = vld [vmem:[%s13232_s4 + $0x208] sm:$0xf0]  ;;  %v6798_v34 = vor.u32 %v8850_v29, %v6797_v26  ;;  %v6917_v58 = vld [vmem:[%s13233_s5 + $0x230] sm:$0xf]  ;;  %v8888_v6 = vld [vmem:[%s13233_s5 + $0x2b4] sm:$0xf0] }
 0x21f   : > { %v6746_v35 = vor.u32 %v8835_v30, %v6743_v5  ;;  %v8871_v7 = vld [vmem:[%s13233_s5 + $0x234] sm:$0xf]  ;;  %v6982_v26 = vor.u32 %v8888_v6, %v6981_v4  ;;  %v8870_v29 = vld [vmem:[%s13233_s5 + $0x224] sm:$0xf0]  ;;  %v6885_v23 = vld [vmem:[%s13233_s5 + $0x1f0] sm:$0xf] }
 0x220   : > { %2187 = vmatmul.bf16.vlgmr.msrb.gmra.mxu1 %v10383_v42  ;;  %6691 = vmatmul.msk.bf16.vlgmr.msrb.gmra.mxu3 %vm1532_vm11, %v10387_v43  ;;  %v8862_v6 = vld [vmem:[%s13233_s5 + $0x1e4] sm:$0xf0] }
 0x221   : > { %2418 = vmatpush.bf16.msra.mxu3 %v6782_v31  ;;  %2432 = vmatpush.bf16.msra.mxu1 %v6838_v32  ;;  %v8849_v31 = vld [vmem:[%s13232_s4 + $0x274] sm:$0xf]  ;;  %v6799_v32 = vld [vmem:[%s13232_s4 + $0x278] sm:$0xf0] }
 0x222   : > { %2444 = vmatpush.bf16.msra.mxu2 %v6786_v57  ;;  %2458 = vmatpush.bf16.msra.mxu0 %v6842_v44  ;;  %v6742_v57 = vor.u32 %v8836_v19, %v6741_v18  ;;  %v8834_v44 = vld [vmem:[%s13232_s4 + $0x1f4] sm:$0xf0]  ;;  %v6802_v47 = vor.u32 %v8849_v31, %v6799_v32  ;;  %v10895_v18 = vrot.slane %v10238_v0, 1  ;;  %v6973_v31 = vld [vmem:[%s13233_s5 + $0x2a0] sm:$0xf] }
 0x223   : > { %2213 = vmatmul.bf16.vlgmr.msrb.gmra.mxu0 %v10383_v42  ;;  %6692 = vmatmul.msk.bf16.vlgmr.msrb.gmra.mxu2 %vm1532_vm11, %v10387_v43  ;;  %v6757_v42 = vld [vmem:[%s13232_s4 + $0x220] sm:$0xf]  ;;  %v6826_v43 = vor.u32 %v8855_v17, %v6823_v36  ;;  %v6734_v25 = vor.u32 %v8834_v44, %v6733_v33  ;;  %v8832_v17 = vld [vmem:[%s13232_s4 + $0x1e4] sm:$0xf0]  ;;  %v8831_v36 = vld [vmem:[%s13232_s4 + $0x1e4] sm:$0xf] }
 0x224   : > { %v6758_v52 = vor.u32 %v8840_v1, %v6757_v42  ;;  %v6925_v42 = vld [vmem:[%s13233_s5 + $0x240] sm:$0xf]  ;;  %v8874_v1 = vld [vmem:[%s13233_s5 + $0x244] sm:$0xf0]  ;;  %v6726_v3 = vor.u32 %v8832_v17, %v6725_v60  ;;  %v6911_v33 = vld [vmem:[%s13233_s5 + $0x228] sm:$0xf0] }
 0x225   : > { %2419 = vmatpush.bf16.msra.mxu3 %v6774_v12  ;;  %2433 = vmatpush.bf16.msra.mxu1 %v6830_v20  ;;  %v8847_v12 = vld [vmem:[%s13232_s4 + $0x264] sm:$0xf]  ;;  %v6791_v20 = vld [vmem:[%s13232_s4 + $0x268] sm:$0xf0]  ;;  %v6926_v56 = vor.u32 %v8874_v1, %v6925_v42  ;;  %v8886_v32 = vld [vmem:[%s13233_s5 + $0x2a4] sm:$0xf0] }
 0x226   : > { %2445 = vmatpush.bf16.msra.mxu2 %v6778_v21  ;;  %2459 = vmatpush.bf16.msra.mxu0 %v6834_v50  ;;  %v6933_v21 = vld [vmem:[%s13233_s5 + $0x250] sm:$0xf]  ;;  %v6935_v50 = vld [vmem:[%s13233_s5 + $0x258] sm:$0xf0]  ;;  %v6974_v45 = vor.u32 %v8886_v32, %v6973_v31  ;;  %v8866_v60 = vld [vmem:[%s13233_s5 + $0x204] sm:$0xf0] }
 0x227   : > { %v6938_v22 = vor.u32 %v8875_v16, %v6935_v50  ;;  %v6967_v16 = vld [vmem:[%s13233_s5 + $0x298] sm:$0xf0]  ;;  %v6895_v42 = vld [vmem:[%s13233_s5 + $0x208] sm:$0xf0]  ;;  %v8881_v1 = vld [vmem:[%s13233_s5 + $0x284] sm:$0xf] }
 0x228   : > { %v7141_v31 = vld [vmem:[%s13232_s4 + $0x3b0] sm:$0xf]  ;;  %v8920_v32 = vld [vmem:[%s13232_s4 + $0x3b4] sm:$0xf0] }
 0x229   : > { %2420 = vmatpush.bf16.msra.mxu3 %v6766_v37  ;;  %2434 = vmatpush.bf16.msra.mxu1 %v6822_v38  ;;  %v6794_v37 = vor.u32 %v8847_v12, %v6791_v20  ;;  %v6934_v38 = vor.u32 %v8876_v24, %v6933_v21  ;;  %v6965_v12 = vld [vmem:[%s13233_s5 + $0x290] sm:$0xf]  ;;  %v8884_v20 = vld [vmem:[%s13233_s5 + $0x294] sm:$0xf0]  ;;  %v8867_v21 = vld [vmem:[%s13233_s5 + $0x214] sm:$0xf] }
 0x22a   : > { %2446 = vmatpush.bf16.msra.mxu2 %v6770_v39  ;;  %2460 = vmatpush.bf16.msra.mxu0 %v6826_v43  ;;  %v6727_v39 = vld [vmem:[%s13232_s4 + $0x1e8] sm:$0xf0]  ;;  %v6989_v43 = vld [vmem:[%s13233_s5 + $0x2c0] sm:$0xf]  ;;  %v6903_v24 = vld [vmem:[%s13233_s5 + $0x218] sm:$0xf0] }
 0x22b   : > { %v6990_v59 = vor.u32 %v8890_v2, %v6989_v43  ;;  %v6906_v17 = vor.u32 %v8867_v21, %v6903_v24 }
 0x22d   : > { %2421 = vmatpush.bf16.msra.mxu3 %v6758_v52  ;;  %2435 = vmatpush.bf16.msra.mxu1 %v6814_v54  ;;  %v6991_v52 = vld [vmem:[%s13233_s5 + $0x2c8] sm:$0xf0]  ;;  %v6730_v54 = vor.u32 %v8831_v36, %v6727_v39  ;;  %v8865_v39 = vld [vmem:[%s13233_s5 + $0x204] sm:$0xf] }
 0x22e   : > { %2447 = vmatpush.bf16.msra.mxu2 %v6762_v55  ;;  %2461 = vmatpush.bf16.msra.mxu0 %v6818_v51  ;;  %v10864_v55 = vrot.slane %v10241_v14, 1  ;;  %v8872_v51 = vld [vmem:[%s13233_s5 + $0x234] sm:$0xf0]  ;;  %v6994_v62 = vor.u32 %v8889_v41, %v6991_v52  ;;  %v6898_v40 = vor.u32 %v8865_v39, %v6895_v42  ;;  %v6949_v52 = vld [vmem:[%s13233_s5 + $0x270] sm:$0xf] }
 0x22f   : > { %v6918_v19 = vor.u32 %v8872_v51, %v6917_v58  ;;  %v8879_v58 = vld [vmem:[%s13233_s5 + $0x274] sm:$0xf]  ;;  %v6951_v51 = vld [vmem:[%s13233_s5 + $0x278] sm:$0xf0] }
 0x231   : > { %2422 = vmatpush.bf16.msra.mxu3 %v6750_v63  ;;  %2436 = vmatpush.bf16.msra.mxu1 %v6806_v8  ;;  %v6919_v63 = vld [vmem:[%s13233_s5 + $0x238] sm:$0xf0]  ;;  %v8887_v8 = vld [vmem:[%s13233_s5 + $0x2b4] sm:$0xf] }
 0x232   : > { %2448 = vmatpush.bf16.msra.mxu2 %v6754_v9  ;;  %2462 = vmatpush.bf16.msra.mxu0 %v6810_v28  ;;  %v6983_v9 = vld [vmem:[%s13233_s5 + $0x2b8] sm:$0xf0]  ;;  %v6909_v28 = vld [vmem:[%s13233_s5 + $0x220] sm:$0xf]  ;;  %v6922_v30 = vor.u32 %v8871_v7, %v6919_v63  ;;  %v8878_v63 = vld [vmem:[%s13233_s5 + $0x264] sm:$0xf0] }
 0x233   : > { %v6986_v5 = vor.u32 %v8887_v8, %v6983_v9  ;;  %v6910_v44 = vor.u32 %v8870_v29, %v6909_v28  ;;  %v6941_v7 = vld [vmem:[%s13233_s5 + $0x260] sm:$0xf]  ;;  %v6954_v9 = vor.u32 %v8879_v58, %v6951_v51  ;;  %v8877_v28 = vld [vmem:[%s13233_s5 + $0x264] sm:$0xf]  ;;  %v6943_v29 = vld [vmem:[%s13233_s5 + $0x268] sm:$0xf0] }
 0x234   : > { %v8899_v58 = vld [vmem:[%s13232_s4 + $0x314] sm:$0xf]  ;;  %v7063_v51 = vld [vmem:[%s13232_s4 + $0x318] sm:$0xf0] }
 0x235   : > { %2423 = vmatpush.bf16.msra.mxu3 %v6742_v57  ;;  %2437 = vmatpush.bf16.msra.mxu1 %v6798_v34  ;;  %v8869_v57 = vld [vmem:[%s13233_s5 + $0x224] sm:$0xf] }
 0x236   : > { %2449 = vmatpush.bf16.msra.mxu2 %v6746_v35  ;;  %2463 = vmatpush.bf16.msra.mxu0 %v6802_v47  ;;  %v8885_v34 = vld [vmem:[%s13233_s5 + $0x2a4] sm:$0xf]  ;;  %v6975_v35 = vld [vmem:[%s13233_s5 + $0x2a8] sm:$0xf0]  ;;  %v8868_v47 = vld [vmem:[%s13233_s5 + $0x214] sm:$0xf0]  ;;  %v6914_v49 = vor.u32 %v8869_v57, %v6911_v33 }
 0x237   : > { %v6978_v11 = vor.u32 %v8885_v34, %v6975_v35  ;;  %v6902_v50 = vor.u32 %v8868_v47, %v6901_v46  ;;  %v8905_v57 = vld [vmem:[%s13232_s4 + $0x344] sm:$0xf]  ;;  %v6942_v34 = vor.u32 %v8878_v63, %v6941_v7  ;;  %v7087_v35 = vld [vmem:[%s13232_s4 + $0x348] sm:$0xf0]  ;;  %v6946_v47 = vor.u32 %v8877_v28, %v6943_v29  ;;  %v7053_v7 = vld [vmem:[%s13232_s4 + $0x300] sm:$0xf] }
 0x238   : > { %v7090_v21 = vor.u32 %v8905_v57, %v7087_v35  ;;  %v8898_v63 = vld [vmem:[%s13232_s4 + $0x304] sm:$0xf0]  ;;  %v8897_v28 = vld [vmem:[%s13232_s4 + $0x304] sm:$0xf]  ;;  %v7055_v29 = vld [vmem:[%s13232_s4 + $0x308] sm:$0xf0] }
 0x239   : > { %2424 = vmatpush.bf16.msra.mxu3 %v6734_v25  ;;  %2438 = vmatpush.bf16.msra.mxu1 %v6790_v15  ;;  %v8883_v25 = vld [vmem:[%s13233_s5 + $0x294] sm:$0xf]  ;;  %v6966_v15 = vor.u32 %v8884_v20, %v6965_v12  ;;  %v7077_v12 = vld [vmem:[%s13232_s4 + $0x330] sm:$0xf]  ;;  %v8904_v20 = vld [vmem:[%s13232_s4 + $0x334] sm:$0xf0]  ;;  %v7058_v35 = vor.u32 %v8897_v28, %v7055_v29 }
 0x23a   : > { %2450 = vmatpush.bf16.msra.mxu2 %v6738_v53  ;;  %2464 = vmatpush.bf16.msra.mxu0 %v6794_v37  ;;  %v6893_v53 = vld [vmem:[%s13233_s5 + $0x200] sm:$0xf]  ;;  %v6970_v36 = vor.u32 %v8883_v25, %v6967_v16  ;;  %v8918_v16 = vld [vmem:[%s13232_s4 + $0x3a4] sm:$0xf0]  ;;  %v7295_v28 = vld [vmem:[%s13233_s5 + $0x3b8] sm:$0xf0] }
 0x23b   : > { %v6957_v37 = vld [vmem:[%s13233_s5 + $0x280] sm:$0xf]  ;;  %v6894_v43 = vor.u32 %v8866_v60, %v6893_v53  ;;  %v8917_v53 = vld [vmem:[%s13232_s4 + $0x3a4] sm:$0xf]  ;;  %v7135_v60 = vld [vmem:[%s13232_s4 + $0x3a8] sm:$0xf0] }
 0x23c   : > { %6843 = vmatmul.msk.bf16.vlgmr.msra.gmra.mxu1 %vm1532_vm11, %v10864_v55  ;;  %v7133_v25 = vld [vmem:[%s13232_s4 + $0x3a0] sm:$0xf]  ;;  %v7138_v42 = vor.u32 %v8917_v53, %v7135_v60 }
 0x23d   : > { %2653 = vmatpush.bf16.msrb.mxu1 %v6934_v38  ;;  %2425 = vmatpush.bf16.msra.mxu3 %v6726_v3  ;;  %v8882_v38 = vld [vmem:[%s13233_s5 + $0x284] sm:$0xf0]  ;;  %v8864_v3 = vld [vmem:[%s13233_s5 + $0x1f4] sm:$0xf0] }
 0x23e   : > { %2679 = vmatpush.bf16.msrb.mxu0 %v6938_v22  ;;  %2451 = vmatpush.bf16.msra.mxu2 %v6730_v54  ;;  %v6959_v22 = vld [vmem:[%s13233_s5 + $0x288] sm:$0xf0]  ;;  %v6958_v2 = vor.u32 %v8882_v38, %v6957_v37  ;;  %v8880_v54 = vld [vmem:[%s13233_s5 + $0x274] sm:$0xf0]  ;;  %v7069_v37 = vld [vmem:[%s13232_s4 + $0x320] sm:$0xf] }
 0x23f   : > { %6844 = vmatmul.msk.bf16.vlgmr.msra.gmra.mxu0 %vm1532_vm11, %v10864_v55  ;;  %v6962_v41 = vor.u32 %v8881_v1, %v6959_v22  ;;  %v6950_v4 = vor.u32 %v8880_v54, %v6949_v52  ;;  %v8902_v38 = vld [vmem:[%s13232_s4 + $0x324] sm:$0xf0]  ;;  %v7125_v1 = vld [vmem:[%s13232_s4 + $0x390] sm:$0xf]  ;;  %v8916_v22 = vld [vmem:[%s13232_s4 + $0x394] sm:$0xf0] }
 0x240   : > { %2426 = vmatmul.bf16.vlgmr.msra.gmra.mxu3 %v10895_v18  ;;  %v7061_v52 = vld [vmem:[%s13232_s4 + $0x310] sm:$0xf]  ;;  %v8900_v54 = vld [vmem:[%s13232_s4 + $0x314] sm:$0xf0] }
 0x241   : > { %2654 = vmatpush.bf16.msrb.mxu1 %v6926_v56  ;;  %2667 = vmatpush.bf16.msrb.mxu3 %v6990_v59  ;;  %v8863_v56 = vld [vmem:[%s13233_s5 + $0x1f4] sm:$0xf]  ;;  %v6887_v59 = vld [vmem:[%s13233_s5 + $0x1f8] sm:$0xf0] }
 0x242   : > { %2680 = vmatpush.bf16.msrb.mxu0 %v6930_v61  ;;  %2693 = vmatpush.bf16.msrb.mxu2 %v6994_v62  ;;  %v6877_v61 = vld [vmem:[%s13233_s5 + $0x1e0] sm:$0xf]  ;;  %v6886_v62 = vor.u32 %v8864_v3, %v6885_v23  ;;  %v6890_v8 = vor.u32 %v8863_v56, %v6887_v59  ;;  %v8915_v23 = vld [vmem:[%s13232_s4 + $0x394] sm:$0xf]  ;;  %v7127_v3 = vld [vmem:[%s13232_s4 + $0x398] sm:$0xf0] }
 0x243   : > { %2452 = vmatmul.bf16.vlgmr.msra.gmra.mxu2 %v10895_v18  ;;  %v6878_v33 = vor.u32 %v8862_v6, %v6877_v61  ;;  %v7130_v59 = vor.u32 %v8915_v23, %v7127_v3  ;;  %v8913_v61 = vld [vmem:[%s13232_s4 + $0x384] sm:$0xf]  ;;  %v7239_v23 = vld [vmem:[%s13233_s5 + $0x348] sm:$0xf0] }
 0x245   : > { %2655 = vmatpush.bf16.msrb.mxu1 %v6918_v19  ;;  %2668 = vmatpush.bf16.msrb.mxu3 %v6982_v26  ;;  %v8861_v19 = vld [vmem:[%s13233_s5 + $0x1e4] sm:$0xf]  ;;  %v6879_v26 = vld [vmem:[%s13233_s5 + $0x1e8] sm:$0xf0] }
 0x246   : > { %2681 = vmatpush.bf16.msrb.mxu0 %v6922_v30  ;;  %2694 = vmatpush.bf16.msrb.mxu2 %v6986_v5  ;;  %v7085_v30 = vld [vmem:[%s13232_s4 + $0x340] sm:$0xf]  ;;  %v8906_v5 = vld [vmem:[%s13232_s4 + $0x344] sm:$0xf0]  ;;  %v6882_v46 = vor.u32 %v8861_v19, %v6879_v26  ;;  %v7109_v19 = vld [vmem:[%s13232_s4 + $0x370] sm:$0xf] }
 0x247   : > { %v8912_v26 = vld [vmem:[%s13232_s4 + $0x374] sm:$0xf0] }
 0x249   : > { %2656 = vmatpush.bf16.msrb.mxu1 %v6910_v44  ;;  %2669 = vmatpush.bf16.msrb.mxu3 %v6974_v45  ;;  %v8919_v44 = vld [vmem:[%s13232_s4 + $0x3b4] sm:$0xf]  ;;  %v7143_v45 = vld [vmem:[%s13232_s4 + $0x3b8] sm:$0xf0] }
 0x24a   : > { %2682 = vmatpush.bf16.msrb.mxu0 %v6914_v49  ;;  %2695 = vmatpush.bf16.msrb.mxu2 %v6978_v11  ;;  %v7086_v49 = vor.u32 %v8906_v5, %v7085_v30  ;;  %v7142_v11 = vor.u32 %v8920_v32, %v7141_v31  ;;  %v7146_v24 = vor.u32 %v8919_v44, %v7143_v45  ;;  %v8911_v30 = vld [vmem:[%s13232_s4 + $0x374] sm:$0xf]  ;;  %v7111_v5 = vld [vmem:[%s13232_s4 + $0x378] sm:$0xf0] }
 0x24b   : > { %v7054_v31 = vor.u32 %v8898_v63, %v7053_v7  ;;  %v7110_v32 = vor.u32 %v8912_v26, %v7109_v19  ;;  %v7114_v44 = vor.u32 %v8911_v30, %v7111_v5  ;;  %v8950_v7 = vld [vmem:[%s13233_s5 + $0x3b4] sm:$0xf0]  ;;  %v8949_v26 = vld [vmem:[%s13233_s5 + $0x3b4] sm:$0xf] }
 0x24c   : > { %v8934_v63 = vld [vmem:[%s13233_s5 + $0x334] sm:$0xf0] }
 0x24d   : > { %2657 = vmatpush.bf16.msrb.mxu1 %v6902_v50  ;;  %2670 = vmatpush.bf16.msrb.mxu3 %v6966_v15  ;;  %v8903_v50 = vld [vmem:[%s13232_s4 + $0x334] sm:$0xf]  ;;  %v7079_v15 = vld [vmem:[%s13232_s4 + $0x338] sm:$0xf0] }
 0x24e   : > { %2683 = vmatpush.bf16.msrb.mxu0 %v6906_v17  ;;  %2696 = vmatpush.bf16.msrb.mxu2 %v6970_v36  ;;  %v7078_v17 = vor.u32 %v8904_v20, %v7077_v12  ;;  %v7134_v36 = vor.u32 %v8918_v16, %v7133_v25  ;;  %v7082_v39 = vor.u32 %v8903_v50, %v7079_v15  ;;  %v7047_v12 = vld [vmem:[%s13232_s4 + $0x2f8] sm:$0xf0]  ;;  %v8909_v20 = vld [vmem:[%s13232_s4 + $0x364] sm:$0xf]  ;;  %v7037_v16 = vld [vmem:[%s13232_s4 + $0x2e0] sm:$0xf] }
 0x24f   : > { %v8894_v50 = vld [vmem:[%s13232_s4 + $0x2e4] sm:$0xf0]  ;;  %v7093_v15 = vld [vmem:[%s13232_s4 + $0x350] sm:$0xf] }
 0x251   : > { %2658 = vmatpush.bf16.msrb.mxu1 %v6894_v43  ;;  %2671 = vmatpush.bf16.msrb.mxu3 %v6958_v2  ;;  %v8901_v43 = vld [vmem:[%s13232_s4 + $0x324] sm:$0xf]  ;;  %v7071_v2 = vld [vmem:[%s13232_s4 + $0x328] sm:$0xf0] }
 0x252   : > { %2684 = vmatpush.bf16.msrb.mxu0 %v6898_v40  ;;  %2697 = vmatpush.bf16.msrb.mxu2 %v6962_v41  ;;  %v7070_v40 = vor.u32 %v8902_v38, %v7069_v37  ;;  %v7126_v41 = vor.u32 %v8916_v22, %v7125_v1  ;;  %v7074_v56 = vor.u32 %v8901_v43, %v7071_v2  ;;  %v7039_v37 = vld [vmem:[%s13232_s4 + $0x2e8] sm:$0xf0]  ;;  %v7237_v1 = vld [vmem:[%s13233_s5 + $0x340] sm:$0xf]  ;;  %v8936_v43 = vld [vmem:[%s13233_s5 + $0x344] sm:$0xf0] }
 0x253   : > { %v8935_v2 = vld [vmem:[%s13233_s5 + $0x344] sm:$0xf] }
 0x255   : > { %2659 = vmatpush.bf16.msrb.mxu1 %v6886_v62  ;;  %2672 = vmatpush.bf16.msrb.mxu3 %v6950_v4  ;;  %v7119_v62 = vld [vmem:[%s13232_s4 + $0x388] sm:$0xf0]  ;;  %v7062_v4 = vor.u32 %v8900_v54, %v7061_v52  ;;  %v7029_v54 = vld [vmem:[%s13232_s4 + $0x2d0] sm:$0xf] }
 0x256   : > { %2685 = vmatpush.bf16.msrb.mxu0 %v6890_v8  ;;  %2698 = vmatpush.bf16.msrb.mxu2 %v6954_v9  ;;  %v7066_v8 = vor.u32 %v8899_v58, %v7063_v51  ;;  %v7122_v9 = vor.u32 %v8913_v61, %v7119_v62  ;;  %v8891_v58 = vld [vmem:[%s13232_s4 + $0x2d4] sm:$0xf]  ;;  %v7031_v51 = vld [vmem:[%s13232_s4 + $0x2d8] sm:$0xf0]  ;;  %v7238_v61 = vor.u32 %v8936_v43, %v7237_v1 }
 0x257   : > { %v7242_v62 = vor.u32 %v8935_v2, %v7239_v23  ;;  %v7034_v29 = vor.u32 %v8891_v58, %v7031_v51  ;;  %v7205_v23 = vld [vmem:[%s13233_s5 + $0x300] sm:$0xf]  ;;  %v8943_v51 = vld [vmem:[%s13233_s5 + $0x384] sm:$0xf] }
 0x259   : > { %2660 = vmatpush.bf16.msrb.mxu1 %v6878_v33  ;;  %2673 = vmatpush.bf16.msrb.mxu3 %v6942_v34  ;;  %v7045_v33 = vld [vmem:[%s13232_s4 + $0x2f0] sm:$0xf]  ;;  %v8896_v34 = vld [vmem:[%s13232_s4 + $0x2f4] sm:$0xf0] }
 0x25a   : > { %2686 = vmatpush.bf16.msrb.mxu0 %v6882_v46  ;;  %2699 = vmatpush.bf16.msrb.mxu2 %v6946_v47  ;;  %v7101_v46 = vld [vmem:[%s13232_s4 + $0x360] sm:$0xf]  ;;  %v8910_v47 = vld [vmem:[%s13232_s4 + $0x364] sm:$0xf0] }
 0x25b   : > { %v7102_v25 = vor.u32 %v8910_v47, %v7101_v46  ;;  %v8931_v46 = vld [vmem:[%s13233_s5 + $0x324] sm:$0xf]  ;;  %v7223_v47 = vld [vmem:[%s13233_s5 + $0x328] sm:$0xf0] }
 0x25c   : > { %2661 = vmatmul.bf16.vlgmr.msrb.gmra.mxu1 %v10895_v18  ;;  %6995 = vmatmul.msk.bf16.vlgmr.msrb.gmra.mxu3 %vm1532_vm11, %v10864_v55 }
 0x25d   : > { %2898 = vmatpush.bf16.msra.mxu3 %v7086_v49  ;;  %2912 = vmatpush.bf16.msra.mxu1 %v7142_v11  ;;  %v8895_v49 = vld [vmem:[%s13232_s4 + $0x2f4] sm:$0xf] }
 0x25e   : > { %2924 = vmatpush.bf16.msra.mxu2 %v7090_v21  ;;  %2938 = vmatpush.bf16.msra.mxu0 %v7146_v24  ;;  %v7103_v21 = vld [vmem:[%s13232_s4 + $0x368] sm:$0xf0]  ;;  %v7046_v24 = vor.u32 %v8896_v34, %v7045_v33  ;;  %v7050_v53 = vor.u32 %v8895_v49, %v7047_v12  ;;  %v7285_v33 = vld [vmem:[%s13233_s5 + $0x3a0] sm:$0xf]  ;;  %v8948_v34 = vld [vmem:[%s13233_s5 + $0x3a4] sm:$0xf0] }
 0x25f   : > { %2687 = vmatmul.bf16.vlgmr.msrb.gmra.mxu0 %v10895_v18  ;;  %6996 = vmatmul.msk.bf16.vlgmr.msrb.gmra.mxu2 %vm1532_vm11, %v10864_v55  ;;  %v7117_v55 = vld [vmem:[%s13232_s4 + $0x380] sm:$0xf]  ;;  %v8914_v18 = vld [vmem:[%s13232_s4 + $0x384] sm:$0xf0]  ;;  %v7106_v60 = vor.u32 %v8909_v20, %v7103_v21  ;;  %v8947_v12 = vld [vmem:[%s13233_s5 + $0x3a4] sm:$0xf] }
 0x260   : > { %v7118_v6 = vor.u32 %v8914_v18, %v7117_v55  ;;  %v1558_v57 = vpop.f32.mrf.mxu1  ;;  %v8892_v18 = vld [vmem:[%s13232_s4 + $0x2d4] sm:$0xf0]  ;;  %v7287_v20 = vld [vmem:[%s13233_s5 + $0x3a8] sm:$0xf0] }
 0x261   : > { %2899 = vmatpush.bf16.msra.mxu3 %v7078_v17  ;;  %2913 = vmatpush.bf16.msra.mxu1 %v7134_v36  ;;  %v1545_v45 = vpop.f32.mrf.mxu0  ;;  %v8908_v17 = vld [vmem:[%s13232_s4 + $0x354] sm:$0xf0]  ;;  %v8893_v36 = vld [vmem:[%s13232_s4 + $0x2e4] sm:$0xf]  ;;  %v7030_v19 = vor.u32 %v8892_v18, %v7029_v54 }
 0x262   : > { %2925 = vmatpush.bf16.msra.mxu2 %v7082_v39  ;;  %2939 = vmatpush.bf16.msra.mxu0 %v7138_v42  ;;  %v11160_v11 = vadd.f32 %v1558_v57, %v1545_v45  ;;  %v8907_v39 = vld [vmem:[%s13232_s4 + $0x354] sm:$0xf]  ;;  %v7095_v42 = vld [vmem:[%s13232_s4 + $0x358] sm:$0xf0]  ;;  %v7221_v57 = vld [vmem:[%s13233_s5 + $0x320] sm:$0xf] }
 0x263   : > { %v8932_v45 = vld [vmem:[%s13233_s5 + $0x324] sm:$0xf0] }
 0x265   : > { %2900 = vmatpush.bf16.msra.mxu3 %v7070_v40  ;;  %2914 = vmatpush.bf16.msra.mxu1 %v7126_v41  ;;  %v7038_v40 = vor.u32 %v8894_v50, %v7037_v16  ;;  %v7094_v41 = vor.u32 %v8908_v17, %v7093_v15  ;;  %v7222_v50 = vor.u32 %v8932_v45, %v7221_v57  ;;  %v8946_v17 = vld [vmem:[%s13233_s5 + $0x394] sm:$0xf0] }
 0x266   : > { %2926 = vmatpush.bf16.msra.mxu2 %v7074_v56  ;;  %2940 = vmatpush.bf16.msra.mxu0 %v7130_v59  ;;  %v1584_v38 = vpop.f32.mrf.mxu3  ;;  %v7042_v56 = vor.u32 %v8893_v36, %v7039_v37  ;;  %v7098_v59 = vor.u32 %v8907_v39, %v7095_v42  ;;  %v7226_v15 = vor.u32 %v8931_v46, %v7223_v47  ;;  %v8930_v36 = vld [vmem:[%s13233_s5 + $0x314] sm:$0xf0]  ;;  %v8929_v37 = vld [vmem:[%s13233_s5 + $0x314] sm:$0xf]  ;;  %v7279_v42 = vld [vmem:[%s13233_s5 + $0x398] sm:$0xf0] }
 0x267   : > { %v1571_v22 = vpop.f32.mrf.mxu2  ;;  %v8945_v39 = vld [vmem:[%s13233_s5 + $0x394] sm:$0xf]  ;;  %v8924_v47 = vld [vmem:[%s13233_s5 + $0x2e4] sm:$0xf0] }
 0x268   : > { %v1585_v3 = vadd.f32 %v1584_v38, %v1571_v22  ;;  %v1560_v52 = vpop.f32.mrf.mxu1  ;;  %v7215_v38 = vld [vmem:[%s13233_s5 + $0x318] sm:$0xf0] }
 0x269   : > { %2901 = vmatpush.bf16.msra.mxu3 %v7062_v4  ;;  %2915 = vmatpush.bf16.msra.mxu1 %v7118_v6  ;;  %v1547_v55 = vpop.f32.mrf.mxu0  ;;  %v7229_v4 = vld [vmem:[%s13233_s5 + $0x330] sm:$0xf]  ;;  %v7218_v43 = vor.u32 %v8929_v37, %v7215_v38  ;;  %v7183_v38 = vld [vmem:[%s13233_s5 + $0x2d8] sm:$0xf0] }
 0x26a   : > { %2927 = vmatpush.bf16.msra.mxu2 %v7066_v8  ;;  %2941 = vmatpush.bf16.msra.mxu0 %v7122_v9  ;;  %v7293_v6 = vld [vmem:[%s13233_s5 + $0x3b0] sm:$0xf]  ;;  %v8933_v8 = vld [vmem:[%s13233_s5 + $0x334] sm:$0xf]  ;;  %v7231_v9 = vld [vmem:[%s13233_s5 + $0x338] sm:$0xf0]  ;;  %v7230_v5 = vor.u32 %v8934_v63, %v7229_v4 }
 0x26b   : > { %v7294_v30 = vor.u32 %v8950_v7, %v7293_v6  ;;  %v7207_v55 = vld [vmem:[%s13233_s5 + $0x308] sm:$0xf0]  ;;  %v7197_v63 = vld [vmem:[%s13233_s5 + $0x2f0] sm:$0xf] }
 0x26d   : > { %2902 = vmatpush.bf16.msra.mxu3 %v7054_v31  ;;  %2916 = vmatpush.bf16.msra.mxu1 %v7110_v32  ;;  %v7234_v31 = vor.u32 %v8933_v8, %v7231_v9  ;;  %v7261_v8 = vld [vmem:[%s13233_s5 + $0x370] sm:$0xf]  ;;  %v8942_v9 = vld [vmem:[%s13233_s5 + $0x374] sm:$0xf0] }
 0x26e   : > { %2928 = vmatpush.bf16.msra.mxu2 %v7058_v35  ;;  %2942 = vmatpush.bf16.msra.mxu0 %v7114_v44  ;;  %v1586_v32 = vpop.f32.mrf.mxu3  ;;  %v7298_v35 = vor.u32 %v8949_v26, %v7295_v28  ;;  %v8926_v26 = vld [vmem:[%s13233_s5 + $0x2f4] sm:$0xf0]  ;;  %v8925_v28 = vld [vmem:[%s13233_s5 + $0x2f4] sm:$0xf] }
 0x26f   : > { %v1573_v44 = vpop.f32.mrf.mxu2  ;;  %v7198_v32 = vor.u32 %v8926_v26, %v7197_v63  ;;  %v8964_v63 = vld [vmem:[%s13232_s4 + $0x424] sm:$0xf0]  ;;  %v8978_v26 = vld [vmem:[%s13232_s4 + $0x494] sm:$0xf0] }
 0x270   : > { %v1753_v49 = vpop.f32.mrf.mxu1  ;;  %v8940_v44 = vld [vmem:[%s13233_s5 + $0x364] sm:$0xf0] }
 0x271   : > { %2903 = vmatpush.bf16.msra.mxu3 %v7046_v24  ;;  %2917 = vmatpush.bf16.msra.mxu1 %v7102_v25  ;;  %v1754_v21 = vadd.f32 %v1753_v49, %v11160_v11  ;;  %v1779_v24 = vpop.f32.mrf.mxu0  ;;  %v7286_v25 = vor.u32 %v8948_v34, %v7285_v33  ;;  %v7290_v11 = vor.u32 %v8947_v12, %v7287_v20  ;;  %v7189_v34 = vld [vmem:[%s13233_s5 + $0x2e0] sm:$0xf]  ;;  %v8923_v49 = vld [vmem:[%s13233_s5 + $0x2e4] sm:$0xf]  ;;  %v7191_v12 = vld [vmem:[%s13233_s5 + $0x2e8] sm:$0xf0] }
 0x272   : > { %2929 = vmatpush.bf16.msra.mxu2 %v7050_v53  ;;  %2943 = vmatpush.bf16.msra.mxu0 %v7106_v60  ;;  %v1780_v16 = vadd.f32 %v1779_v24, %v1585_v3  ;;  %v7213_v53 = vld [vmem:[%s13233_s5 + $0x310] sm:$0xf]  ;;  %v7269_v3 = vld [vmem:[%s13233_s5 + $0x380] sm:$0xf]  ;;  %v8939_v20 = vld [vmem:[%s13233_s5 + $0x364] sm:$0xf] }
 0x273   : > { %v7277_v60 = vld [vmem:[%s13233_s5 + $0x390] sm:$0xf]  ;;  %v7214_v22 = vor.u32 %v8930_v36, %v7213_v53  ;;  %v7194_v53 = vor.u32 %v8923_v49, %v7191_v12  ;;  %v8961_v49 = vld [vmem:[%s13232_s4 + $0x414] sm:$0xf]  ;;  %v7375_v12 = vld [vmem:[%s13232_s4 + $0x418] sm:$0xf0] }
 0x274   : > { %v7278_v1 = vor.u32 %v8946_v17, %v7277_v60  ;;  %v7245_v60 = vld [vmem:[%s13233_s5 + $0x350] sm:$0xf]  ;;  %v8938_v17 = vld [vmem:[%s13233_s5 + $0x354] sm:$0xf0] }
 0x275   : > { %2904 = vmatpush.bf16.msra.mxu3 %v7038_v40  ;;  %2918 = vmatpush.bf16.msra.mxu1 %v7094_v41  ;;  %v8944_v40 = vld [vmem:[%s13233_s5 + $0x384] sm:$0xf0]  ;;  %v7282_v41 = vor.u32 %v8945_v39, %v7279_v42  ;;  %v8937_v39 = vld [vmem:[%s13233_s5 + $0x354] sm:$0xf]  ;;  %v7247_v42 = vld [vmem:[%s13233_s5 + $0x358] sm:$0xf0] }
 0x276   : > { %2930 = vmatpush.bf16.msra.mxu2 %v7042_v56  ;;  %2944 = vmatpush.bf16.msra.mxu0 %v7098_v59  ;;  %v1766_v2 = vpop.f32.mrf.mxu3  ;;  %v8928_v56 = vld [vmem:[%s13233_s5 + $0x304] sm:$0xf0]  ;;  %v8927_v59 = vld [vmem:[%s13233_s5 + $0x304] sm:$0xf]  ;;  %v7270_v4 = vor.u32 %v8944_v40, %v7269_v3  ;;  %v8965_v3 = vld [vmem:[%s13232_s4 + $0x434] sm:$0xf] }
 0x277   : > { %v11307_v52 = vadd.f32 %v1766_v2, %v1754_v21  ;;  %v1792_v54 = vpop.f32.mrf.mxu2  ;;  %v7206_v6 = vor.u32 %v8928_v56, %v7205_v23  ;;  %v7210_v7 = vor.u32 %v8927_v59, %v7207_v55  ;;  %v7255_v21 = vld [vmem:[%s13233_s5 + $0x368] sm:$0xf0]  ;;  %v7246_v2 = vor.u32 %v8938_v17, %v7245_v60  ;;  %v8980_v23 = vld [vmem:[%s13232_s4 + $0x4a4] sm:$0xf0]  ;;  %v7391_v40 = vld [vmem:[%s13232_s4 + $0x438] sm:$0xf0] }
 0x278   : > { %7147 = vmatmul.msk.bf16.vlgmr.msra.gmra.mxu1 %vm1532_vm11, %v10290_v10  ;;  %v11318_v18 = vadd.f32 %v1792_v54, %v1780_v16  ;;  %v1755_v58 = vpop.f32.mrf.mxu1  ;;  %v8922_v16 = vld [vmem:[%s13233_s5 + $0x2d4] sm:$0xf0]  ;;  %v7258_v37 = vor.u32 %v8939_v20, %v7255_v21  ;;  %v8979_v56 = vld [vmem:[%s13232_s4 + $0x4a4] sm:$0xf]  ;;  %v7447_v59 = vld [vmem:[%s13232_s4 + $0x4a8] sm:$0xf0]  ;;  %v7250_v55 = vor.u32 %v8937_v39, %v7247_v42 }
 0x279   : > { %3133 = vmatpush.bf16.msrb.mxu1 %v7238_v61  ;;  %7148 = vmatmul.msk.bf16.vlgmr.msra.gmra.mxu0 %vm1532_vm11, %v10290_v10  ;;  %v7271_v61 = vld [vmem:[%s13233_s5 + $0x388] sm:$0xf0]  ;;  %v8975_v20 = vld [vmem:[%s13232_s4 + $0x484] sm:$0xf]  ;;  %v8974_v17 = vld [vmem:[%s13232_s4 + $0x474] sm:$0xf0] }
 0x27a   : > { %3159 = vmatpush.bf16.msrb.mxu0 %v7242_v62  ;;  %2905 = vmatpush.bf16.msra.mxu3 %v7030_v19  ;;  %v1781_v62 = vpop.f32.mrf.mxu0  ;;  %v7274_v19 = vor.u32 %v8943_v51, %v7271_v61  ;;  %v7431_v21 = vld [vmem:[%s13232_s4 + $0x488] sm:$0xf0] }
 0x27b   : > { %2931 = vmatpush.bf16.msra.mxu2 %v7034_v29  ;;  %v7199_v29 = vld [vmem:[%s13233_s5 + $0x2f8] sm:$0xf0]  ;;  %v7394_v62 = vor.u32 %v8965_v3, %v7391_v40  ;;  %v7434_v60 = vor.u32 %v8975_v20, %v7431_v21  ;;  %v8972_v3 = vld [vmem:[%s13232_s4 + $0x464] sm:$0xf0]  ;;  %v8957_v40 = vld [vmem:[%s13232_s4 + $0x3f4] sm:$0xf] }
 0x27c   : > { %v7202_v57 = vor.u32 %v8925_v28, %v7199_v29  ;;  %v8963_v28 = vld [vmem:[%s13232_s4 + $0x424] sm:$0xf]  ;;  %v7383_v29 = vld [vmem:[%s13232_s4 + $0x428] sm:$0xf0]  ;;  %v8995_v21 = vld [vmem:[%s13233_s5 + $0x434] sm:$0xf] }
 0x27d   : > { %3134 = vmatpush.bf16.msrb.mxu1 %v7230_v5  ;;  %2906 = vmatmul.bf16.vlgmr.msra.gmra.mxu3 %v10305_v27  ;;  %v7263_v5 = vld [vmem:[%s13233_s5 + $0x378] sm:$0xf0] }
 0x27e   : > { %3147 = vmatpush.bf16.msrb.mxu3 %v7294_v30  ;;  %3160 = vmatpush.bf16.msrb.mxu0 %v7234_v31  ;;  %v8941_v30 = vld [vmem:[%s13233_s5 + $0x374] sm:$0xf]  ;;  %v7262_v31 = vor.u32 %v8942_v9, %v7261_v8  ;;  %v1768_v33 = vpop.f32.mrf.mxu3  ;;  %v7437_v8 = vld [vmem:[%s13232_s4 + $0x490] sm:$0xf]  ;;  %v7450_v9 = vor.u32 %v8979_v56, %v7447_v59  ;;  %v7415_v56 = vld [vmem:[%s13232_s4 + $0x468] sm:$0xf0] }
 0x27f   : > { %3173 = vmatpush.bf16.msrb.mxu2 %v7298_v35  ;;  %v7253_v35 = vld [vmem:[%s13233_s5 + $0x360] sm:$0xf]  ;;  %v7266_v45 = vor.u32 %v8941_v30, %v7263_v5  ;;  %v1794_v46 = vpop.f32.mrf.mxu2  ;;  %v8977_v5 = vld [vmem:[%s13232_s4 + $0x494] sm:$0xf]  ;;  %v7438_v33 = vor.u32 %v8978_v26, %v7437_v8  ;;  %v7351_v8 = vld [vmem:[%s13232_s4 + $0x3e8] sm:$0xf0] }
 0x280   : > { %2932 = vmatmul.bf16.vlgmr.msra.gmra.mxu2 %v10305_v27  ;;  %v7254_v24 = vor.u32 %v8940_v44, %v7253_v35  ;;  %v7373_v35 = vld [vmem:[%s13232_s4 + $0x410] sm:$0xf]  ;;  %v8962_v44 = vld [vmem:[%s13232_s4 + $0x414] sm:$0xf0]  ;;  %v7407_v26 = vld [vmem:[%s13232_s4 + $0x458] sm:$0xf0] }
 0x281   : > { %3135 = vmatpush.bf16.msrb.mxu1 %v7222_v50  ;;  %v1999_v50 = vpop.f32.mrf.mxu1 }
 0x282   : > { %3148 = vmatpush.bf16.msrb.mxu3 %v7286_v25  ;;  %3161 = vmatpush.bf16.msrb.mxu0 %v7226_v15  ;;  %v7181_v25 = vld [vmem:[%s13233_s5 + $0x2d0] sm:$0xf]  ;;  %v7190_v15 = vor.u32 %v8924_v47, %v7189_v34  ;;  %v2025_v36 = vpop.f32.mrf.mxu0  ;;  %v7386_v34 = vor.u32 %v8963_v28, %v7383_v29  ;;  %v8976_v47 = vld [vmem:[%s13232_s4 + $0x484] sm:$0xf0] }
 0x283   : > { %3174 = vmatpush.bf16.msrb.mxu2 %v7290_v11  ;;  %v8921_v11 = vld [vmem:[%s13233_s5 + $0x2d4] sm:$0xf] }
 0x284   : > { %v7186_v54 = vor.u32 %v8921_v11, %v7183_v38  ;;  %v8959_v11 = vld [vmem:[%s13232_s4 + $0x404] sm:$0xf]  ;;  %v7423_v38 = vld [vmem:[%s13232_s4 + $0x478] sm:$0xf0] }
 0x285   : > { %3136 = vmatpush.bf16.msrb.mxu1 %v7214_v22  ;;  %v8966_v22 = vld [vmem:[%s13232_s4 + $0x434] sm:$0xf0] }
 0x286   : > { %3149 = vmatpush.bf16.msrb.mxu3 %v7278_v1  ;;  %3162 = vmatpush.bf16.msrb.mxu0 %v7218_v43  ;;  %v7389_v1 = vld [vmem:[%s13232_s4 + $0x430] sm:$0xf]  ;;  %v7445_v43 = vld [vmem:[%s13232_s4 + $0x4a0] sm:$0xf] }
 0x287   : > { %3175 = vmatpush.bf16.msrb.mxu2 %v7282_v41  ;;  %v7182_v41 = vor.u32 %v8922_v16, %v7181_v25  ;;  %v7390_v58 = vor.u32 %v8966_v22, %v7389_v1  ;;  %v1986_v51 = vpop.f32.mrf.mxu3  ;;  %v7446_v61 = vor.u32 %v8980_v23, %v7445_v43  ;;  %v7357_v22 = vld [vmem:[%s13232_s4 + $0x3f0] sm:$0xf]  ;;  %v8958_v43 = vld [vmem:[%s13232_s4 + $0x3f4] sm:$0xf0] }
 0x288   : > { %v7358_v59 = vor.u32 %v8958_v43, %v7357_v22 }
 0x289   : > { %3137 = vmatpush.bf16.msrb.mxu1 %v7206_v6  ;;  %v2001_v30 = vpop.f32.mrf.mxu1 }
 0x28a   : > { %3150 = vmatpush.bf16.msrb.mxu3 %v7270_v4  ;;  %3163 = vmatpush.bf16.msrb.mxu0 %v7210_v7  ;;  %v11422_v4 = vadd.f32 %v1999_v50, %v1986_v51  ;;  %v2012_v6 = vpop.f32.mrf.mxu2  ;;  %v7381_v7 = vld [vmem:[%s13232_s4 + $0x420] sm:$0xf]  ;;  %v7378_v50 = vor.u32 %v8961_v49, %v7375_v12  ;;  %v7341_v30 = vld [vmem:[%s13232_s4 + $0x3d0] sm:$0xf]  ;;  %v7399_v49 = vld [vmem:[%s13232_s4 + $0x448] sm:$0xf0] }
 0x28b   : > { %3176 = vmatpush.bf16.msrb.mxu2 %v7274_v19  ;;  %v11433_v19 = vadd.f32 %v2025_v36, %v2012_v6  ;;  %v7367_v36 = vld [vmem:[%s13232_s4 + $0x408] sm:$0xf0]  ;;  %v7349_v51 = vld [vmem:[%s13232_s4 + $0x3e0] sm:$0xf]  ;;  %v8996_v12 = vld [vmem:[%s13233_s5 + $0x434] sm:$0xf0] }
 0x28c   : > { %v7370_v1 = vor.u32 %v8959_v11, %v7367_v36  ;;  %v8994_v11 = vld [vmem:[%s13233_s5 + $0x424] sm:$0xf0] }
 0x28d   : > { %3138 = vmatpush.bf16.msrb.mxu1 %v7198_v32  ;;  %v2027_v32 = vpop.f32.mrf.mxu0 }
 0x28e   : > { %3151 = vmatpush.bf16.msrb.mxu3 %v7262_v31  ;;  %3164 = vmatpush.bf16.msrb.mxu0 %v7202_v57  ;;  %v7439_v31 = vld [vmem:[%s13232_s4 + $0x498] sm:$0xf0]  ;;  %v7382_v57 = vor.u32 %v8964_v63, %v7381_v7  ;;  %v8970_v7 = vld [vmem:[%s13232_s4 + $0x454] sm:$0xf0]  ;;  %v8955_v63 = vld [vmem:[%s13232_s4 + $0x3e4] sm:$0xf] }
 0x28f   : > { %3177 = vmatpush.bf16.msrb.mxu2 %v7266_v45  ;;  %v7429_v45 = vld [vmem:[%s13232_s4 + $0x480] sm:$0xf]  ;;  %v7442_v46 = vor.u32 %v8977_v5, %v7439_v31  ;;  %v1988_v25 = vpop.f32.mrf.mxu3 }
 0x290   : > { %v7430_v16 = vor.u32 %v8976_v47, %v7429_v45  ;;  %v8967_v47 = vld [vmem:[%s13232_s4 + $0x444] sm:$0xf] }
 0x291   : > { %3139 = vmatpush.bf16.msrb.mxu1 %v7190_v15 }
 0x292   : > { %3152 = vmatpush.bf16.msrb.mxu3 %v7254_v24  ;;  %3165 = vmatpush.bf16.msrb.mxu0 %v7194_v53  ;;  %v7374_v24 = vor.u32 %v8962_v44, %v7373_v35  ;;  %v2014_v15 = vpop.f32.mrf.mxu2  ;;  %v8960_v53 = vld [vmem:[%s13232_s4 + $0x404] sm:$0xf0] }
 0x293   : > { %3178 = vmatpush.bf16.msrb.mxu2 %v7258_v37  ;;  %v8973_v37 = vld [vmem:[%s13232_s4 + $0x474] sm:$0xf]  ;;  %v8968_v35 = vld [vmem:[%s13232_s4 + $0x444] sm:$0xf0] }
 0x294   : > { %v7426_v23 = vor.u32 %v8973_v37, %v7423_v38  ;;  %v8952_v15 = vld [vmem:[%s13232_s4 + $0x3c4] sm:$0xf0]  ;;  %v7597_v38 = vld [vmem:[%s13233_s5 + $0x4a0] sm:$0xf] }
 0x295   : > { %3140 = vmatpush.bf16.msrb.mxu1 %v7182_v41  ;;  %v7359_v41 = vld [vmem:[%s13232_s4 + $0x3f8] sm:$0xf0] }
 0x296   : > { %3153 = vmatpush.bf16.msrb.mxu3 %v7246_v2  ;;  %3166 = vmatpush.bf16.msrb.mxu0 %v7186_v54  ;;  %v7413_v2 = vld [vmem:[%s13232_s4 + $0x460] sm:$0xf]  ;;  %v8971_v54 = vld [vmem:[%s13232_s4 + $0x464] sm:$0xf] }
 0x297   : > { %3179 = vmatpush.bf16.msrb.mxu2 %v7250_v55  ;;  %v7414_v55 = vor.u32 %v8972_v3, %v7413_v2  ;;  %v7418_v6 = vor.u32 %v8971_v54, %v7415_v56  ;;  %v9009_v3 = vld [vmem:[%s13233_s5 + $0x4a4] sm:$0xf] }
 0x298   : > { %3141 = vmatmul.bf16.vlgmr.msrb.gmra.mxu1 %v10305_v27 }
 0x299   : > { %3388 = vmatpush.bf16.msra.mxu1 %v7446_v61  ;;  %7299 = vmatmul.msk.bf16.vlgmr.msrb.gmra.mxu3 %vm1532_vm11, %v10290_v10  ;;  %v8956_v61 = vld [vmem:[%s13232_s4 + $0x3e4] sm:$0xf0] }
 0x29a   : > { %3374 = vmatpush.bf16.msra.mxu3 %v7390_v58  ;;  %3414 = vmatpush.bf16.msra.mxu0 %v7450_v9  ;;  %v7362_v58 = vor.u32 %v8957_v40, %v7359_v41  ;;  %v8969_v9 = vld [vmem:[%s13232_s4 + $0x454] sm:$0xf]  ;;  %v7350_v29 = vor.u32 %v8956_v61, %v7349_v51  ;;  %v7599_v40 = vld [vmem:[%s13233_s5 + $0x4a8] sm:$0xf0]  ;;  %v7525_v51 = vld [vmem:[%s13233_s5 + $0x410] sm:$0xf] }
 0x29b   : > { %3400 = vmatpush.bf16.msra.mxu2 %v7394_v62  ;;  %3167 = vmatmul.bf16.vlgmr.msrb.gmra.mxu0 %v10305_v27  ;;  %v7365_v27 = vld [vmem:[%s13232_s4 + $0x400] sm:$0xf]  ;;  %v7405_v62 = vld [vmem:[%s13232_s4 + $0x450] sm:$0xf]  ;;  %v7410_v45 = vor.u32 %v8969_v9, %v7407_v26  ;;  %v8992_v61 = vld [vmem:[%s13233_s5 + $0x414] sm:$0xf0] }
 0x29c   : > { %7300 = vmatmul.msk.bf16.vlgmr.msrb.gmra.mxu2 %vm1532_vm11, %v10290_v10  ;;  %v7421_v10 = vld [vmem:[%s13232_s4 + $0x470] sm:$0xf]  ;;  %v7366_v39 = vor.u32 %v8960_v53, %v7365_v27  ;;  %v7406_v32 = vor.u32 %v8970_v7, %v7405_v62  ;;  %v8951_v27 = vld [vmem:[%s13232_s4 + $0x3c4] sm:$0xf]  ;;  %v7402_v53 = vor.u32 %v8967_v47, %v7399_v49  ;;  %v9008_v7 = vld [vmem:[%s13233_s5 + $0x494] sm:$0xf0] }
 0x29d   : > { %3389 = vmatpush.bf16.msra.mxu1 %v7438_v33  ;;  %v7422_v42 = vor.u32 %v8974_v17, %v7421_v10  ;;  %v2188_v28 = vpop.f32.mrf.mxu1  ;;  %v8954_v33 = vld [vmem:[%s13232_s4 + $0x3d4] sm:$0xf0]  ;;  %v7533_v17 = vld [vmem:[%s13233_s5 + $0x420] sm:$0xf]  ;;  %v9007_v9 = vld [vmem:[%s13233_s5 + $0x494] sm:$0xf] }
 0x29e   : > { %3375 = vmatpush.bf16.msra.mxu3 %v7382_v57  ;;  %3415 = vmatpush.bf16.msra.mxu0 %v7442_v46  ;;  %v2189_v5 = vadd.f32 %v2188_v28, %v11422_v4  ;;  %v7354_v57 = vor.u32 %v8955_v63, %v7351_v8  ;;  %v8953_v4 = vld [vmem:[%s13232_s4 + $0x3d4] sm:$0xf]  ;;  %v7343_v46 = vld [vmem:[%s13232_s4 + $0x3d8] sm:$0xf0]  ;;  %v7342_v20 = vor.u32 %v8954_v33, %v7341_v30  ;;  %v11662_v28 = vrot.slane %v10238_v0, 2 }
 0x29f   : > { %3401 = vmatpush.bf16.msra.mxu2 %v7386_v34  ;;  %v7397_v34 = vld [vmem:[%s13232_s4 + $0x440] sm:$0xf]  ;;  %v8991_v63 = vld [vmem:[%s13233_s5 + $0x414] sm:$0xf]  ;;  %v7527_v8 = vld [vmem:[%s13233_s5 + $0x418] sm:$0xf0] }
 0x2a0   : > { %v2214_v31 = vpop.f32.mrf.mxu0  ;;  %v7398_v25 = vor.u32 %v8968_v35, %v7397_v34  ;;  %v7591_v26 = vld [vmem:[%s13233_s5 + $0x498] sm:$0xf0]  ;;  %v7581_v0 = vld [vmem:[%s13233_s5 + $0x480] sm:$0xf]  ;;  %v9006_v34 = vld [vmem:[%s13233_s5 + $0x484] sm:$0xf0] }
 0x2a1   : > { %3390 = vmatpush.bf16.msra.mxu1 %v7430_v16  ;;  %v2215_v44 = vadd.f32 %v2214_v31, %v11433_v19  ;;  %v7541_v19 = vld [vmem:[%s13233_s5 + $0x430] sm:$0xf]  ;;  %v7346_v16 = vor.u32 %v8953_v4, %v7343_v46  ;;  %v8990_v31 = vld [vmem:[%s13233_s5 + $0x404] sm:$0xf0]  ;;  %v7594_v33 = vor.u32 %v9007_v9, %v7591_v26  ;;  %v8989_v35 = vld [vmem:[%s13233_s5 + $0x404] sm:$0xf]  ;;  %v7582_v49 = vor.u32 %v9006_v34, %v7581_v0 }
 0x2a2   : > { %3376 = vmatpush.bf16.msra.mxu3 %v7374_v24  ;;  %3416 = vmatpush.bf16.msra.mxu0 %v7434_v60  ;;  %v7543_v24 = vld [vmem:[%s13233_s5 + $0x438] sm:$0xf0]  ;;  %v7542_v10 = vor.u32 %v8996_v12, %v7541_v19  ;;  %v7335_v60 = vld [vmem:[%s13232_s4 + $0x3c8] sm:$0xf0]  ;;  %v9005_v4 = vld [vmem:[%s13233_s5 + $0x484] sm:$0xf] }
 0x2a3   : > { %3402 = vmatpush.bf16.msra.mxu2 %v7378_v50  ;;  %v7333_v50 = vld [vmem:[%s13232_s4 + $0x3c0] sm:$0xf]  ;;  %v2201_v36 = vpop.f32.mrf.mxu3  ;;  %v7546_v37 = vor.u32 %v8995_v21, %v7543_v24  ;;  %v7338_v56 = vor.u32 %v8951_v27, %v7335_v60  ;;  %v7583_v46 = vld [vmem:[%s13233_s5 + $0x488] sm:$0xf0]  ;;  %v7509_v19 = vld [vmem:[%s13233_s5 + $0x3f0] sm:$0xf] }
 0x2a4   : > { %v7334_v2 = vor.u32 %v8952_v15, %v7333_v50  ;;  %v8988_v12 = vld [vmem:[%s13233_s5 + $0x3f4] sm:$0xf0]  ;;  %v7586_v21 = vor.u32 %v9005_v4, %v7583_v46  ;;  %v7573_v24 = vld [vmem:[%s13233_s5 + $0x470] sm:$0xf]  ;;  %v7511_v50 = vld [vmem:[%s13233_s5 + $0x3f8] sm:$0xf0] }
 0x2a5   : > { %3391 = vmatpush.bf16.msra.mxu1 %v7422_v42  ;;  %v8993_v42 = vld [vmem:[%s13233_s5 + $0x424] sm:$0xf]  ;;  %v2190_v43 = vpop.f32.mrf.mxu1  ;;  %v9003_v15 = vld [vmem:[%s13233_s5 + $0x474] sm:$0xf]  ;;  %v7575_v27 = vld [vmem:[%s13233_s5 + $0x478] sm:$0xf0] }
 0x2a6   : > { %3377 = vmatpush.bf16.msra.mxu3 %v7366_v39  ;;  %3417 = vmatpush.bf16.msra.mxu0 %v7426_v23  ;;  %v9010_v39 = vld [vmem:[%s13233_s5 + $0x4a4] sm:$0xf0]  ;;  %v2227_v22 = vpop.f32.mrf.mxu2  ;;  %v7535_v23 = vld [vmem:[%s13233_s5 + $0x428] sm:$0xf0]  ;;  %v7501_v60 = vld [vmem:[%s13233_s5 + $0x3e0] sm:$0xf] }
 0x2a7   : > { %3403 = vmatpush.bf16.msra.mxu2 %v7370_v1  ;;  %v11617_v1 = vadd.f32 %v2201_v36, %v2189_v5  ;;  %v11628_v41 = vadd.f32 %v2227_v22, %v2215_v44  ;;  %v7538_v62 = vor.u32 %v8993_v42, %v7535_v23  ;;  %v7517_v5 = vld [vmem:[%s13233_s5 + $0x400] sm:$0xf]  ;;  %v7578_v36 = vor.u32 %v9003_v15, %v7575_v27  ;;  %v7503_v42 = vld [vmem:[%s13233_s5 + $0x3e8] sm:$0xf0]  ;;  %v9001_v22 = vld [vmem:[%s13233_s5 + $0x464] sm:$0xf] }
 0x2a8   : > { %v2216_v54 = vpop.f32.mrf.mxu0  ;;  %v7518_v47 = vor.u32 %v8990_v31, %v7517_v5  ;;  %v7567_v43 = vld [vmem:[%s13233_s5 + $0x468] sm:$0xf0]  ;;  %v7485_v9 = vld [vmem:[%s13233_s5 + $0x3c0] sm:$0xf]  ;;  %v8982_v26 = vld [vmem:[%s13233_s5 + $0x3c4] sm:$0xf0] }
 0x2a9   : > { %3392 = vmatpush.bf16.msra.mxu1 %v7414_v55  ;;  %v7534_v55 = vor.u32 %v8994_v11, %v7533_v17  ;;  %v8986_v17 = vld [vmem:[%s13233_s5 + $0x3e4] sm:$0xf0]  ;;  %v8984_v54 = vld [vmem:[%s13233_s5 + $0x3d4] sm:$0xf0]  ;;  %v7549_v5 = vld [vmem:[%s13233_s5 + $0x440] sm:$0xf] }
 0x2aa   : > { %3378 = vmatpush.bf16.msra.mxu3 %v7358_v59  ;;  %3418 = vmatpush.bf16.msra.mxu0 %v7418_v6  ;;  %v11631_v59 = vrot.slane %v10241_v14, 2  ;;  %v7602_v6 = vor.u32 %v9009_v3, %v7599_v40  ;;  %v7589_v14 = vld [vmem:[%s13233_s5 + $0x490] sm:$0xf]  ;;  %v7502_v23 = vor.u32 %v8986_v17, %v7501_v60  ;;  %v8998_v31 = vld [vmem:[%s13233_s5 + $0x444] sm:$0xf0] }
 0x2ab   : > { %3404 = vmatpush.bf16.msra.mxu2 %v7362_v58  ;;  %v7598_v58 = vor.u32 %v9010_v39, %v7597_v38  ;;  %v7590_v30 = vor.u32 %v9008_v7, %v7589_v14  ;;  %v9002_v38 = vld [vmem:[%s13233_s5 + $0x464] sm:$0xf0]  ;;  %v8985_v39 = vld [vmem:[%s13233_s5 + $0x3e4] sm:$0xf]  ;;  %v7493_v40 = vld [vmem:[%s13233_s5 + $0x3d0] sm:$0xf] }
 0x2ac   : > { %v8999_v14 = vld [vmem:[%s13233_s5 + $0x454] sm:$0xf]  ;;  %v7559_v7 = vld [vmem:[%s13233_s5 + $0x458] sm:$0xf0]  ;;  %v7551_v0 = vld [vmem:[%s13233_s5 + $0x448] sm:$0xf0] }
 0x2ad   : > { %3393 = vmatpush.bf16.msra.mxu1 %v7406_v32  ;;  %v2203_v32 = vpop.f32.mrf.mxu3 }
 0x2ae   : > { %3379 = vmatpush.bf16.msra.mxu3 %v7350_v29  ;;  %3419 = vmatpush.bf16.msra.mxu0 %v7410_v45  ;;  %v7526_v29 = vor.u32 %v8992_v61, %v7525_v51  ;;  %v2229_v44 = vpop.f32.mrf.mxu2  ;;  %v7519_v45 = vld [vmem:[%s13233_s5 + $0x408] sm:$0xf0]  ;;  %v7557_v51 = vld [vmem:[%s13233_s5 + $0x450] sm:$0xf]  ;;  %v9000_v61 = vld [vmem:[%s13233_s5 + $0x454] sm:$0xf0] }
 0x2af   : > { %3405 = vmatpush.bf16.msra.mxu2 %v7354_v57  ;;  %v7530_v57 = vor.u32 %v8991_v63, %v7527_v8  ;;  %v7494_v63 = vor.u32 %v8984_v54, %v7493_v40  ;;  %v7558_v8 = vor.u32 %v9000_v61, %v7557_v51  ;;  %v8981_v32 = vld [vmem:[%s13233_s5 + $0x3c4] sm:$0xf]  ;;  %v7550_v44 = vor.u32 %v8998_v31, %v7549_v5 }
 0x2b1   : > { %3394 = vmatpush.bf16.msra.mxu1 %v7398_v25  ;;  %v9004_v25 = vld [vmem:[%s13233_s5 + $0x474] sm:$0xf0] }
 0x2b2   : > { %3380 = vmatpush.bf16.msra.mxu3 %v7342_v20  ;;  %3420 = vmatpush.bf16.msra.mxu0 %v7402_v53  ;;  %v7522_v20 = vor.u32 %v8989_v35, %v7519_v45  ;;  %v7510_v53 = vor.u32 %v8988_v12, %v7509_v19  ;;  %v7486_v35 = vor.u32 %v8982_v26, %v7485_v9 }
 0x2b3   : > { %3406 = vmatpush.bf16.msra.mxu2 %v7346_v16  ;;  %v8987_v16 = vld [vmem:[%s13233_s5 + $0x3f4] sm:$0xf] }
 0x2b4   : > { %7451 = vmatmul.msk.bf16.vlgmr.msra.gmra.mxu1 %vm1532_vm11, %v11631_v59  ;;  %v7514_v11 = vor.u32 %v8987_v16, %v7511_v50 }
 0x2b5   : > { %3609 = vmatpush.bf16.msrb.mxu1 %v7542_v10  ;;  %7452 = vmatmul.msk.bf16.vlgmr.msra.gmra.mxu0 %vm1532_vm11, %v11631_v59  ;;  %v7574_v10 = vor.u32 %v9004_v25, %v7573_v24 }
 0x2b6   : > { %3635 = vmatpush.bf16.msrb.mxu0 %v7546_v37  ;;  %3381 = vmatpush.bf16.msra.mxu3 %v7334_v2  ;;  %v7565_v37 = vld [vmem:[%s13233_s5 + $0x460] sm:$0xf] }
 0x2b7   : > { %3407 = vmatpush.bf16.msra.mxu2 %v7338_v56  ;;  %v7566_v3 = vor.u32 %v9002_v38, %v7565_v37 }
 0x2b9   : > { %3610 = vmatpush.bf16.msrb.mxu1 %v7534_v55  ;;  %3382 = vmatmul.bf16.vlgmr.msra.gmra.mxu3 %v11662_v28  ;;  %v2440_v2 = vpop.f32.mrf.mxu1  ;;  %v7506_v55 = vor.u32 %v8985_v39, %v7503_v42 }
 0x2ba   : > { %3623 = vmatpush.bf16.msrb.mxu3 %v7598_v58  ;;  %3636 = vmatpush.bf16.msrb.mxu0 %v7538_v62  ;;  %v7570_v58 = vor.u32 %v9001_v22, %v7567_v43  ;;  %v8983_v62 = vld [vmem:[%s13233_s5 + $0x3d4] sm:$0xf] }
 0x2bb   : > { %3649 = vmatpush.bf16.msrb.mxu2 %v7602_v6  ;;  %v7495_v6 = vld [vmem:[%s13233_s5 + $0x3d8] sm:$0xf0] }
 0x2bc   : > { %3408 = vmatmul.bf16.vlgmr.msra.gmra.mxu2 %v11662_v28  ;;  %v2466_v56 = vpop.f32.mrf.mxu0 }
 0x2bd   : > { %3611 = vmatpush.bf16.msrb.mxu1 %v7526_v29  ;;  %v7498_v29 = vor.u32 %v8983_v62, %v7495_v6 }
 0x2be   : > { %3624 = vmatpush.bf16.msrb.mxu3 %v7590_v30  ;;  %3637 = vmatpush.bf16.msrb.mxu0 %v7530_v57  ;;  %v7562_v30 = vor.u32 %v8999_v14, %v7559_v7  ;;  %v7487_v57 = vld [vmem:[%s13233_s5 + $0x3c8] sm:$0xf0] }
 0x2bf   : > { %3650 = vmatpush.bf16.msrb.mxu2 %v7594_v33  ;;  %v8997_v33 = vld [vmem:[%s13233_s5 + $0x444] sm:$0xf]  ;;  %v7490_v4 = vor.u32 %v8981_v32, %v7487_v57 }
 0x2c0   : > { %v7554_v46 = vor.u32 %v8997_v33, %v7551_v0  ;;  %v3665_v0 = vld [vmem:[%s13234_s6] sm:$0x3] }
 0x2c1   : > { %3612 = vmatpush.bf16.msrb.mxu1 %v7518_v47  ;;  %v2442_v34 = vpop.f32.mrf.mxu1 }
 0x2c2   : > { %3625 = vmatpush.bf16.msrb.mxu3 %v7582_v49  ;;  %3638 = vmatpush.bf16.msrb.mxu0 %v7522_v20  ;;  %v3794_v34 = vld [vmem:[%s13235_s7 + $0x180] sm:$0xff] }
 0x2c3   : > { %3651 = vmatpush.bf16.msrb.mxu2 %v7586_v21  ;;  %v2427_v47 = vpop.f32.mrf.mxu3 }
 0x2c4   : > { %v2468_v45 = vpop.f32.mrf.mxu0  ;;  %v2441_v19 = vadd.f32 %v2440_v2, %v2427_v47 }
 0x2c5   : > { %3613 = vmatpush.bf16.msrb.mxu1 %v7510_v53 }
 0x2c6   : > { %3626 = vmatpush.bf16.msrb.mxu3 %v7574_v10  ;;  %3639 = vmatpush.bf16.msrb.mxu0 %v7514_v11  ;;  %v2453_v49 = vpop.f32.mrf.mxu2  ;;  %v2470_v20 = vadd.f32 %v2441_v19, %v11307_v52 }
 0x2c7   : > { %3652 = vmatpush.bf16.msrb.mxu2 %v7578_v36  ;;  %v2467_v12 = vadd.f32 %v2466_v56, %v2453_v49 }
 0x2c9   : > { %3614 = vmatpush.bf16.msrb.mxu1 %v7502_v23  ;;  %v2471_v21 = vadd.f32 %v2467_v12, %v11318_v18 }
 0x2ca   : > { %3627 = vmatpush.bf16.msrb.mxu3 %v7566_v3  ;;  %3640 = vmatpush.bf16.msrb.mxu0 %v7506_v55 }
 0x2cb   : > { %3653 = vmatpush.bf16.msrb.mxu2 %v7570_v58  ;;  %v2429_v24 = vpop.f32.mrf.mxu3 }
 0x2cd   : > { %3615 = vmatpush.bf16.msrb.mxu1 %v7494_v63 }
 0x2ce   : > { %3628 = vmatpush.bf16.msrb.mxu3 %v7558_v8  ;;  %3641 = vmatpush.bf16.msrb.mxu0 %v7498_v29  ;;  %v2455_v25 = vpop.f32.mrf.mxu2 }
 0x2cf   : > { %3654 = vmatpush.bf16.msrb.mxu2 %v7562_v30 }
 0x2d1   : > { %3616 = vmatpush.bf16.msrb.mxu1 %v7486_v35 }
 0x2d2   : > { %3629 = vmatpush.bf16.msrb.mxu3 %v7550_v44  ;;  %3642 = vmatpush.bf16.msrb.mxu0 %v7490_v4 }
 0x2d3   : > { %3655 = vmatpush.bf16.msrb.mxu2 %v7554_v46 }
 0x2d4   : > { %3617 = vmatmul.bf16.vlgmr.msrb.gmra.mxu1 %v11662_v28 }
 0x2d5   : > { %7603 = vmatmul.msk.bf16.vlgmr.msrb.gmra.mxu3 %vm1532_vm11, %v11631_v59  ;;  %3643 = vmatmul.bf16.vlgmr.msrb.gmra.mxu0 %v11662_v28 }
 0x2d6   : > { %7604 = vmatmul.msk.bf16.vlgmr.msrb.gmra.mxu2 %vm1532_vm11, %v11631_v59 }
 0x2d9   : > { %v2662_v16 = vpop.f32.mrf.mxu1 }
 0x2dc   : > { %v2688_v50 = vpop.f32.mrf.mxu0 }
 0x2df   : > { %v2675_v15 = vpop.f32.mrf.mxu3 }
 0x2e0   : > { %v2676_v27 = vadd.f32 %v2675_v15, %v2662_v16  ;;  %v3668_v16 = vperm.slane %v3665_v0, 1 }
 0x2e1   : > { %v2664_v10 = vpop.f32.mrf.mxu1 }
 0x2e2   : > { %v2701_v53 = vpop.f32.mrf.mxu2  ;;  %v2705_v18 = vadd.f32 %v2676_v27, %v11617_v1  ;;  %v3949_v27 = vunpack.c.h.b16 %v3794_v34  ;;  %v9041_v10 = vld [vmem:[%s13235_s7 + $0xec] sm:$0xf0] }
 0x2e3   : > { %v2702_v52 = vadd.f32 %v2701_v53, %v2688_v50 }
 0x2e4   : > { %v2690_v60 = vpop.f32.mrf.mxu0 }
 0x2e5   : > { %v2706_v17 = vadd.f32 %v2702_v52, %v11628_v41  ;;  %v7723_v52 = vld [vmem:[%s13235_s7 + $0xe0] sm:$0xf] }
 0x2e7   : > { %v2677_v11 = vpop.f32.mrf.mxu3 }
 0x2ea   : > { %v2703_v36 = vpop.f32.mrf.mxu2 }
 0x2f5   : > { %v2920_v28 = vpop.f32.mrf.mxu1 }
 0x2f6   : > { %v2946_v37 = vpop.f32.mrf.mxu0 }
 0x2fd   : > { %v2922_v38 = vpop.f32.mrf.mxu1 }
 0x2fe   : > { %v2948_v59 = vpop.f32.mrf.mxu0  ;;  %v7724_v38 = vor.u32 %v9041_v10, %v7723_v52 }
 0x2ff   : > { %v9037_v59 = vld [vmem:[%s13235_s7 + $0xcc] sm:$0xf0] }
 0x300   : > { %v2907_v39 = vpop.f32.mrf.mxu3 }
 0x301   : > { %v2921_v42 = vadd.f32 %v2920_v28, %v2907_v39  ;;  %v7707_v28 = vld [vmem:[%s13235_s7 + $0xc0] sm:$0xf]  ;;  %v9039_v39 = vld [vmem:[%s13235_s7 + $0xe4] sm:$0xf] }
 0x303   : > { %v2933_v22 = vpop.f32.mrf.mxu2  ;;  %v2950_v2 = vadd.f32 %v2921_v42, %v2470_v20  ;;  %v3667_v20 = vperm.slane %v3665_v0, 0  ;;  %v7725_v42 = vld [vmem:[%s13235_s7 + $0xf0] sm:$0xf0]  ;;  %v9049_v0 = vld [vmem:[%s13235_s7 + $0x12c] sm:$0xf0] }
 0x304   : > { %v2947_v43 = vadd.f32 %v2946_v37, %v2933_v22  ;;  %v4001_v22 = vpack.c.b16 %v3949_v27, %v3949_v27  ;;  %v9023_v27 = vld [vmem:[%s13235_s7 + $0x64] sm:$0xf] }
 0x306   : > { %v2951_v23 = vadd.f32 %v2947_v43, %v2471_v21  ;;  %v3948_v21 = vunpack.c.l.b16 %v3794_v34  ;;  %v3675_v43 = vpack.c.bf16 %v9871_v48, %v9871_v48  ;;  %v7691_v48 = vld [vmem:[%s13235_s7 + $0xa0] sm:$0xf] }
 0x307   : > { %v7659_v34 = vld [vmem:[%s13235_s7 + $0x60] sm:$0xf] }
 0x308   : > { %v2909_v3 = vpop.f32.mrf.mxu3 }
 0x30b   : > { %v2935_v40 = vpop.f32.mrf.mxu2 }
 0x30c   : > { %v7787_v40 = vld [vmem:[%s13235_s7 + $0x160] sm:$0xf] }
 0x315   : > { %v3142_v54 = vpop.f32.mrf.mxu1 }
 0x318   : > { %v3168_v56 = vpop.f32.mrf.mxu0 }
 0x31c   : > { %v3155_v1 = vpop.f32.mrf.mxu3 }
 0x31d   : > { %v3144_v58 = vpop.f32.mrf.mxu1  ;;  %v3156_v5 = vadd.f32 %v3155_v1, %v3142_v54  ;;  %v9057_v54 = vld [vmem:[%s13235_s7 + $0x16c] sm:$0xf0]  ;;  %v9035_v1 = vld [vmem:[%s13235_s7 + $0xc4] sm:$0xf] }
 0x31e   : > { %v7708_v58 = vor.u32 %v9037_v59, %v7707_v28  ;;  %v9038_v59 = vld [vmem:[%s13235_s7 + $0xd4] sm:$0xf0] }
 0x31f   : > { %v3181_v55 = vpop.f32.mrf.mxu2  ;;  %v3185_v35 = vadd.f32 %v3156_v5, %v2705_v18  ;;  %v4000_v18 = vpack.c.b16 %v3948_v21, %v3948_v21  ;;  %v7693_v5 = vld [vmem:[%s13235_s7 + $0xb0] sm:$0xf0]  ;;  %v7739_v21 = vld [vmem:[%s13235_s7 + $0x100] sm:$0xf] }
 0x320   : > { %v3170_v41 = vpop.f32.mrf.mxu0  ;;  %v3182_v31 = vadd.f32 %v3181_v55, %v3168_v56  ;;  %v7709_v55 = vld [vmem:[%s13235_s7 + $0xd0] sm:$0xf0] }
 0x321   : > { %v4057_v3 = vsel %vm1196_vm5, %v4000_v18, 0  ;;  %v7788_v41 = vor.u32 %v9057_v54, %v7787_v40  ;;  %v7661_v18 = vld [vmem:[%s13235_s7 + $0x70] sm:$0xf0] }
 0x322   : > { %v3186_v4 = vadd.f32 %v3182_v31, %v2706_v17  ;;  %v9051_v31 = vld [vmem:[%s13235_s7 + $0x144] sm:$0xf] }
 0x324   : > { %v3157_v51 = vpop.f32.mrf.mxu3 }
 0x325   : > { %v4060_v51 = vsel %vm1196_vm5, %v4001_v22, 0 }
 0x327   : > { %v3183_v61 = vpop.f32.mrf.mxu2 }
 0x328   : > { %v9055_v61 = vld [vmem:[%s13235_s7 + $0x164] sm:$0xf] }
 0x331   : > { %v3396_v62 = vpop.f32.mrf.mxu1 }
 0x332   : > { %v3422_v6 = vpop.f32.mrf.mxu0 }
 0x339   : > { %v3398_v14 = vpop.f32.mrf.mxu1 }
 0x33a   : > { %v3424_v7 = vpop.f32.mrf.mxu0  ;;  %v7771_v14 = vld [vmem:[%s13235_s7 + $0x140] sm:$0xf] }
 0x33b   : > { %v9053_v7 = vld [vmem:[%s13235_s7 + $0x14c] sm:$0xf0] }
 0x33c   : > { %v3383_v63 = vpop.f32.mrf.mxu3 }
 0x33d   : > { %v3397_v32 = vadd.f32 %v3396_v62, %v3383_v63  ;;  %v7789_v62 = vld [vmem:[%s13235_s7 + $0x170] sm:$0xf0]  ;;  %v7675_v63 = vld [vmem:[%s13235_s7 + $0x80] sm:$0xf] }
 0x33f   : > { %v3409_v8 = vpop.f32.mrf.mxu2  ;;  %v3426_v49 = vadd.f32 %v3397_v32, %v2950_v2  ;;  %v3676_v2 = vpack.c.bf16 %v9876_v13, %v9876_v13  ;;  %v7728_v13 = vor.u32 %v9039_v39, %v7725_v42  ;;  %v7773_v32 = vld [vmem:[%s13235_s7 + $0x150] sm:$0xf0]  ;;  %v7664_v39 = vor.u32 %v9023_v27, %v7661_v18  ;;  %v7797_v27 = vld [vmem:[%s13235_s7 + $0x178] sm:$0xf0]  ;;  %v7779_v18 = vld [vmem:[%s13235_s7 + $0x148] sm:$0xf] }
 0x340   : > { %v3423_v57 = vadd.f32 %v3422_v6, %v3409_v8  ;;  %v9033_v6 = vld [vmem:[%s13235_s7 + $0xac] sm:$0xf0]  ;;  %v7712_v8 = vor.u32 %v9035_v1, %v7709_v55  ;;  %v9015_v55 = vld [vmem:[%s13235_s7 + $0x24] sm:$0xf] }
 0x342   : > { %v3427_v24 = vadd.f32 %v3423_v57, %v2951_v23  ;;  %v9029_v57 = vld [vmem:[%s13235_s7 + $0x8c] sm:$0xf0] }
 0x344   : > { %v3385_v9 = vpop.f32.mrf.mxu3 }
 0x345   : > { %v9031_v9 = vld [vmem:[%s13235_s7 + $0xa4] sm:$0xf] }
 0x347   : > { %v3411_v26 = vpop.f32.mrf.mxu2 }
 0x348   : > { %v7792_v26 = vor.u32 %v9055_v61, %v7789_v62  ;;  %v9040_v61 = vld [vmem:[%s13235_s7 + $0xec] sm:$0xf] }
 0x351   : > { %v3618_v29 = vpop.f32.mrf.mxu1 }
 0x352   : > { %v3644_v30 = vpop.f32.mrf.mxu0 }
 0x358   : > { %v3631_v33 = vpop.f32.mrf.mxu3 }
 0x359   : > { %v3632_v44 = vadd.f32 %v3631_v33, %v3618_v29  ;;  %v3657_v45 = vpop.f32.mrf.mxu2  ;;  %v3620_v47 = vpop.f32.mrf.mxu1  ;;  %v7692_v29 = vor.u32 %v9033_v6, %v7691_v48  ;;  %v7755_v33 = vld [vmem:[%s13235_s7 + $0x120] sm:$0xf]  ;;  %v9034_v48 = vld [vmem:[%s13235_s7 + $0xb4] sm:$0xf0] }
 0x35a   : > { %v3658_v46 = vadd.f32 %v3657_v45, %v3644_v30  ;;  %v3646_v12 = vpop.f32.mrf.mxu0  ;;  %v7772_v30 = vor.u32 %v9053_v7, %v7771_v14  ;;  %v7776_v45 = vor.u32 %v9051_v31, %v7773_v32  ;;  %v7756_v47 = vor.u32 %v9049_v0, %v7755_v33  ;;  %v7733_v14 = vld [vmem:[%s13235_s7 + $0xf8] sm:$0xf0]  ;;  %v7683_v7 = vld [vmem:[%s13235_s7 + $0x88] sm:$0xf]  ;;  %v9036_v32 = vld [vmem:[%s13235_s7 + $0xcc] sm:$0xf] }
 0x35b   : > { %v3661_v19 = vadd.f32 %v3632_v44, %v3185_v35  ;;  %v7696_v35 = vor.u32 %v9031_v9, %v7693_v5  ;;  %v9027_v44 = vld [vmem:[%s13235_s7 + $0x84] sm:$0xf]  ;;  %v7757_v12 = vld [vmem:[%s13235_s7 + $0x130] sm:$0xf0] }
 0x35c   : > { %v3662_v25 = vadd.f32 %v3658_v46, %v3186_v4  ;;  %v11895_v4 = vld [vmem:[%s13235_s7 + $0x188] sm:$0xff]  ;;  %v7676_v46 = vor.u32 %v9029_v57, %v7675_v63  ;;  %v9030_v63 = vld [vmem:[%s13235_s7 + $0x94] sm:$0xf0]  ;;  %v7717_v57 = vld [vmem:[%s13235_s7 + $0xd8] sm:$0xf0] }
 0x35d   : > { %v3663_v50 = vmax.f32 %v3426_v49, %v3661_v19  ;;  %v7677_v49 = vld [vmem:[%s13235_s7 + $0x90] sm:$0xf0]  ;;  %v9047_v19 = vld [vmem:[%s13235_s7 + $0x124] sm:$0xf]  ;;  %v3951_v6 = vunpack.c.h.b16 %v11895_v4  ;;  %v7684_v5 = vor.u32 %v9030_v63, %v7683_v7  ;;  %v7720_v0 = vor.u32 %v9036_v32, %v7717_v57  ;;  %v9044_v63 = vld [vmem:[%s13235_s7 + $0x10c] sm:$0xf] }
 0x35e   : > { %v3664_v15 = vmax.f32 %v3427_v24, %v3662_v25  ;;  %v9045_v24 = vld [vmem:[%s13235_s7 + $0x10c] sm:$0xf0]  ;;  %v3950_v25 = vunpack.c.l.b16 %v11895_v4  ;;  %v9028_v4 = vld [vmem:[%s13235_s7 + $0x8c] sm:$0xf] }
 0x35f   : > { %v3671_v53 = vadd.f32 %v3667_v20, %v3663_v50  ;;  %v9025_v20 = vld [vmem:[%s13235_s7 + $0x6c] sm:$0xf0]  ;;  %v9042_v50 = vld [vmem:[%s13235_s7 + $0xf4] sm:$0xf0]  ;;  %v7740_v10 = vor.u32 %v9045_v24, %v7739_v21  ;;  %v4003_v31 = vpack.c.b16 %v3951_v6, %v3951_v6  ;;  %v9024_v24 = vld [vmem:[%s13235_s7 + $0x6c] sm:$0xf] }
 0x360   : > { %v3633_v60 = vpop.f32.mrf.mxu3  ;;  %v3672_v17 = vadd.f32 %v3668_v16, %v3664_v15  ;;  %v7731_v16 = vld [vmem:[%s13235_s7 + $0xe8] sm:$0xf]  ;;  %v7680_v15 = vor.u32 %v9027_v44, %v7677_v49  ;;  %v7660_v52 = vor.u32 %v9025_v20, %v7659_v34  ;;  %v7701_v44 = vld [vmem:[%s13235_s7 + $0xb8] sm:$0xf0]  ;;  %v9058_v21 = vld [vmem:[%s13235_s7 + $0x174] sm:$0xf0] }
 0x361   : > { %v3659_v11 = vpop.f32.mrf.mxu2  ;;  %v3673_v36 = vpack.c.bf16 %v3671_v53, %v3671_v53  ;;  %v7760_v53 = vor.u32 %v9047_v19, %v7757_v12  ;;  %v9043_v60 = vld [vmem:[%s13235_s7 + $0x104] sm:$0xf]  ;;  %v7732_v28 = vor.u32 %v9042_v50, %v7731_v16  ;;  %v4066_v34 = vsel %vm1196_vm5, %v4003_v31, 0  ;;  %v7667_v49 = vld [vmem:[%s13235_s7 + $0x68] sm:$0xf] }
 0x362   : > { %v3674_v37 = vpack.c.bf16 %v3672_v17, %v3672_v17  ;;  %v7741_v17 = vld [vmem:[%s13235_s7 + $0x110] sm:$0xf0]  ;;  %v7643_v11 = vld [vmem:[%s13235_s7 + $0x40] sm:$0xf]  ;;  %v9026_v19 = vld [vmem:[%s13235_s7 + $0x74] sm:$0xf0] }
 0x363   : > { %v3682_v23 = vsel %vm1196_vm5, %v3673_v36, 0  ;;  %v9021_v36 = vld [vmem:[%s13235_s7 + $0x4c] sm:$0xf0]  ;;  %v7744_v42 = vor.u32 %v9043_v60, %v7741_v17  ;;  %v7795_v12 = vld [vmem:[%s13235_s7 + $0x168] sm:$0xf]  ;;  %v7668_v20 = vor.u32 %v9026_v19, %v7667_v49 }
 0x364   : > { %3694 = vmatpush.bf16.msra.mxu3 %v3682_v23  ;;  %v3685_v56 = vsel %vm1196_vm5, %v3674_v37, 0  ;;  %3723 = vmatpush.bf16.msra.mxu2 %v3682_v23  ;;  %v4002_v37 = vpack.c.b16 %v3950_v25, %v3950_v25  ;;  %v7644_v22 = vor.u32 %v9021_v36, %v7643_v11  ;;  %v7627_v23 = vld [vmem:[%s13235_s7 + $0x20] sm:$0xf]  ;;  %v7669_v25 = vld [vmem:[%s13235_s7 + $0x78] sm:$0xf0]  ;;  %v7796_v16 = vor.u32 %v9058_v21, %v7795_v12 }
 0x365   : > { %3707 = vmatpush.bf16.msra.mxu1 %v3685_v56  ;;  %3736 = vmatpush.bf16.msra.mxu0 %v3685_v56  ;;  %v7699_v56 = vld [vmem:[%s13235_s7 + $0xa8] sm:$0xf]  ;;  %v7672_v50 = vor.u32 %v9024_v24, %v7669_v25  ;;  %v9054_v17 = vld [vmem:[%s13235_s7 + $0x154] sm:$0xf0]  ;;  %v9020_v11 = vld [vmem:[%s13235_s7 + $0x4c] sm:$0xf] }
 0x366   : > { %v4063_v54 = vsel %vm1196_vm5, %v4002_v37, 0  ;;  %v7700_v62 = vor.u32 %v9034_v48, %v7699_v56  ;;  %v7653_v36 = vld [vmem:[%s13235_s7 + $0x58] sm:$0xf0]  ;;  %v9048_v48 = vld [vmem:[%s13235_s7 + $0x12c] sm:$0xf] }
 0x367   : > { %7605 = vmatmul.msk.bf16.vlgmr.msra.gmra.mxu3 %vm3677_vm12, %v3675_v43  ;;  %7607 = vmatmul.msk.bf16.vlgmr.msra.gmra.mxu2 %vm3677_vm12, %v3676_v2  ;;  %v7656_v37 = vor.u32 %v9020_v11, %v7653_v36  ;;  %v7621_v6 = vld [vmem:[%s13235_s7 + $0x18] sm:$0xf0]  ;;  %v9087_v12 = vld [vmem:[%s13235_s7 + $0x274] sm:$0xf]  ;;  %v7955_v11 = vld [vmem:[%s13235_s7 + $0x260] sm:$0xf0] }
 0x368   : > { %4068 = vmatpush.bf16.msrb.mxu3 %v7724_v38  ;;  %7606 = vmatmul.msk.bf16.vlgmr.msra.gmra.mxu1 %vm3677_vm12, %v3675_v43  ;;  %v7715_v38 = vld [vmem:[%s13235_s7 + $0xc8] sm:$0xf]  ;;  %v9019_v43 = vld [vmem:[%s13235_s7 + $0x44] sm:$0xf]  ;;  %v9103_v36 = vld [vmem:[%s13235_s7 + $0x2f4] sm:$0xf] }
 0x369   : > { %4084 = vmatpush.bf16.msrb.mxu1 %v4057_v3  ;;  %7608 = vmatmul.msk.bf16.vlgmr.msra.gmra.mxu0 %vm3677_vm12, %v3676_v2  ;;  %v7645_v2 = vld [vmem:[%s13235_s7 + $0x50] sm:$0xf0]  ;;  %v9017_v3 = vld [vmem:[%s13235_s7 + $0x2c] sm:$0xf0]  ;;  %v7716_v40 = vor.u32 %v9038_v59, %v7715_v38  ;;  %v9052_v38 = vld [vmem:[%s13235_s7 + $0x14c] sm:$0xf] }
 0x36a   : > { %4094 = vmatpush.bf16.msrb.mxu2 %v7728_v13  ;;  %4110 = vmatpush.bf16.msrb.mxu0 %v4060_v51  ;;  %v7648_v13 = vor.u32 %v9019_v43, %v7645_v2  ;;  %v7628_v1 = vor.u32 %v9017_v3, %v7627_v23  ;;  %v9013_v51 = vld [vmem:[%s13235_s7 + $0xc] sm:$0xf0]  ;;  %v7781_v59 = vld [vmem:[%s13235_s7 + $0x158] sm:$0xf0]  ;;  %v7763_v43 = vld [vmem:[%s13235_s7 + $0x128] sm:$0xf] }
 0x36b   : > { %v9050_v23 = vld [vmem:[%s13235_s7 + $0x134] sm:$0xf0]  ;;  %v9016_v3 = vld [vmem:[%s13235_s7 + $0x2c] sm:$0xf] }
 0x36c   : > { %4069 = vmatpush.bf16.msrb.mxu3 %v7708_v58  ;;  %v7629_v58 = vld [vmem:[%s13235_s7 + $0x30] sm:$0xf0] }
 0x36d   : > { %4085 = vmatpush.bf16.msrb.mxu1 %v7788_v41  ;;  %v7611_v41 = vld [vmem:[%s13235_s7] sm:$0xf] }
 0x36e   : > { %4095 = vmatpush.bf16.msrb.mxu2 %v7712_v8  ;;  %4111 = vmatpush.bf16.msrb.mxu0 %v7792_v26  ;;  %v7632_v8 = vor.u32 %v9015_v55, %v7629_v58  ;;  %v7612_v9 = vor.u32 %v9013_v51, %v7611_v41  ;;  %v9011_v26 = vld [vmem:[%s13235_s7 + $0x4] sm:$0xf]  ;;  %v7619_v55 = vld [vmem:[%s13235_s7 + $0x8] sm:$0xf]  ;;  %v9014_v58 = vld [vmem:[%s13235_s7 + $0x14] sm:$0xf0] }
 0x36f   : > { %v7747_v41 = vld [vmem:[%s13235_s7 + $0x108] sm:$0xf]  ;;  %v7620_v51 = vor.u32 %v9014_v58, %v7619_v55 }
 0x370   : > { %4070 = vmatpush.bf16.msrb.mxu3 %v7692_v29  ;;  %v7613_v29 = vld [vmem:[%s13235_s7 + $0x10] sm:$0xf0] }
 0x371   : > { %4086 = vmatpush.bf16.msrb.mxu1 %v7772_v30  ;;  %v7736_v30 = vor.u32 %v9040_v61, %v7733_v14  ;;  %v7616_v33 = vor.u32 %v9011_v26, %v7613_v29  ;;  %v9046_v61 = vld [vmem:[%s13235_s7 + $0x114] sm:$0xf0] }
 0x372   : > { %4096 = vmatpush.bf16.msrb.mxu2 %v7696_v35  ;;  %4112 = vmatpush.bf16.msrb.mxu0 %v7776_v45  ;;  %v9032_v35 = vld [vmem:[%s13235_s7 + $0xac] sm:$0xf]  ;;  %v7748_v14 = vor.u32 %v9046_v61, %v7747_v41  ;;  %v8001_v41 = vld [vmem:[%s13235_s7 + $0x2b0] sm:$0xf]  ;;  %v9075_v61 = vld [vmem:[%s13235_s7 + $0x214] sm:$0xf] }
 0x373   : > { %v7704_v45 = vor.u32 %v9032_v35, %v7701_v44 }
 0x374   : > { %4071 = vmatpush.bf16.msrb.mxu3 %v7676_v46  ;;  %v7685_v46 = vld [vmem:[%s13235_s7 + $0x98] sm:$0xf0] }
 0x375   : > { %4087 = vmatpush.bf16.msrb.mxu1 %v7756_v47  ;;  %v7688_v47 = vor.u32 %v9028_v4, %v7685_v46  ;;  %v9089_v4 = vld [vmem:[%s13235_s7 + $0x27c] sm:$0xf0] }
 0x376   : > { %4097 = vmatpush.bf16.msrb.mxu2 %v7680_v15  ;;  %4113 = vmatpush.bf16.msrb.mxu0 %v7760_v53  ;;  %v9056_v15 = vld [vmem:[%s13235_s7 + $0x16c] sm:$0xf] }
 0x377   : > { %v7800_v53 = vor.u32 %v9056_v15, %v7797_v27  ;;  %v7953_v15 = vld [vmem:[%s13235_s7 + $0x250] sm:$0xf]  ;;  %v9085_v27 = vld [vmem:[%s13235_s7 + $0x25c] sm:$0xf0] }
 0x378   : > { %4072 = vmatpush.bf16.msrb.mxu3 %v7660_v52  ;;  %v7651_v52 = vld [vmem:[%s13235_s7 + $0x48] sm:$0xf] }
 0x379   : > { %4088 = vmatpush.bf16.msrb.mxu1 %v7740_v10  ;;  %v9022_v10 = vld [vmem:[%s13235_s7 + $0x54] sm:$0xf0] }
 0x37a   : > { %4098 = vmatpush.bf16.msrb.mxu2 %v7664_v39  ;;  %4114 = vmatpush.bf16.msrb.mxu0 %v7744_v42  ;;  %v7652_v60 = vor.u32 %v9022_v10, %v7651_v52  ;;  %v7784_v39 = vor.u32 %v9052_v38, %v7781_v59  ;;  %v7635_v42 = vld [vmem:[%s13235_s7 + $0x28] sm:$0xf]  ;;  %v7937_v59 = vld [vmem:[%s13235_s7 + $0x230] sm:$0xf] }
 0x37c   : > { %4073 = vmatpush.bf16.msrb.mxu3 %v7644_v22  ;;  %v9018_v22 = vld [vmem:[%s13235_s7 + $0x34] sm:$0xf0] }
 0x37d   : > { %4120 = vmatpush.bf16.msra.mxu1 %v7732_v28  ;;  %v7780_v28 = vor.u32 %v9054_v17, %v7779_v18  ;;  %v7636_v2 = vor.u32 %v9018_v22, %v7635_v42  ;;  %v8033_v18 = vld [vmem:[%s13235_s7 + $0x2f0] sm:$0xf]  ;;  %v9083_v17 = vld [vmem:[%s13235_s7 + $0x254] sm:$0xf] }
 0x37e   : > { %4136 = vmatpush.bf16.msra.mxu0 %v4063_v54  ;;  %4099 = vmatpush.bf16.msrb.mxu2 %v7648_v13  ;;  %v7764_v54 = vor.u32 %v9050_v23, %v7763_v43  ;;  %v7765_v13 = vld [vmem:[%s13235_s7 + $0x138] sm:$0xf0]  ;;  %v7958_v42 = vor.u32 %v9083_v17, %v7955_v11  ;;  %v8017_v43 = vld [vmem:[%s13235_s7 + $0x2d0] sm:$0xf]  ;;  %v9079_v23 = vld [vmem:[%s13235_s7 + $0x234] sm:$0xf] }
 0x37f   : > { %v9065_v17 = vld [vmem:[%s13235_s7 + $0x1bc] sm:$0xf0] }
 0x380   : > { %4074 = vmatpush.bf16.msrb.mxu3 %v7628_v1  ;;  %v7768_v1 = vor.u32 %v9048_v48, %v7765_v13  ;;  %v7921_v13 = vld [vmem:[%s13235_s7 + $0x210] sm:$0xf] }
 0x381   : > { %4121 = vmatpush.bf16.msra.mxu1 %v7716_v40  ;;  %v7637_v40 = vld [vmem:[%s13235_s7 + $0x38] sm:$0xf0] }
 0x382   : > { %4100 = vmatpush.bf16.msrb.mxu2 %v7632_v8  ;;  %4137 = vmatpush.bf16.msra.mxu0 %v7796_v16  ;;  %v7640_v56 = vor.u32 %v9016_v3, %v7637_v40  ;;  %v7749_v8 = vld [vmem:[%s13235_s7 + $0x118] sm:$0xf0]  ;;  %v7939_v3 = vld [vmem:[%s13235_s7 + $0x240] sm:$0xf0]  ;;  %v9099_v40 = vld [vmem:[%s13235_s7 + $0x2d4] sm:$0xf] }
 0x383   : > { %v7942_v55 = vor.u32 %v9079_v23, %v7939_v3  ;;  %v7857_v3 = vld [vmem:[%s13235_s7 + $0x190] sm:$0xf] }
 0x384   : > { %4075 = vmatpush.bf16.msrb.mxu3 %v7612_v9  ;;  %v7752_v9 = vor.u32 %v9044_v63, %v7749_v8  ;;  %v7905_v8 = vld [vmem:[%s13235_s7 + $0x1f0] sm:$0xf] }
 0x385   : > { %4122 = vmatpush.bf16.msra.mxu1 %v7700_v62  ;;  %v9012_v62 = vld [vmem:[%s13235_s7 + $0xc] sm:$0xf] }
 0x386   : > { %4101 = vmatpush.bf16.msrb.mxu2 %v7616_v33  ;;  %4138 = vmatpush.bf16.msra.mxu0 %v7780_v28  ;;  %v7624_v7 = vor.u32 %v9012_v62, %v7621_v6  ;;  %v8035_v28 = vld [vmem:[%s13235_s7 + $0x300] sm:$0xf0]  ;;  %v9095_v6 = vld [vmem:[%s13235_s7 + $0x2b4] sm:$0xf] }
 0x387   : > { %v8038_v22 = vor.u32 %v9103_v36, %v8035_v28  ;;  %v7923_v62 = vld [vmem:[%s13235_s7 + $0x220] sm:$0xf0] }
 0x388   : > { %4146 = vmatpush.bf16.msra.mxu3 %v7736_v30  ;;  %v7853_v30 = vld [vmem:[%s13235_s7 + $0x310] sm:$0xff] }
 0x389   : > { %4123 = vmatpush.bf16.msra.mxu1 %v7684_v5  ;;  %v4390_v31 = vunpack.c.l.b16 %v7853_v30  ;;  %v4391_v32 = vunpack.c.h.b16 %v7853_v30 }
 0x38a   : > { %4162 = vmatpush.bf16.msra.mxu2 %v4066_v34  ;;  %4139 = vmatpush.bf16.msra.mxu0 %v7764_v54  ;;  %v8019_v54 = vld [vmem:[%s13235_s7 + $0x2e0] sm:$0xf0] }
 0x38b   : > { %v4442_v46 = vpack.c.b16 %v4390_v31, %v4390_v31  ;;  %v8022_v58 = vor.u32 %v9099_v40, %v8019_v54  ;;  %v9071_v31 = vld [vmem:[%s13235_s7 + $0x1f4] sm:$0xf]  ;;  %v9061_v40 = vld [vmem:[%s13235_s7 + $0x19c] sm:$0xf0] }
 0x38c   : > { %4147 = vmatpush.bf16.msra.mxu3 %v7720_v0 }
 0x38d   : > { %4124 = vmatpush.bf16.msra.mxu1 %v7668_v20  ;;  %v7971_v20 = vld [vmem:[%s13235_s7 + $0x280] sm:$0xf0]  ;;  %v4498_v16 = vsel %vm1196_vm5, %v4442_v46, 0 }
 0x38e   : > { %4163 = vmatpush.bf16.msra.mxu2 %v7800_v53  ;;  %4140 = vmatpush.bf16.msra.mxu0 %v7748_v14  ;;  %v7974_v10 = vor.u32 %v9087_v12, %v7971_v20  ;;  %v8003_v14 = vld [vmem:[%s13235_s7 + $0x2c0] sm:$0xf0]  ;;  %v9067_v12 = vld [vmem:[%s13235_s7 + $0x1d4] sm:$0xf] }
 0x38f   : > { %v8006_v30 = vor.u32 %v9095_v6, %v8003_v14 }
 0x390   : > { %4148 = vmatpush.bf16.msra.mxu3 %v7704_v45  ;;  %v7969_v45 = vld [vmem:[%s13235_s7 + $0x270] sm:$0xf] }
 0x391   : > { %4125 = vmatpush.bf16.msra.mxu1 %v7652_v60  ;;  %v7970_v21 = vor.u32 %v9089_v4, %v7969_v45  ;;  %v9105_v60 = vld [vmem:[%s13235_s7 + $0x2fc] sm:$0xf0] }
 0x392   : > { %4164 = vmatpush.bf16.msra.mxu2 %v7784_v39  ;;  %v8034_v38 = vor.u32 %v9105_v60, %v8033_v18  ;;  %v9081_v39 = vld [vmem:[%s13235_s7 + $0x23c] sm:$0xf0]  ;;  %v7873_v60 = vld [vmem:[%s13235_s7 + $0x1b0] sm:$0xf] }
 0x394   : > { %4149 = vmatpush.bf16.msra.mxu3 %v7688_v47  ;;  %v4443_v47 = vpack.c.b16 %v4391_v32, %v4391_v32  ;;  %v7907_v32 = vld [vmem:[%s13235_s7 + $0x200] sm:$0xf0] }
 0x395   : > { %4126 = vmatpush.bf16.msra.mxu1 %v7636_v2  ;;  %v9101_v2 = vld [vmem:[%s13235_s7 + $0x2dc] sm:$0xf0]  ;;  %v7910_v46 = vor.u32 %v9071_v31, %v7907_v32  ;;  %v9104_v32 = vld [vmem:[%s13235_s7 + $0x2fc] sm:$0xf] }
 0x396   : > { %4165 = vmatpush.bf16.msra.mxu2 %v7768_v1  ;;  %v8018_v48 = vor.u32 %v9101_v2, %v8017_v43  ;;  %v9077_v1 = vld [vmem:[%s13235_s7 + $0x21c] sm:$0xf0]  ;;  %v7874_v43 = vor.u32 %v9065_v17, %v7873_v60  ;;  %v9066_v60 = vld [vmem:[%s13235_s7 + $0x1c4] sm:$0xf0]  ;;  %v9064_v17 = vld [vmem:[%s13235_s7 + $0x1bc] sm:$0xf] }
 0x398   : > { %4150 = vmatpush.bf16.msra.mxu3 %v7672_v50  ;;  %v4501_v50 = vsel %vm1196_vm5, %v4443_v47, 0 }
 0x399   : > { %4127 = vmatpush.bf16.msra.mxu1 %v7620_v51  ;;  %v9097_v51 = vld [vmem:[%s13235_s7 + $0x2bc] sm:$0xf0] }
 0x39a   : > { %4166 = vmatpush.bf16.msra.mxu2 %v7752_v9  ;;  %v8002_v63 = vor.u32 %v9097_v51, %v8001_v41  ;;  %v9073_v9 = vld [vmem:[%s13235_s7 + $0x1fc] sm:$0xf0]  ;;  %v9076_v41 = vld [vmem:[%s13235_s7 + $0x21c] sm:$0xf]  ;;  %v7931_v51 = vld [vmem:[%s13235_s7 + $0x228] sm:$0xf0] }
 0x39b   : > { %v7906_v45 = vor.u32 %v9073_v9, %v7905_v8  ;;  %v7913_v8 = vld [vmem:[%s13235_s7 + $0x1f8] sm:$0xf] }
 0x39c   : > { %4151 = vmatpush.bf16.msra.mxu3 %v7656_v37  ;;  %v7954_v37 = vor.u32 %v9085_v27, %v7953_v15  ;;  %v7854_v15 = vld [vmem:[%s13235_s7 + $0x318] sm:$0xff]  ;;  %v9086_v27 = vld [vmem:[%s13235_s7 + $0x264] sm:$0xf0] }
 0x39d   : > { %v4392_v11 = vunpack.c.l.b16 %v7854_v15  ;;  %v4393_v2 = vunpack.c.h.b16 %v7854_v15  ;;  %v8041_v9 = vld [vmem:[%s13235_s7 + $0x2f8] sm:$0xf] }
 0x39f   : > { %v4444_v54 = vpack.c.b16 %v4392_v11, %v4392_v11  ;;  %v7883_v11 = vld [vmem:[%s13235_s7 + $0x1c8] sm:$0xf0] }
 0x3a0   : > { %4152 = vmatpush.bf16.msra.mxu3 %v7640_v56  ;;  %v7938_v56 = vor.u32 %v9081_v39, %v7937_v59  ;;  %v7945_v59 = vld [vmem:[%s13235_s7 + $0x238] sm:$0xf]  ;;  %v9082_v39 = vld [vmem:[%s13235_s7 + $0x244] sm:$0xf0] }
 0x3a1   : > { %v4504_v14 = vsel %vm1196_vm5, %v4444_v54, 0  ;;  %v7867_v54 = vld [vmem:[%s13235_s7 + $0x1a8] sm:$0xf0] }
 0x3a4   : > { %4153 = vmatpush.bf16.msra.mxu3 %v7624_v7  ;;  %v7922_v7 = vor.u32 %v9077_v1, %v7921_v13  ;;  %v9059_v13 = vld [vmem:[%s13235_s7 + $0x194] sm:$0xf]  ;;  %v7859_v1 = vld [vmem:[%s13235_s7 + $0x1a0] sm:$0xf0] }
 0x3a5   : > { %v7862_v6 = vor.u32 %v9059_v13, %v7859_v1  ;;  %v7995_v13 = vld [vmem:[%s13235_s7 + $0x2a8] sm:$0xf0]  ;;  %v8215_v1 = vld [vmem:[%s13235_s7 + $0x400] sm:$0xf] }
 0x3e5   : > { %v3709_v26 = vpop.f32.mrf.mxu1 }
 0x3e6   : > { %v3738_v29 = vpop.f32.mrf.mxu0 }
 0x3e7   : > { %v3743_v5 = vmax.f32 %v3709_v26, %v3738_v29  ;;  %v7985_v26 = vld [vmem:[%s13235_s7 + $0x290] sm:$0xf]  ;;  %v7926_v29 = vor.u32 %v9075_v61, %v7923_v62  ;;  %v7858_v61 = vor.u32 %v9061_v40, %v7857_v3  ;;  %v4445_v62 = vpack.c.b16 %v4393_v2, %v4393_v2  ;;  %v9094_v2 = vld [vmem:[%s13235_s7 + $0x2a4] sm:$0xf0]  ;;  %v9060_v40 = vld [vmem:[%s13235_s7 + $0x19c] sm:$0xf] }
 0x3e9   : > { %v4507_v31 = vsel %vm1196_vm5, %v4445_v62, 0  ;;  %v7870_v62 = vor.u32 %v9060_v40, %v7867_v54  ;;  %v9139_v40 = vld [vmem:[%s13235_s7 + $0x424] sm:$0xf]  ;;  %v8233_v54 = vld [vmem:[%s13235_s7 + $0x430] sm:$0xf0] }
 0x3ea   : > { %v3696_v57 = vpop.f32.mrf.mxu3  ;;  %v3725_v33 = vpop.f32.mrf.mxu2 }
 0x3eb   : > { %v3742_v0 = vmax.f32 %v3696_v57, %v3725_v33  ;;  %v9091_v57 = vld [vmem:[%s13235_s7 + $0x294] sm:$0xf]  ;;  %v7987_v33 = vld [vmem:[%s13235_s7 + $0x2a0] sm:$0xf0] }
 0x3ec   : > { %v7990_v47 = vor.u32 %v9091_v57, %v7987_v33  ;;  %v8043_v57 = vld [vmem:[%s13235_s7 + $0x308] sm:$0xf0] }
 0x3ed   : > { %v3744_v34 = vpack.c.bf16 %v3743_v5, %v3742_v0  ;;  %v3711_v35 = vpop.f32.mrf.mxu1  ;;  %v9093_v5 = vld [vmem:[%s13235_s7 + $0x29c] sm:$0xf0]  ;;  %v7977_v0 = vld [vmem:[%s13235_s7 + $0x278] sm:$0xf] }
 0x3ee   : > { %v3740_v44 = vpop.f32.mrf.mxu0  ;;  %v9088_v35 = vld [vmem:[%s13235_s7 + $0x27c] sm:$0xf]  ;;  %v7986_v4 = vor.u32 %v9093_v5, %v7985_v26  ;;  %v9106_v26 = vld [vmem:[%s13235_s7 + $0x304] sm:$0xf0]  ;;  %v7915_v5 = vld [vmem:[%s13235_s7 + $0x208] sm:$0xf0] }
 0x3ef   : > { %v3797_v49 = vunpack.c.l.b16 %v3744_v34  ;;  %v3798_v19 = vunpack.c.h.b16 %v3744_v34  ;;  %v9090_v34 = vld [vmem:[%s13235_s7 + $0x284] sm:$0xf0]  ;;  %v7979_v44 = vld [vmem:[%s13235_s7 + $0x288] sm:$0xf0] }
 0x3f0   : > { %v7978_v20 = vor.u32 %v9090_v34, %v7977_v0  ;;  %v8042_v34 = vor.u32 %v9106_v26, %v8041_v9  ;;  %v8199_v9 = vld [vmem:[%s13235_s7 + $0x3e0] sm:$0xf]  ;;  %v9133_v26 = vld [vmem:[%s13235_s7 + $0x3ec] sm:$0xf0] }
 0x3f1   : > { %v12126_v24 = vpack.c.b16 %v3797_v49, %v3797_v49  ;;  %v12128_v25 = vpack.c.b16 %v3798_v19, %v3798_v19  ;;  %v7889_v49 = vld [vmem:[%s13235_s7 + $0x1d0] sm:$0xf]  ;;  %v9069_v19 = vld [vmem:[%s13235_s7 + $0x1dc] sm:$0xf0] }
 0x3f2   : > { %v3698_v53 = vpop.f32.mrf.mxu3  ;;  %v3727_v52 = vpop.f32.mrf.mxu2 }
 0x3f3   : > { %4076 = vmatmul.bf16.vlgmr.msrb.gmra.mxu3 %v12126_v24  ;;  %7801 = vmatmul.msk.bf16.vlgmr.msrb.gmra.mxu1 %vm4052_vm13, %v12128_v25  ;;  %v9084_v53 = vld [vmem:[%s13235_s7 + $0x25c] sm:$0xf]  ;;  %v7963_v52 = vld [vmem:[%s13235_s7 + $0x268] sm:$0xf0]  ;;  %v12354_v33 = vshrl.u32 %v12126_v24, 16  ;;  %v12357_v0 = vshrl.u32 %v12128_v25, 16 }
 0x3f4   : > { %4102 = vmatmul.bf16.vlgmr.msrb.gmra.mxu2 %v12126_v24  ;;  %7802 = vmatmul.msk.bf16.vlgmr.msrb.gmra.mxu0 %vm4052_vm13, %v12128_v25  ;;  %v7966_v28 = vor.u32 %v9084_v53, %v7963_v52  ;;  %v7881_v53 = vld [vmem:[%s13235_s7 + $0x1b8] sm:$0xf] }
 0x3f5   : > { %4509 = vmatpush.bf16.msrb.mxu0 %v7970_v21  ;;  %4525 = vmatpush.bf16.msrb.mxu1 %v4498_v16  ;;  %v7982_v21 = vor.u32 %v9088_v35, %v7979_v44  ;;  %v7891_v16 = vld [vmem:[%s13235_s7 + $0x1e0] sm:$0xf0]  ;;  %v8009_v52 = vld [vmem:[%s13235_s7 + $0x2b8] sm:$0xf] }
 0x3f6   : > { %4535 = vmatpush.bf16.msrb.mxu2 %v7974_v10  ;;  %4551 = vmatpush.bf16.msrb.mxu3 %v4501_v50  ;;  %v7961_v50 = vld [vmem:[%s13235_s7 + $0x258] sm:$0xf]  ;;  %v7890_v10 = vor.u32 %v9069_v19, %v7889_v49  ;;  %v7894_v18 = vor.u32 %v9067_v12, %v7891_v16  ;;  %v9070_v49 = vld [vmem:[%s13235_s7 + $0x1e4] sm:$0xf0]  ;;  %v9068_v19 = vld [vmem:[%s13235_s7 + $0x1dc] sm:$0xf] }
 0x3f7   : > { %v7962_v36 = vor.u32 %v9086_v27, %v7961_v50  ;;  %v7899_v12 = vld [vmem:[%s13235_s7 + $0x1e8] sm:$0xf0]  ;;  %v8099_v16 = vld [vmem:[%s13235_s7 + $0x4a0] sm:$0xff] }
 0x3f8   : > { %v7902_v27 = vor.u32 %v9068_v19, %v7899_v12  ;;  %v9149_v19 = vld [vmem:[%s13235_s7 + $0x46c] sm:$0xf0]  ;;  %v9127_v12 = vld [vmem:[%s13235_s7 + $0x3c4] sm:$0xf] }
 0x3f9   : > { %4510 = vmatpush.bf16.msrb.mxu0 %v7954_v37  ;;  %4526 = vmatpush.bf16.msrb.mxu1 %v8034_v38  ;;  %v9063_v37 = vld [vmem:[%s13235_s7 + $0x1b4] sm:$0xf]  ;;  %v7875_v38 = vld [vmem:[%s13235_s7 + $0x1c0] sm:$0xf0] }
 0x3fa   : > { %4536 = vmatpush.bf16.msrb.mxu2 %v7958_v42  ;;  %4552 = vmatpush.bf16.msrb.mxu3 %v8038_v22  ;;  %v9080_v42 = vld [vmem:[%s13235_s7 + $0x23c] sm:$0xf]  ;;  %v7947_v22 = vld [vmem:[%s13235_s7 + $0x248] sm:$0xf0]  ;;  %v7878_v23 = vor.u32 %v9063_v37, %v7875_v38 }
 0x3fb   : > { %v8011_v37 = vld [vmem:[%s13235_s7 + $0x2c8] sm:$0xf0] }
 0x3fd   : > { %4511 = vmatpush.bf16.msrb.mxu0 %v7938_v56  ;;  %4527 = vmatpush.bf16.msrb.mxu1 %v8018_v48  ;;  %v7946_v56 = vor.u32 %v9082_v39, %v7945_v59  ;;  %v7950_v48 = vor.u32 %v9080_v42, %v7947_v22  ;;  %v7865_v59 = vld [vmem:[%s13235_s7 + $0x198] sm:$0xf]  ;;  %v7882_v39 = vor.u32 %v9066_v60, %v7881_v53  ;;  %v9062_v22 = vld [vmem:[%s13235_s7 + $0x1a4] sm:$0xf0]  ;;  %v8167_v53 = vld [vmem:[%s13235_s7 + $0x3a0] sm:$0xf] }
 0x3fe   : > { %4537 = vmatpush.bf16.msrb.mxu2 %v7942_v55  ;;  %4553 = vmatpush.bf16.msrb.mxu3 %v8022_v58  ;;  %v7929_v55 = vld [vmem:[%s13235_s7 + $0x218] sm:$0xf]  ;;  %v9078_v58 = vld [vmem:[%s13235_s7 + $0x224] sm:$0xf0]  ;;  %v7886_v42 = vor.u32 %v9064_v17, %v7883_v11  ;;  %v9145_v60 = vld [vmem:[%s13235_s7 + $0x44c] sm:$0xf0] }
 0x3ff   : > { %v9123_v17 = vld [vmem:[%s13235_s7 + $0x3a4] sm:$0xf]  ;;  %v8169_v11 = vld [vmem:[%s13235_s7 + $0x3b0] sm:$0xf0] }
 0x401   : > { %4512 = vmatpush.bf16.msrb.mxu0 %v7922_v7  ;;  %4528 = vmatpush.bf16.msrb.mxu1 %v8002_v63  ;;  %v7930_v7 = vor.u32 %v9078_v58, %v7929_v55  ;;  %v7934_v63 = vor.u32 %v9076_v41, %v7931_v51  ;;  %v9137_v55 = vld [vmem:[%s13235_s7 + $0x40c] sm:$0xf0]  ;;  %v9135_v41 = vld [vmem:[%s13235_s7 + $0x404] sm:$0xf]  ;;  %v8217_v51 = vld [vmem:[%s13235_s7 + $0x410] sm:$0xf0] }
 0x402   : > { %4538 = vmatpush.bf16.msrb.mxu2 %v7926_v29  ;;  %4554 = vmatpush.bf16.msrb.mxu3 %v8006_v30  ;;  %v9074_v29 = vld [vmem:[%s13235_s7 + $0x204] sm:$0xf0]  ;;  %v9072_v30 = vld [vmem:[%s13235_s7 + $0x1fc] sm:$0xf] }
 0x403   : > { %4128 = vmatmul.bf16.vlgmr.msra.gmra.mxu1 %v12126_v24  ;;  %4154 = vmatmul.bf16.vlgmr.msra.gmra.mxu3 %v12126_v24  ;;  %v7914_v35 = vor.u32 %v9074_v29, %v7913_v8  ;;  %v7918_v44 = vor.u32 %v9072_v30, %v7915_v5  ;;  %v8220_v8 = vor.u32 %v9135_v41, %v8217_v51  ;;  %v8279_v29 = vld [vmem:[%s13235_s7 + $0x480] sm:$0xf]  ;;  %v9153_v30 = vld [vmem:[%s13235_s7 + $0x48c] sm:$0xf0]  ;;  %v9131_v5 = vld [vmem:[%s13235_s7 + $0x3e4] sm:$0xf] }
 0x404   : > { %7803 = vmatmul.msk.bf16.vlgmr.msra.gmra.mxu0 %vm4052_vm13, %v12128_v25  ;;  %7804 = vmatmul.msk.bf16.vlgmr.msra.gmra.mxu2 %vm4052_vm13, %v12128_v25  ;;  %v8135_v51 = vld [vmem:[%s13235_s7 + $0x360] sm:$0xf] }
 0x405   : > { %4513 = vmatpush.bf16.msrb.mxu0 %v7906_v45  ;;  %4529 = vmatpush.bf16.msrb.mxu1 %v7986_v4  ;;  %v7897_v45 = vld [vmem:[%s13235_s7 + $0x1d8] sm:$0xf] }
 0x406   : > { %4539 = vmatpush.bf16.msrb.mxu2 %v7910_v46  ;;  %4555 = vmatpush.bf16.msrb.mxu3 %v7990_v47  ;;  %v8025_v4 = vld [vmem:[%s13235_s7 + $0x2d8] sm:$0xf]  ;;  %v9102_v46 = vld [vmem:[%s13235_s7 + $0x2e4] sm:$0xf0]  ;;  %v8046_v47 = vor.u32 %v9104_v32, %v8043_v57  ;;  %v7898_v15 = vor.u32 %v9070_v49, %v7897_v45  ;;  %v9151_v57 = vld [vmem:[%s13235_s7 + $0x484] sm:$0xf] }
 0x407   : > { %v8026_v50 = vor.u32 %v9102_v46, %v8025_v4  ;;  %v8183_v4 = vld [vmem:[%s13235_s7 + $0x3c0] sm:$0xf]  ;;  %v9129_v46 = vld [vmem:[%s13235_s7 + $0x3cc] sm:$0xf0] }
 0x409   : > { %4561 = vmatpush.bf16.msra.mxu1 %v7978_v20  ;;  %4514 = vmatpush.bf16.msrb.mxu0 %v7890_v10  ;;  %v9100_v20 = vld [vmem:[%s13235_s7 + $0x2dc] sm:$0xf]  ;;  %v9098_v10 = vld [vmem:[%s13235_s7 + $0x2c4] sm:$0xf0] }
 0x40a   : > { %4587 = vmatpush.bf16.msra.mxu3 %v7982_v21  ;;  %4540 = vmatpush.bf16.msrb.mxu2 %v7894_v18  ;;  %v8027_v21 = vld [vmem:[%s13235_s7 + $0x2e8] sm:$0xf0]  ;;  %v8010_v38 = vor.u32 %v9098_v10, %v8009_v52  ;;  %v9125_v52 = vld [vmem:[%s13235_s7 + $0x3ac] sm:$0xf0]  ;;  %v8247_v10 = vld [vmem:[%s13235_s7 + $0x440] sm:$0xf] }
 0x40b   : > { %v8030_v18 = vor.u32 %v9100_v20, %v8027_v21  ;;  %v8185_v20 = vld [vmem:[%s13235_s7 + $0x3d0] sm:$0xf0]  ;;  %v9147_v21 = vld [vmem:[%s13235_s7 + $0x464] sm:$0xf] }
 0x40d   : > { %4562 = vmatpush.bf16.msra.mxu1 %v7962_v36  ;;  %4515 = vmatpush.bf16.msrb.mxu0 %v7874_v43  ;;  %v4825_v36 = vunpack.c.l.b16 %v8099_v16  ;;  %v7993_v43 = vld [vmem:[%s13235_s7 + $0x298] sm:$0xf] }
 0x40e   : > { %4588 = vmatpush.bf16.msra.mxu3 %v7966_v28  ;;  %4541 = vmatpush.bf16.msrb.mxu2 %v7878_v23  ;;  %v9096_v28 = vld [vmem:[%s13235_s7 + $0x2bc] sm:$0xf]  ;;  %v4826_v23 = vunpack.c.h.b16 %v8099_v16  ;;  %v7994_v58 = vor.u32 %v9094_v2, %v7993_v43  ;;  %v8265_v16 = vld [vmem:[%s13235_s7 + $0x470] sm:$0xf0]  ;;  %v9141_v43 = vld [vmem:[%s13235_s7 + $0x42c] sm:$0xf0] }
 0x40f   : > { %v8014_v3 = vor.u32 %v9096_v28, %v8011_v37  ;;  %v8249_v28 = vld [vmem:[%s13235_s7 + $0x450] sm:$0xf0]  ;;  %v8168_v37 = vor.u32 %v9125_v52, %v8167_v53  ;;  %v9107_v52 = vld [vmem:[%s13235_s7 + $0x324] sm:$0xf] }
 0x411   : > { %4563 = vmatpush.bf16.msra.mxu1 %v7946_v56  ;;  %4516 = vmatpush.bf16.msrb.mxu0 %v7858_v61  ;;  %v9092_v56 = vld [vmem:[%s13235_s7 + $0x29c] sm:$0xf]  ;;  %v7866_v61 = vor.u32 %v9062_v22, %v7865_v59  ;;  %v8248_v59 = vor.u32 %v9145_v60, %v8247_v10  ;;  %v8231_v22 = vld [vmem:[%s13235_s7 + $0x420] sm:$0xf]  ;;  %v8105_v10 = vld [vmem:[%s13235_s7 + $0x330] sm:$0xf0] }
 0x412   : > { %4589 = vmatpush.bf16.msra.mxu3 %v7950_v48  ;;  %4542 = vmatpush.bf16.msrb.mxu2 %v7862_v6  ;;  %v4877_v48 = vpack.c.b16 %v4825_v36, %v4825_v36  ;;  %v4878_v6 = vpack.c.b16 %v4826_v23, %v4826_v23  ;;  %v9143_v36 = vld [vmem:[%s13235_s7 + $0x444] sm:$0xf]  ;;  %v8175_v60 = vld [vmem:[%s13235_s7 + $0x3a8] sm:$0xf] }
 0x413   : > { %8047 = vmatmul.msk.bf16.vlgmr.msrb.gmra.mxu1 %vm4052_vm13, %v12357_v0  ;;  %8048 = vmatmul.msk.bf16.vlgmr.msrb.gmra.mxu3 %vm4052_vm13, %v12357_v0  ;;  %v8252_v2 = vor.u32 %v9143_v36, %v8249_v28  ;;  %v9119_v23 = vld [vmem:[%s13235_s7 + $0x384] sm:$0xf]  ;;  %v9124_v36 = vld [vmem:[%s13235_s7 + $0x3ac] sm:$0xf]  ;;  %v8177_v28 = vld [vmem:[%s13235_s7 + $0x3b8] sm:$0xf0] }
 0x414   : > { %4517 = vmatmul.bf16.vlgmr.msrb.gmra.mxu0 %v12354_v33  ;;  %v4936_v32 = vsel %vm1196_vm5, %v4878_v6, 0 }
 0x415   : > { %4577 = vmatpush.bf16.msra.mxu0 %v4504_v14  ;;  %4564 = vmatpush.bf16.msra.mxu1 %v7930_v7  ;;  %v7998_v14 = vor.u32 %v9092_v56, %v7995_v13  ;;  %v8216_v7 = vor.u32 %v9137_v55, %v8215_v1  ;;  %v8223_v56 = vld [vmem:[%s13235_s7 + $0x408] sm:$0xf]  ;;  %v9136_v1 = vld [vmem:[%s13235_s7 + $0x40c] sm:$0xf]  ;;  %v8225_v55 = vld [vmem:[%s13235_s7 + $0x418] sm:$0xf0] }
 0x416   : > { %4590 = vmatpush.bf16.msra.mxu3 %v7934_v63  ;;  %4603 = vmatpush.bf16.msra.mxu2 %v4507_v31  ;;  %v4933_v63 = vsel %vm1196_vm5, %v4877_v48, 0  ;;  %v8201_v31 = vld [vmem:[%s13235_s7 + $0x3f0] sm:$0xf0]  ;;  %v9138_v48 = vld [vmem:[%s13235_s7 + $0x414] sm:$0xf0] }
 0x417   : > { %4543 = vmatmul.bf16.vlgmr.msrb.gmra.mxu2 %v12354_v33  ;;  %v8204_v45 = vor.u32 %v9131_v5, %v8201_v31  ;;  %v8224_v6 = vor.u32 %v9138_v48, %v8223_v56  ;;  %v8209_v5 = vld [vmem:[%s13235_s7 + $0x3f8] sm:$0xf0]  ;;  %v12677_v48 = vrot.slane %v12126_v24, 1 }
 0x418   : > { %v8161_v56 = vld [vmem:[%s13235_s7 + $0x398] sm:$0xf0] }
 0x419   : > { %4578 = vmatpush.bf16.msra.mxu0 %v8042_v34  ;;  %4565 = vmatpush.bf16.msra.mxu1 %v7914_v35  ;;  %v8281_v34 = vld [vmem:[%s13235_s7 + $0x490] sm:$0xf0]  ;;  %v8200_v35 = vor.u32 %v9133_v26, %v8199_v9  ;;  %v8207_v9 = vld [vmem:[%s13235_s7 + $0x3e8] sm:$0xf]  ;;  %v9134_v26 = vld [vmem:[%s13235_s7 + $0x3f4] sm:$0xf0] }
 0x41a   : > { %4591 = vmatpush.bf16.msra.mxu3 %v7918_v44  ;;  %4604 = vmatpush.bf16.msra.mxu2 %v8046_v47  ;;  %v8280_v44 = vor.u32 %v9153_v30, %v8279_v29  ;;  %v8263_v47 = vld [vmem:[%s13235_s7 + $0x460] sm:$0xf]  ;;  %v8284_v49 = vor.u32 %v9151_v57, %v8281_v34  ;;  %v9132_v30 = vld [vmem:[%s13235_s7 + $0x3ec] sm:$0xf]  ;;  %v9113_v57 = vld [vmem:[%s13235_s7 + $0x34c] sm:$0xf0] }
 0x41d   : > { %4579 = vmatpush.bf16.msra.mxu0 %v8026_v50  ;;  %4566 = vmatpush.bf16.msra.mxu1 %v7898_v15  ;;  %v8184_v50 = vor.u32 %v9129_v46, %v8183_v4  ;;  %v8264_v15 = vor.u32 %v9149_v19, %v8263_v47  ;;  %v9111_v4 = vld [vmem:[%s13235_s7 + $0x344] sm:$0xf]  ;;  %v8121_v46 = vld [vmem:[%s13235_s7 + $0x350] sm:$0xf0]  ;;  %v8212_v47 = vor.u32 %v9132_v30, %v8209_v5  ;;  %v8255_v30 = vld [vmem:[%s13235_s7 + $0x448] sm:$0xf] }
 0x41e   : > { %4592 = vmatpush.bf16.msra.mxu3 %v7902_v27  ;;  %4605 = vmatpush.bf16.msra.mxu2 %v8030_v18  ;;  %v8188_v27 = vor.u32 %v9127_v12, %v8185_v20  ;;  %v8268_v18 = vor.u32 %v9147_v21, %v8265_v16  ;;  %v9128_v12 = vld [vmem:[%s13235_s7 + $0x3cc] sm:$0xf]  ;;  %v8193_v20 = vld [vmem:[%s13235_s7 + $0x3d8] sm:$0xf0]  ;;  %v8124_v21 = vor.u32 %v9111_v4, %v8121_v46  ;;  %v8103_v16 = vld [vmem:[%s13235_s7 + $0x320] sm:$0xf] }
 0x41f   : > { %v9146_v5 = vld [vmem:[%s13235_s7 + $0x454] sm:$0xf0]  ;;  %v8129_v4 = vld [vmem:[%s13235_s7 + $0x358] sm:$0xf0] }
 0x420   : > { %v8256_v46 = vor.u32 %v9146_v5, %v8255_v30  ;;  %v8493_v30 = vld [vmem:[%s13235_s7 + $0x5d0] sm:$0xf]  ;;  %v9193_v5 = vld [vmem:[%s13235_s7 + $0x5dc] sm:$0xf0] }
 0x421   : > { %4580 = vmatpush.bf16.msra.mxu0 %v8010_v38  ;;  %4567 = vmatpush.bf16.msra.mxu1 %v7882_v39  ;;  %v8151_v38 = vld [vmem:[%s13235_s7 + $0x380] sm:$0xf]  ;;  %v8172_v39 = vor.u32 %v9123_v17, %v8169_v11  ;;  %v9126_v17 = vld [vmem:[%s13235_s7 + $0x3b4] sm:$0xf0] }
 0x422   : > { %4593 = vmatpush.bf16.msra.mxu3 %v7886_v42  ;;  %4606 = vmatpush.bf16.msra.mxu2 %v8014_v3  ;;  %v9121_v42 = vld [vmem:[%s13235_s7 + $0x38c] sm:$0xf0]  ;;  %v8153_v3 = vld [vmem:[%s13235_s7 + $0x390] sm:$0xf0] }
 0x423   : > { %v8152_v13 = vor.u32 %v9121_v42, %v8151_v38  ;;  %v8156_v41 = vor.u32 %v9119_v23, %v8153_v3  ;;  %v8159_v42 = vld [vmem:[%s13235_s7 + $0x388] sm:$0xf]  ;;  %v9122_v23 = vld [vmem:[%s13235_s7 + $0x394] sm:$0xf0]  ;;  %v9152_v3 = vld [vmem:[%s13235_s7 + $0x48c] sm:$0xf] }
 0x425   : > { %4581 = vmatpush.bf16.msra.mxu0 %v7994_v58  ;;  %4568 = vmatpush.bf16.msra.mxu1 %v7866_v61  ;;  %v8232_v58 = vor.u32 %v9141_v43, %v8231_v22  ;;  %v9117_v61 = vld [vmem:[%s13235_s7 + $0x36c] sm:$0xf0]  ;;  %v8287_v22 = vld [vmem:[%s13235_s7 + $0x488] sm:$0xf]  ;;  %v9154_v43 = vld [vmem:[%s13235_s7 + $0x494] sm:$0xf0] }
 0x426   : > { %4594 = vmatpush.bf16.msra.mxu3 %v7870_v62  ;;  %4607 = vmatpush.bf16.msra.mxu2 %v7998_v14  ;;  %v8236_v62 = vor.u32 %v9139_v40, %v8233_v54  ;;  %v9115_v14 = vld [vmem:[%s13235_s7 + $0x364] sm:$0xf]  ;;  %v8136_v29 = vor.u32 %v9117_v61, %v8135_v51  ;;  %v8289_v40 = vld [vmem:[%s13235_s7 + $0x498] sm:$0xf0]  ;;  %v9120_v54 = vld [vmem:[%s13235_s7 + $0x38c] sm:$0xf] }
 0x427   : > { %v9150_v51 = vld [vmem:[%s13235_s7 + $0x474] sm:$0xf0]  ;;  %v8164_v24 = vor.u32 %v9120_v54, %v8161_v56  ;;  %v9199_v56 = vld [vmem:[%s13235_s7 + $0x614] sm:$0xf] }
 0x428   : > { %4569 = vmatmul.bf16.vlgmr.msra.gmra.mxu1 %v12354_v33  ;;  %8049 = vmatmul.msk.bf16.vlgmr.msra.gmra.mxu0 %vm4052_vm13, %v12357_v0  ;;  %v9118_v61 = vld [vmem:[%s13235_s7 + $0x374] sm:$0xf0] }
 0x429   : > { %4944 = vmatpush.bf16.msrb.mxu0 %v8216_v7  ;;  %4960 = vmatpush.bf16.msrb.mxu1 %v4933_v63  ;;  %v8137_v7 = vld [vmem:[%s13235_s7 + $0x370] sm:$0xf0]  ;;  %v8100_v63 = vld [vmem:[%s13235_s7 + $0x4a8] sm:$0xff] }
 0x42a   : > { %4970 = vmatpush.bf16.msrb.mxu2 %v8220_v8  ;;  %4986 = vmatpush.bf16.msrb.mxu3 %v4936_v32  ;;  %v8228_v8 = vor.u32 %v9136_v1, %v8225_v55  ;;  %v8140_v31 = vor.u32 %v9115_v14, %v8137_v7  ;;  %v8119_v32 = vld [vmem:[%s13235_s7 + $0x340] sm:$0xf]  ;;  %v4827_v34 = vunpack.c.l.b16 %v8100_v63  ;;  %v8160_v1 = vor.u32 %v9122_v23, %v8159_v42  ;;  %v9116_v14 = vld [vmem:[%s13235_s7 + $0x36c] sm:$0xf]  ;;  %v8145_v7 = vld [vmem:[%s13235_s7 + $0x378] sm:$0xf0] }
 0x42b   : > { %4595 = vmatmul.bf16.vlgmr.msra.gmra.mxu3 %v12354_v33  ;;  %8050 = vmatmul.msk.bf16.vlgmr.msra.gmra.mxu2 %vm4052_vm13, %v12357_v0  ;;  %v8120_v19 = vor.u32 %v9113_v57, %v8119_v32  ;;  %v8292_v55 = vor.u32 %v9152_v3, %v8289_v40  ;;  %v9114_v32 = vld [vmem:[%s13235_s7 + $0x354] sm:$0xf0]  ;;  %v9144_v57 = vld [vmem:[%s13235_s7 + $0x44c] sm:$0xf]  ;;  %v9201_v23 = vld [vmem:[%s13235_s7 + $0x61c] sm:$0xf0] }
 0x42c   : > { %v9179_v3 = vld [vmem:[%s13235_s7 + $0x574] sm:$0xf]  ;;  %v8447_v40 = vld [vmem:[%s13235_s7 + $0x580] sm:$0xf0] }
 0x42d   : > { %4945 = vmatpush.bf16.msrb.mxu0 %v8200_v35  ;;  %4961 = vmatpush.bf16.msrb.mxu1 %v8280_v44  ;;  %v4828_v35 = vunpack.c.h.b16 %v8100_v63  ;;  %v12602_v44 = vrot.slane %v12128_v25, 1  ;;  %v9130_v25 = vld [vmem:[%s13235_s7 + $0x3d4] sm:$0xf0]  ;;  %v8345_v63 = vld [vmem:[%s13235_s7 + $0x630] sm:$0xff] }
 0x42e   : > { %4971 = vmatpush.bf16.msrb.mxu2 %v8204_v45  ;;  %4987 = vmatpush.bf16.msrb.mxu3 %v8284_v49  ;;  %v8208_v45 = vor.u32 %v9134_v26, %v8207_v9  ;;  %v8191_v49 = vld [vmem:[%s13235_s7 + $0x3c8] sm:$0xf] }
 0x42f   : > { %v8192_v53 = vor.u32 %v9130_v25, %v8191_v49 }
 0x431   : > { %4946 = vmatpush.bf16.msrb.mxu0 %v8184_v50  ;;  %4962 = vmatpush.bf16.msrb.mxu1 %v8264_v15  ;;  %v9109_v50 = vld [vmem:[%s13235_s7 + $0x32c] sm:$0xf0]  ;;  %v4879_v15 = vpack.c.b16 %v4827_v34, %v4827_v34  ;;  %v8257_v34 = vld [vmem:[%s13235_s7 + $0x458] sm:$0xf0] }
 0x432   : > { %4972 = vmatpush.bf16.msrb.mxu2 %v8188_v27  ;;  %4988 = vmatpush.bf16.msrb.mxu3 %v8268_v18  ;;  %v4880_v27 = vpack.c.b16 %v4828_v35, %v4828_v35  ;;  %v8196_v18 = vor.u32 %v9128_v12, %v8193_v20  ;;  %v8104_v11 = vor.u32 %v9109_v50, %v8103_v16  ;;  %v5260_v35 = vunpack.c.l.b16 %v8345_v63  ;;  %v8239_v12 = vld [vmem:[%s13235_s7 + $0x428] sm:$0xf]  ;;  %v9142_v20 = vld [vmem:[%s13235_s7 + $0x434] sm:$0xf0]  ;;  %v9108_v50 = vld [vmem:[%s13235_s7 + $0x32c] sm:$0xf] }
 0x433   : > { %v4939_v38 = vsel %vm1196_vm5, %v4879_v15, 0  ;;  %v8260_v25 = vor.u32 %v9144_v57, %v8257_v34  ;;  %v9140_v15 = vld [vmem:[%s13235_s7 + $0x42c] sm:$0xf]  ;;  %v9191_v57 = vld [vmem:[%s13235_s7 + $0x5d4] sm:$0xf] }
 0x434   : > { %v8495_v34 = vld [vmem:[%s13235_s7 + $0x5e0] sm:$0xf0] }
 0x435   : > { %4947 = vmatpush.bf16.msrb.mxu0 %v8168_v37  ;;  %4963 = vmatpush.bf16.msrb.mxu1 %v8248_v59  ;;  %v8108_v37 = vor.u32 %v9107_v52, %v8105_v10  ;;  %v4942_v59 = vsel %vm1196_vm5, %v4880_v27, 0  ;;  %v8241_v27 = vld [vmem:[%s13235_s7 + $0x438] sm:$0xf0]  ;;  %v8461_v10 = vld [vmem:[%s13235_s7 + $0x590] sm:$0xf] }
 0x436   : > { %4973 = vmatpush.bf16.msrb.mxu2 %v8172_v39  ;;  %4989 = vmatpush.bf16.msrb.mxu3 %v8252_v2  ;;  %v8176_v39 = vor.u32 %v9126_v17, %v8175_v60  ;;  %v8180_v2 = vor.u32 %v9124_v36, %v8177_v28  ;;  %v8113_v52 = vld [vmem:[%s13235_s7 + $0x338] sm:$0xf0]  ;;  %v8240_v60 = vor.u32 %v9142_v20, %v8239_v12  ;;  %v9183_v17 = vld [vmem:[%s13235_s7 + $0x594] sm:$0xf]  ;;  %v8399_v20 = vld [vmem:[%s13235_s7 + $0x520] sm:$0xf0] }
 0x437   : > { %v8244_v28 = vor.u32 %v9140_v15, %v8241_v27  ;;  %v9167_v12 = vld [vmem:[%s13235_s7 + $0x514] sm:$0xf]  ;;  %v9186_v15 = vld [vmem:[%s13235_s7 + $0x5a4] sm:$0xf0] }
 0x439   : > { %4948 = vmatpush.bf16.msrb.mxu0 %v8152_v13  ;;  %4964 = vmatpush.bf16.msrb.mxu1 %v8232_v58  ;;  %v8288_v13 = vor.u32 %v9154_v43, %v8287_v22  ;;  %v8143_v58 = vld [vmem:[%s13235_s7 + $0x368] sm:$0xf]  ;;  %v8445_v22 = vld [vmem:[%s13235_s7 + $0x570] sm:$0xf]  ;;  %v9181_v43 = vld [vmem:[%s13235_s7 + $0x57c] sm:$0xf0] }
 0x43a   : > { %4974 = vmatpush.bf16.msrb.mxu2 %v8156_v41  ;;  %4990 = vmatpush.bf16.msrb.mxu3 %v8236_v62  ;;  %v8271_v41 = vld [vmem:[%s13235_s7 + $0x468] sm:$0xf]  ;;  %v9148_v62 = vld [vmem:[%s13235_s7 + $0x46c] sm:$0xf]  ;;  %v8144_v9 = vor.u32 %v9118_v61, %v8143_v58  ;;  %v8450_v58 = vor.u32 %v9179_v3, %v8447_v40  ;;  %v8365_v3 = vld [vmem:[%s13235_s7 + $0x4d0] sm:$0xf] }
 0x43b   : > { %v9161_v40 = vld [vmem:[%s13235_s7 + $0x4dc] sm:$0xf0] }
 0x43c   : > { %8293 = vmatmul.msk.bf16.vlgmr.msrb.gmra.mxu1 %vm4052_vm13, %v12602_v44 }
 0x43d   : > { %4996 = vmatpush.bf16.msra.mxu1 %v8224_v6  ;;  %4949 = vmatpush.bf16.msrb.mxu0 %v8136_v29  ;;  %v8273_v6 = vld [vmem:[%s13235_s7 + $0x478] sm:$0xf0]  ;;  %v8127_v29 = vld [vmem:[%s13235_s7 + $0x348] sm:$0xf] }
 0x43e   : > { %5022 = vmatpush.bf16.msra.mxu3 %v8228_v8  ;;  %4975 = vmatpush.bf16.msrb.mxu2 %v8140_v31  ;;  %v8272_v8 = vor.u32 %v9150_v51, %v8271_v41  ;;  %v8276_v26 = vor.u32 %v9148_v62, %v8273_v6  ;;  %v8148_v31 = vor.u32 %v9116_v14, %v8145_v7  ;;  %v8429_v41 = vld [vmem:[%s13235_s7 + $0x550] sm:$0xf]  ;;  %v9177_v51 = vld [vmem:[%s13235_s7 + $0x55c] sm:$0xf0]  ;;  %v9175_v6 = vld [vmem:[%s13235_s7 + $0x554] sm:$0xf] }
 0x43f   : > { %8294 = vmatmul.msk.bf16.vlgmr.msrb.gmra.mxu3 %vm4052_vm13, %v12602_v44  ;;  %v8128_v49 = vor.u32 %v9114_v32, %v8127_v29  ;;  %v9197_v62 = vld [vmem:[%s13235_s7 + $0x5fc] sm:$0xf0]  ;;  %v8431_v14 = vld [vmem:[%s13235_s7 + $0x560] sm:$0xf0]  ;;  %v9195_v7 = vld [vmem:[%s13235_s7 + $0x5f4] sm:$0xf] }
 0x440   : > { %v9173_v29 = vld [vmem:[%s13235_s7 + $0x53c] sm:$0xf0]  ;;  %v8415_v32 = vld [vmem:[%s13235_s7 + $0x540] sm:$0xf0] }
 0x441   : > { %4997 = vmatpush.bf16.msra.mxu1 %v8208_v45  ;;  %4950 = vmatpush.bf16.msrb.mxu0 %v8120_v19  ;;  %v9112_v45 = vld [vmem:[%s13235_s7 + $0x34c] sm:$0xf]  ;;  %v9110_v19 = vld [vmem:[%s13235_s7 + $0x334] sm:$0xf0] }
 0x442   : > { %5023 = vmatpush.bf16.msra.mxu3 %v8212_v47  ;;  %4976 = vmatpush.bf16.msrb.mxu2 %v8124_v21  ;;  %v8111_v47 = vld [vmem:[%s13235_s7 + $0x328] sm:$0xf]  ;;  %v5261_v21 = vunpack.c.h.b16 %v8345_v63  ;;  %v8132_v16 = vor.u32 %v9112_v45, %v8129_v4  ;;  %v8511_v63 = vld [vmem:[%s13235_s7 + $0x600] sm:$0xf0]  ;;  %v8397_v45 = vld [vmem:[%s13235_s7 + $0x510] sm:$0xf]  ;;  %v8494_v4 = vor.u32 %v9193_v5, %v8493_v30 }
 0x443   : > { %v8112_v36 = vor.u32 %v9110_v19, %v8111_v47  ;;  %v9169_v47 = vld [vmem:[%s13235_s7 + $0x51c] sm:$0xf0]  ;;  %v8498_v19 = vor.u32 %v9191_v57, %v8495_v34  ;;  %v8421_v30 = vld [vmem:[%s13235_s7 + $0x538] sm:$0xf] }
 0x444   : > { %v8398_v27 = vor.u32 %v9169_v47, %v8397_v45  ;;  %v9202_v47 = vld [vmem:[%s13235_s7 + $0x624] sm:$0xf0] }
 0x445   : > { %4998 = vmatpush.bf16.msra.mxu1 %v8192_v53  ;;  %4951 = vmatpush.bf16.msrb.mxu0 %v8104_v11  ;;  %v5312_v53 = vpack.c.b16 %v5260_v35, %v5260_v35  ;;  %v8463_v11 = vld [vmem:[%s13235_s7 + $0x5a0] sm:$0xf0] }
 0x446   : > { %5024 = vmatpush.bf16.msra.mxu3 %v8196_v18  ;;  %4977 = vmatpush.bf16.msrb.mxu2 %v8108_v37  ;;  %v9185_v18 = vld [vmem:[%s13235_s7 + $0x59c] sm:$0xf0]  ;;  %v5313_v37 = vpack.c.b16 %v5261_v21, %v5261_v21  ;;  %v8466_v42 = vor.u32 %v9183_v17, %v8463_v11  ;;  %v9187_v21 = vld [vmem:[%s13235_s7 + $0x5b4] sm:$0xf] }
 0x447   : > { %v9165_v17 = vld [vmem:[%s13235_s7 + $0x4fc] sm:$0xf0] }
 0x448   : > { %4952 = vmatmul.bf16.vlgmr.msrb.gmra.mxu0 %v12677_v48  ;;  %v5371_v54 = vsel %vm1196_vm5, %v5313_v37, 0  ;;  %v8383_v37 = vld [vmem:[%s13235_s7 + $0x500] sm:$0xf0] }
 0x449   : > { %5012 = vmatpush.bf16.msra.mxu0 %v4939_v38  ;;  %4999 = vmatpush.bf16.msra.mxu1 %v8176_v39  ;;  %v8116_v38 = vor.u32 %v9108_v50, %v8113_v52  ;;  %v5368_v39 = vsel %vm1196_vm5, %v5312_v53, 0  ;;  %v8469_v50 = vld [vmem:[%s13235_s7 + $0x598] sm:$0xf]  ;;  %v9184_v53 = vld [vmem:[%s13235_s7 + $0x59c] sm:$0xf] }
 0x44a   : > { %5038 = vmatpush.bf16.msra.mxu2 %v4942_v59  ;;  %5025 = vmatpush.bf16.msra.mxu3 %v8180_v2  ;;  %v8462_v59 = vor.u32 %v9185_v18, %v8461_v10  ;;  %v8525_v2 = vld [vmem:[%s13235_s7 + $0x610] sm:$0xf]  ;;  %v8471_v52 = vld [vmem:[%s13235_s7 + $0x5a8] sm:$0xf0]  ;;  %v8402_v18 = vor.u32 %v9167_v12, %v8399_v20  ;;  %v9168_v20 = vld [vmem:[%s13235_s7 + $0x51c] sm:$0xf] }
 0x44b   : > { %4978 = vmatmul.bf16.vlgmr.msrb.gmra.mxu2 %v12677_v48  ;;  %v8535_v12 = vld [vmem:[%s13235_s7 + $0x628] sm:$0xf0] }
 0x44d   : > { %5013 = vmatpush.bf16.msra.mxu0 %v8288_v13  ;;  %5000 = vmatpush.bf16.msra.mxu1 %v8160_v1  ;;  %v8527_v13 = vld [vmem:[%s13235_s7 + $0x620] sm:$0xf0]  ;;  %v8446_v1 = vor.u32 %v9181_v43, %v8445_v22  ;;  %v9180_v43 = vld [vmem:[%s13235_s7 + $0x57c] sm:$0xf] }
 0x44e   : > { %5039 = vmatpush.bf16.msra.mxu2 %v8292_v55  ;;  %5026 = vmatpush.bf16.msra.mxu3 %v8164_v24  ;;  %v8526_v55 = vor.u32 %v9201_v23, %v8525_v2  ;;  %v8509_v24 = vld [vmem:[%s13235_s7 + $0x5f0] sm:$0xf]  ;;  %v8530_v61 = vor.u32 %v9199_v56, %v8527_v13  ;;  %v8455_v2 = vld [vmem:[%s13235_s7 + $0x588] sm:$0xf0]  ;;  %v12918_v13 = vrot.slane %v12357_v0, 1 }
 0x44f   : > { %v9178_v0 = vld [vmem:[%s13235_s7 + $0x564] sm:$0xf0] }
 0x451   : > { %5014 = vmatpush.bf16.msra.mxu0 %v8272_v8  ;;  %5001 = vmatpush.bf16.msra.mxu1 %v8144_v9  ;;  %v8430_v8 = vor.u32 %v9177_v51, %v8429_v41  ;;  %v8510_v9 = vor.u32 %v9197_v62, %v8509_v24  ;;  %v8458_v41 = vor.u32 %v9180_v43, %v8455_v2  ;;  %v8437_v51 = vld [vmem:[%s13235_s7 + $0x558] sm:$0xf]  ;;  %v8439_v62 = vld [vmem:[%s13235_s7 + $0x568] sm:$0xf0]  ;;  %v9194_v43 = vld [vmem:[%s13235_s7 + $0x5e4] sm:$0xf0] }
 0x452   : > { %5040 = vmatpush.bf16.msra.mxu2 %v8276_v26  ;;  %5027 = vmatpush.bf16.msra.mxu3 %v8148_v31  ;;  %v8434_v26 = vor.u32 %v9175_v6, %v8431_v14  ;;  %v9171_v31 = vld [vmem:[%s13235_s7 + $0x534] sm:$0xf]  ;;  %v8366_v24 = vor.u32 %v9161_v40, %v8365_v3  ;;  %v8349_v14 = vld [vmem:[%s13235_s7 + $0x4b0] sm:$0xf]  ;;  %v9162_v3 = vld [vmem:[%s13235_s7 + $0x4e4] sm:$0xf0] }
 0x453   : > { %v9192_v40 = vld [vmem:[%s13235_s7 + $0x5dc] sm:$0xf] }
 0x455   : > { %5015 = vmatpush.bf16.msra.mxu0 %v8256_v46  ;;  %5002 = vmatpush.bf16.msra.mxu1 %v8128_v49  ;;  %v8418_v46 = vor.u32 %v9171_v31, %v8415_v32  ;;  %v8477_v49 = vld [vmem:[%s13235_s7 + $0x5b0] sm:$0xf]  ;;  %v9172_v31 = vld [vmem:[%s13235_s7 + $0x53c] sm:$0xf]  ;;  %v8423_v32 = vld [vmem:[%s13235_s7 + $0x548] sm:$0xf0] }
 0x456   : > { %5041 = vmatpush.bf16.msra.mxu2 %v8260_v25  ;;  %5028 = vmatpush.bf16.msra.mxu3 %v8132_v16  ;;  %v9189_v25 = vld [vmem:[%s13235_s7 + $0x5bc] sm:$0xf0]  ;;  %v8479_v16 = vld [vmem:[%s13235_s7 + $0x5c0] sm:$0xf0] }
 0x457   : > { %v8478_v10 = vor.u32 %v9189_v25, %v8477_v49  ;;  %v8482_v11 = vor.u32 %v9187_v21, %v8479_v16  ;;  %v8426_v49 = vor.u32 %v9172_v31, %v8423_v32  ;;  %v9170_v25 = vld [vmem:[%s13235_s7 + $0x524] sm:$0xf0]  ;;  %v8407_v21 = vld [vmem:[%s13235_s7 + $0x528] sm:$0xf0]  ;;  %v12993_v16 = vrot.slane %v12354_v33, 1 }
 0x458   : > { %v9198_v33 = vld [vmem:[%s13235_s7 + $0x604] sm:$0xf0] }
 0x459   : > { %5016 = vmatpush.bf16.msra.mxu0 %v8240_v60  ;;  %5003 = vmatpush.bf16.msra.mxu1 %v8112_v36  ;;  %v8381_v60 = vld [vmem:[%s13235_s7 + $0x4f0] sm:$0xf]  ;;  %v8470_v36 = vor.u32 %v9186_v15, %v8469_v50 }
 0x45a   : > { %5042 = vmatpush.bf16.msra.mxu2 %v8244_v28  ;;  %5029 = vmatpush.bf16.msra.mxu3 %v8116_v38  ;;  %v9163_v28 = vld [vmem:[%s13235_s7 + $0x4f4] sm:$0xf]  ;;  %v8346_v38 = vld [vmem:[%s13235_s7 + $0x638] sm:$0xff]  ;;  %v8382_v22 = vor.u32 %v9165_v17, %v8381_v60  ;;  %v8410_v60 = vor.u32 %v9168_v20, %v8407_v21  ;;  %v9166_v17 = vld [vmem:[%s13235_s7 + $0x504] sm:$0xf0] }
 0x45b   : > { %v8386_v23 = vor.u32 %v9163_v28, %v8383_v37  ;;  %v5263_v56 = vunpack.c.h.b16 %v8346_v38  ;;  %v9164_v28 = vld [vmem:[%s13235_s7 + $0x4fc] sm:$0xf]  ;;  %v8391_v37 = vld [vmem:[%s13235_s7 + $0x508] sm:$0xf0] }
 0x45c   : > { %5004 = vmatmul.bf16.vlgmr.msra.gmra.mxu1 %v12677_v48  ;;  %8295 = vmatmul.msk.bf16.vlgmr.msra.gmra.mxu0 %vm4052_vm13, %v12602_v44  ;;  %v8394_v2 = vor.u32 %v9164_v28, %v8391_v37 }
 0x45d   : > { %5379 = vmatpush.bf16.msrb.mxu0 %v8462_v59  ;;  %5395 = vmatpush.bf16.msrb.mxu1 %v5368_v39  ;;  %v8474_v59 = vor.u32 %v9184_v53, %v8471_v52  ;;  %v8453_v39 = vld [vmem:[%s13235_s7 + $0x578] sm:$0xf] }
 0x45e   : > { %5405 = vmatpush.bf16.msrb.mxu2 %v8466_v42  ;;  %5421 = vmatpush.bf16.msrb.mxu3 %v5371_v54  ;;  %v9182_v42 = vld [vmem:[%s13235_s7 + $0x584] sm:$0xf0]  ;;  %v5262_v54 = vunpack.c.l.b16 %v8346_v38 }
 0x45f   : > { %5030 = vmatmul.bf16.vlgmr.msra.gmra.mxu3 %v12677_v48  ;;  %8296 = vmatmul.msk.bf16.vlgmr.msra.gmra.mxu2 %vm4052_vm13, %v12602_v44  ;;  %v8413_v48 = vld [vmem:[%s13235_s7 + $0x530] sm:$0xf]  ;;  %v8514_v44 = vor.u32 %v9195_v7, %v8511_v63  ;;  %v9157_v7 = vld [vmem:[%s13235_s7 + $0x4bc] sm:$0xf0] }
 0x460   : > { %v8414_v35 = vor.u32 %v9173_v29, %v8413_v48  ;;  %v5314_v63 = vpack.c.b16 %v5262_v54, %v5262_v54  ;;  %v8351_v48 = vld [vmem:[%s13235_s7 + $0x4c0] sm:$0xf0]  ;;  %v8350_v5 = vor.u32 %v9157_v7, %v8349_v14  ;;  %v8503_v54 = vld [vmem:[%s13235_s7 + $0x5e8] sm:$0xf0]  ;;  %v9158_v14 = vld [vmem:[%s13235_s7 + $0x4c4] sm:$0xf0] }
 0x461   : > { %5380 = vmatpush.bf16.msrb.mxu0 %v8446_v1  ;;  %5396 = vmatpush.bf16.msrb.mxu1 %v8526_v55  ;;  %v8454_v1 = vor.u32 %v9182_v42, %v8453_v39  ;;  %v9159_v55 = vld [vmem:[%s13235_s7 + $0x4d4] sm:$0xf]  ;;  %v8373_v42 = vld [vmem:[%s13235_s7 + $0x4d8] sm:$0xf] }
 0x462   : > { %5406 = vmatpush.bf16.msrb.mxu2 %v8450_v58  ;;  %5422 = vmatpush.bf16.msrb.mxu3 %v8530_v61  ;;  %v8367_v58 = vld [vmem:[%s13235_s7 + $0x4e0] sm:$0xf0]  ;;  %v9176_v61 = vld [vmem:[%s13235_s7 + $0x55c] sm:$0xf]  ;;  %v5374_v34 = vsel %vm1196_vm5, %v5314_v63, 0 }
 0x463   : > { %v8370_v6 = vor.u32 %v9159_v55, %v8367_v58  ;;  %v8442_v29 = vor.u32 %v9176_v61, %v8439_v62  ;;  %v9160_v55 = vld [vmem:[%s13235_s7 + $0x4dc] sm:$0xf]  ;;  %v8375_v58 = vld [vmem:[%s13235_s7 + $0x4e8] sm:$0xf0]  ;;  %v8374_v62 = vor.u32 %v9162_v3, %v8373_v42  ;;  %v8485_v7 = vld [vmem:[%s13235_s7 + $0x5b8] sm:$0xf] }
 0x464   : > { %v9190_v63 = vld [vmem:[%s13235_s7 + $0x5c4] sm:$0xf0]  ;;  %v3745_v3 = vld [vmem:[%s13236_s8] sm:$0xf] }
 0x465   : > { %5381 = vmatpush.bf16.msrb.mxu0 %v8430_v8  ;;  %5397 = vmatpush.bf16.msrb.mxu1 %v8510_v9  ;;  %v5315_v8 = vpack.c.b16 %v5263_v56, %v5263_v56  ;;  %v8438_v9 = vor.u32 %v9178_v0, %v8437_v51 }
 0x466   : > { %5407 = vmatpush.bf16.msrb.mxu2 %v8434_v26  ;;  %5423 = vmatpush.bf16.msrb.mxu3 %v8514_v44  ;;  %v9155_v26 = vld [vmem:[%s13235_s7 + $0x4b4] sm:$0xf]  ;;  %v9174_v44 = vld [vmem:[%s13235_s7 + $0x544] sm:$0xf0] }
 0x467   : > { %v8354_v57 = vor.u32 %v9155_v26, %v8351_v48  ;;  %v8422_v45 = vor.u32 %v9174_v44, %v8421_v30  ;;  %v9188_v26 = vld [vmem:[%s13235_s7 + $0x5bc] sm:$0xf]  ;;  %v8487_v48 = vld [vmem:[%s13235_s7 + $0x5c8] sm:$0xf0] }
 0x468   : > { %v8359_v30 = vld [vmem:[%s13235_s7 + $0x4c8] sm:$0xf0]  ;;  %v8490_v32 = vor.u32 %v9188_v26, %v8487_v48 }
 0x469   : > { %5382 = vmatpush.bf16.msrb.mxu0 %v8414_v35  ;;  %5398 = vmatpush.bf16.msrb.mxu1 %v8494_v4  ;;  %v5377_v35 = vsel %vm1196_vm5, %v5315_v8, 0  ;;  %v8405_v4 = vld [vmem:[%s13235_s7 + $0x518] sm:$0xf] }
 0x46a   : > { %5408 = vmatpush.bf16.msrb.mxu2 %v8418_v46  ;;  %5424 = vmatpush.bf16.msrb.mxu3 %v8498_v19  ;;  %v8533_v46 = vld [vmem:[%s13235_s7 + $0x618] sm:$0xf]  ;;  %v9200_v19 = vld [vmem:[%s13235_s7 + $0x61c] sm:$0xf]  ;;  %v8406_v53 = vor.u32 %v9170_v25, %v8405_v4 }
 0x46b   : > { %v8534_v15 = vor.u32 %v9202_v47, %v8533_v46  ;;  %v8538_v52 = vor.u32 %v9200_v19, %v8535_v12 }
 0x46d   : > { %5383 = vmatpush.bf16.msrb.mxu0 %v8398_v27  ;;  %5399 = vmatpush.bf16.msrb.mxu1 %v8478_v10  ;;  %v8389_v10 = vld [vmem:[%s13235_s7 + $0x4f8] sm:$0xf] }
 0x46e   : > { %5409 = vmatpush.bf16.msrb.mxu2 %v8402_v18  ;;  %5425 = vmatpush.bf16.msrb.mxu3 %v8482_v11  ;;  %v8517_v18 = vld [vmem:[%s13235_s7 + $0x5f8] sm:$0xf]  ;;  %v9196_v11 = vld [vmem:[%s13235_s7 + $0x5fc] sm:$0xf] }
 0x46f   : > { %v8518_v38 = vor.u32 %v9198_v33, %v8517_v18 }
 0x470   : > { %8539 = vmatmul.msk.bf16.vlgmr.msrb.gmra.mxu1 %vm4052_vm13, %v12918_v13  ;;  %v4090_v50 = vpop.f32.mrf.mxu1 }
 0x471   : > { %5431 = vmatpush.bf16.msra.mxu1 %v8470_v36  ;;  %5384 = vmatpush.bf16.msrb.mxu0 %v8382_v22  ;;  %v4116_v27 = vpop.f32.mrf.mxu0  ;;  %v8519_v36 = vld [vmem:[%s13235_s7 + $0x608] sm:$0xf0]  ;;  %v8501_v22 = vld [vmem:[%s13235_s7 + $0x5d8] sm:$0xf] }
 0x472   : > { %5457 = vmatpush.bf16.msra.mxu3 %v8474_v59  ;;  %5410 = vmatpush.bf16.msrb.mxu2 %v8386_v23  ;;  %v8390_v59 = vor.u32 %v9166_v17, %v8389_v10  ;;  %v8522_v39 = vor.u32 %v9196_v11, %v8519_v36  ;;  %v8502_v0 = vor.u32 %v9194_v43, %v8501_v22 }
 0x473   : > { %8540 = vmatmul.msk.bf16.vlgmr.msrb.gmra.mxu3 %vm4052_vm13, %v12918_v13 }
 0x475   : > { %5432 = vmatpush.bf16.msra.mxu1 %v8454_v1  ;;  %5385 = vmatpush.bf16.msrb.mxu0 %v8366_v24  ;;  %v8357_v24 = vld [vmem:[%s13235_s7 + $0x4b8] sm:$0xf] }
 0x476   : > { %5458 = vmatpush.bf16.msra.mxu3 %v8458_v41  ;;  %5411 = vmatpush.bf16.msrb.mxu2 %v8370_v6  ;;  %v4077_v23 = vpop.f32.mrf.mxu3  ;;  %v8506_v6 = vor.u32 %v9192_v40, %v8503_v54  ;;  %v8358_v31 = vor.u32 %v9158_v14, %v8357_v24 }
 0x477   : > { %v4091_v56 = vadd.f32 %v4090_v50, %v4077_v23  ;;  %v4103_v1 = vpop.f32.mrf.mxu2 }
 0x478   : > { %v4117_v41 = vadd.f32 %v4116_v27, %v4103_v1  ;;  %v4092_v51 = vpop.f32.mrf.mxu1 }
 0x479   : > { %5433 = vmatpush.bf16.msra.mxu1 %v8438_v9  ;;  %5386 = vmatpush.bf16.msrb.mxu0 %v8350_v5  ;;  %v4118_v61 = vpop.f32.mrf.mxu0  ;;  %v8378_v9 = vor.u32 %v9160_v55, %v8375_v58  ;;  %v8486_v5 = vor.u32 %v9190_v63, %v8485_v7 }
 0x47a   : > { %5459 = vmatpush.bf16.msra.mxu3 %v8442_v29  ;;  %5412 = vmatpush.bf16.msrb.mxu2 %v8354_v57  ;;  %v4176_v8 = vrot.slane %v4117_v41, 7  ;;  %v9156_v29 = vld [vmem:[%s13235_s7 + $0x4bc] sm:$0xf] }
 0x47b   : > { %v8362_v57 = vor.u32 %v9156_v29, %v8359_v30  ;;  %v5571_v30 = vld [vmem:[%s13237_s9 + $0xf8] sm:$0x3] }
 0x47c   : > { %5387 = vmatmul.bf16.vlgmr.msrb.gmra.mxu0 %v12993_v16  ;;  %v4180_v44 = vsel %vm4179_vm14, %v4091_v56, %v4176_v8 }
 0x47d   : > { %5447 = vmatpush.bf16.msra.mxu0 %v5374_v34  ;;  %5434 = vmatpush.bf16.msra.mxu1 %v8422_v45 }
 0x47e   : > { %5473 = vmatpush.bf16.msra.mxu2 %v5377_v35  ;;  %5460 = vmatpush.bf16.msra.mxu3 %v8426_v49  ;;  %v4079_v34 = vpop.f32.mrf.mxu3 }
 0x47f   : > { %5413 = vmatmul.bf16.vlgmr.msrb.gmra.mxu2 %v12993_v16  ;;  %v4105_v35 = vpop.f32.mrf.mxu2  ;;  %v9226_v34 = vld [vmem:[%s13237_s9 + $0xb8] sm:$0xff] }
 0x480   : > { %v4129_v45 = vpop.f32.mrf.mxu1 }
 0x481   : > { %5448 = vmatpush.bf16.msra.mxu0 %v8534_v15  ;;  %5435 = vmatpush.bf16.msra.mxu1 %v8406_v53  ;;  %v4142_v4 = vpop.f32.mrf.mxu0 }
 0x482   : > { %5474 = vmatpush.bf16.msra.mxu2 %v8538_v52  ;;  %5461 = vmatpush.bf16.msra.mxu3 %v8410_v60  ;;  %v4143_v46 = vadd.f32 %v4142_v4, %v4129_v45 }
 0x484   : > { %v4177_v20 = vrot.slane %v4143_v46, 6 }
 0x485   : > { %5449 = vmatpush.bf16.msra.mxu0 %v8518_v38  ;;  %5436 = vmatpush.bf16.msra.mxu1 %v8390_v59 }
 0x486   : > { %5475 = vmatpush.bf16.msra.mxu2 %v8522_v39  ;;  %5462 = vmatpush.bf16.msra.mxu3 %v8394_v2  ;;  %v4155_v47 = vpop.f32.mrf.mxu3 }
 0x487   : > { %v4168_v49 = vpop.f32.mrf.mxu2 }
 0x488   : > { %v4169_v25 = vadd.f32 %v4168_v49, %v4155_v47  ;;  %v4131_v19 = vpop.f32.mrf.mxu1  ;;  %v9209_v49 = vld [vmem:[%s13237_s9 + $0x30] sm:$0xff] }
 0x489   : > { %5450 = vmatpush.bf16.msra.mxu0 %v8502_v0  ;;  %5437 = vmatpush.bf16.msra.mxu1 %v8374_v62  ;;  %v4144_v12 = vpop.f32.mrf.mxu0  ;;  %v9225_v19 = vld [vmem:[%s13237_s9 + $0xb0] sm:$0xff] }
 0x48a   : > { %5476 = vmatpush.bf16.msra.mxu2 %v8506_v6  ;;  %5463 = vmatpush.bf16.msra.mxu3 %v8378_v9  ;;  %v4178_v21 = vrot.slane %v4169_v25, 5  ;;  %v9217_v25 = vld [vmem:[%s13237_s9 + $0x70] sm:$0xff] }
 0x48c   : > { %v4182_v50 = vsel %vm4181_vm15, %v4177_v20, %v4178_v21  ;;  %v9233_v21 = vld [vmem:[%s13237_s9 + $0xf0] sm:$0xff] }
 0x48d   : > { %5451 = vmatpush.bf16.msra.mxu0 %v8486_v5  ;;  %5438 = vmatpush.bf16.msra.mxu1 %v8358_v31  ;;  %v4184_v15 = vsel %vm4183_vm0, %v4180_v44, %v4182_v50  ;;  %v5698_v5 = vunpack.c.l.b16 %v5571_v30 }
 0x48e   : > { %5477 = vmatpush.bf16.msra.mxu2 %v8490_v32  ;;  %5464 = vmatpush.bf16.msra.mxu3 %v8362_v57  ;;  %v4157_v27 = vpop.f32.mrf.mxu3  ;;  %v4186_v56 = vadd.f32 %v4184_v15, %v3745_v3  ;;  %v9210_v32 = vld [vmem:[%s13237_s9 + $0x38] sm:$0xff]  ;;  %v9229_v3 = vld [vmem:[%s13237_s9 + $0xd0] sm:$0xff] }
 0x48f   : > { %v4170_v53 = vpop.f32.mrf.mxu2  ;;  %v5730_v31 = vpack.c.b16 %v5698_v5, %v5698_v5  ;;  %v9218_v57 = vld [vmem:[%s13237_s9 + $0x78] sm:$0xff]  ;;  %v9208_v27 = vld [vmem:[%s13237_s9 + $0x28] sm:$0xff] }
 0x490   : > { %8541 = vmatmul.msk.bf16.vlgmr.msra.gmra.mxu0 %vm4052_vm13, %v12918_v13  ;;  %5439 = vmatmul.bf16.vlgmr.msra.gmra.mxu1 %v12993_v16  ;;  %v4531_v10 = vpop.f32.mrf.mxu1  ;;  %v9216_v53 = vld [vmem:[%s13237_s9 + $0x68] sm:$0xff] }
 0x491   : > { %8542 = vmatmul.msk.bf16.vlgmr.msra.gmra.mxu2 %vm4052_vm13, %v12918_v13  ;;  %5465 = vmatmul.bf16.vlgmr.msra.gmra.mxu3 %v12993_v16  ;;  %v4518_v52 = vpop.f32.mrf.mxu0  ;;  %v5767_v35 = vsel %vm4183_vm0, %v5730_v31, 0 }
 0x492   : > { %v4532_v13 = vadd.f32 %v4531_v10, %v4518_v52  ;;  %5769 = vmatpush.bf16.msrb.mxu0 %v9210_v32  ;;  %5782 = vmatpush.bf16.msrb.mxu1 %v9218_v57  ;;  %v9224_v52 = vld [vmem:[%s13237_s9 + $0xa8] sm:$0xff] }
 0x493   : > { %5795 = vmatpush.bf16.msrb.mxu2 %v9226_v34  ;;  %5808 = vmatpush.bf16.msrb.mxu3 %v5767_v35 }
 0x496   : > { %v4557_v16 = vpop.f32.mrf.mxu3  ;;  %5770 = vmatpush.bf16.msrb.mxu0 %v9209_v49  ;;  %5783 = vmatpush.bf16.msrb.mxu1 %v9217_v25 }
 0x497   : > { %5796 = vmatpush.bf16.msrb.mxu2 %v9225_v19  ;;  %5809 = vmatpush.bf16.msrb.mxu3 %v9233_v21 }
 0x498   : > { %v4533_v17 = vpop.f32.mrf.mxu1 }
 0x499   : > { %v4520_v33 = vpop.f32.mrf.mxu0  ;;  %v9207_v17 = vld [vmem:[%s13237_s9 + $0x20] sm:$0xff] }
 0x49a   : > { %v4544_v18 = vpop.f32.mrf.mxu2  ;;  %5771 = vmatpush.bf16.msrb.mxu0 %v9208_v27  ;;  %5784 = vmatpush.bf16.msrb.mxu1 %v9216_v53  ;;  %v5572_v53 = vld [vmem:[%s13238_s10] sm:$0x1] }
 0x49b   : > { %v4558_v60 = vadd.f32 %v4557_v16, %v4544_v18  ;;  %5797 = vmatpush.bf16.msrb.mxu2 %v9224_v52 }
 0x49d   : > { %v4617_v11 = vrot.slane %v4558_v60, 7 }
 0x49e   : > { %v4559_v37 = vpop.f32.mrf.mxu3  ;;  %5772 = vmatpush.bf16.msrb.mxu0 %v9207_v17 }
 0x49f   : > { %v4620_v36 = vsel %vm4179_vm14, %v4532_v13, %v4617_v11  ;;  %v9232_v13 = vld [vmem:[%s13237_s9 + $0xe8] sm:$0xff]  ;;  %v9215_v11 = vld [vmem:[%s13237_s9 + $0x60] sm:$0xff] }
 0x4a0   : > { %5810 = vmatpush.bf16.msrb.mxu3 %v9232_v13  ;;  %5785 = vmatpush.bf16.msrb.mxu1 %v9215_v11 }
 0x4a2   : > { %v4546_v28 = vpop.f32.mrf.mxu2 }
 0x4a3   : > { %v9231_v28 = vld [vmem:[%s13237_s9 + $0xe0] sm:$0xff] }
 0x4a4   : > { %5811 = vmatpush.bf16.msrb.mxu3 %v9231_v28 }
 0x4a5   : > { %v4570_v38 = vpop.f32.mrf.mxu1  ;;  %v4583_v59 = vpop.f32.mrf.mxu0 }
 0x4a6   : > { %v4584_v39 = vadd.f32 %v4583_v59, %v4570_v38  ;;  %v9206_v38 = vld [vmem:[%s13237_s9 + $0x18] sm:$0xff] }
 0x4a7   : > { %v9214_v59 = vld [vmem:[%s13237_s9 + $0x58] sm:$0xff]  ;;  %5773 = vmatpush.bf16.msrb.mxu0 %v9206_v38 }
 0x4a8   : > { %v4618_v40 = vrot.slane %v4584_v39, 6  ;;  %v9222_v39 = vld [vmem:[%s13237_s9 + $0x98] sm:$0xff]  ;;  %5786 = vmatpush.bf16.msrb.mxu1 %v9214_v59 }
 0x4ad   : > { %v4572_v43 = vpop.f32.mrf.mxu1  ;;  %v4585_v23 = vpop.f32.mrf.mxu0 }
 0x4ae   : > { %v4596_v42 = vpop.f32.mrf.mxu3  ;;  %v4609_v22 = vpop.f32.mrf.mxu2  ;;  %v9213_v43 = vld [vmem:[%s13237_s9 + $0x50] sm:$0xff] }
 0x4af   : > { %v4610_v2 = vadd.f32 %v4609_v22, %v4596_v42  ;;  %v9230_v42 = vld [vmem:[%s13237_s9 + $0xd8] sm:$0xff]  ;;  %v9205_v22 = vld [vmem:[%s13237_s9 + $0x10] sm:$0xff]  ;;  %5787 = vmatpush.bf16.msrb.mxu1 %v9213_v43 }
 0x4b0   : > { %5812 = vmatpush.bf16.msrb.mxu3 %v9230_v42  ;;  %5774 = vmatpush.bf16.msrb.mxu0 %v9205_v22 }
 0x4b1   : > { %v4619_v54 = vrot.slane %v4610_v2, 5  ;;  %v9221_v2 = vld [vmem:[%s13237_s9 + $0x90] sm:$0xff] }
 0x4b3   : > { %v4621_v1 = vsel %vm4181_vm15, %v4618_v40, %v4619_v54  ;;  %v9204_v54 = vld [vmem:[%s13237_s9 + $0x8] sm:$0xff] }
 0x4b4   : > { %v4622_v55 = vsel %vm4183_vm0, %v4620_v36, %v4621_v1  ;;  %v9223_v36 = vld [vmem:[%s13237_s9 + $0xa0] sm:$0xff]  ;;  %5813 = vmatpush.bf16.msrb.mxu3 %v9229_v3  ;;  %v9220_v1 = vld [vmem:[%s13237_s9 + $0x88] sm:$0xff]  ;;  %5775 = vmatpush.bf16.msrb.mxu0 %v9204_v54 }
 0x4b5   : > { %v4624_v58 = vadd.f32 %v4622_v55, %v4186_v56  ;;  %5798 = vmatpush.bf16.msrb.mxu2 %v9223_v36  ;;  %v9212_v56 = vld [vmem:[%s13237_s9 + $0x48] sm:$0xff] }
 0x4b6   : > { %v4598_v41 = vpop.f32.mrf.mxu3  ;;  %v4611_v51 = vpop.f32.mrf.mxu2  ;;  %5788 = vmatpush.bf16.msrb.mxu1 %v9212_v56 }
 0x4b7   : > { %v9203_v41 = vld [vmem:[%s13237_s9] sm:$0xff] }
 0x4b8   : > { %v9211_v51 = vld [vmem:[%s13237_s9 + $0x40] sm:$0xff]  ;;  %5776 = vmatpush.bf16.msrb.mxu0 %v9203_v41 }
 0x4b9   : > { %v4966_v0 = vpop.f32.mrf.mxu1  ;;  %5799 = vmatpush.bf16.msrb.mxu2 %v9222_v39 }
 0x4ba   : > { %5789 = vmatpush.bf16.msrb.mxu1 %v9211_v51 }
 0x4bd   : > { %5800 = vmatpush.bf16.msrb.mxu2 %v9221_v2 }
 0x4c1   : > { %v4968_v61 = vpop.f32.mrf.mxu1  ;;  %5801 = vmatpush.bf16.msrb.mxu2 %v9220_v1 }
 0x4c2   : > { %v4992_v24 = vpop.f32.mrf.mxu3  ;;  %v9227_v61 = vld [vmem:[%s13237_s9 + $0xc0] sm:$0xff] }
 0x4c5   : > { %v4953_v62 = vpop.f32.mrf.mxu0 }
 0x4c6   : > { %v4967_v6 = vadd.f32 %v4966_v0, %v4953_v62  ;;  %v9219_v0 = vld [vmem:[%s13237_s9 + $0x80] sm:$0xff] }
 0x4c7   : > { %5802 = vmatpush.bf16.msrb.mxu2 %v9219_v0 }
 0x4ca   : > { %v4994_v14 = vpop.f32.mrf.mxu3 }
 0x4cd   : > { %v4955_v8 = vpop.f32.mrf.mxu0 }
 0x4ce   : > { %v4979_v7 = vpop.f32.mrf.mxu2 }
 0x4cf   : > { %v4993_v63 = vadd.f32 %v4992_v24, %v4979_v7 }
 0x4d1   : > { %v5052_v9 = vrot.slane %v4993_v63, 7 }
 0x4d3   : > { %v5055_v26 = vsel %vm4179_vm14, %v4967_v6, %v5052_v9 }
 0x4d6   : > { %v4981_v48 = vpop.f32.mrf.mxu2 }
 0x4d9   : > { %v5005_v29 = vpop.f32.mrf.mxu1  ;;  %v5018_v44 = vpop.f32.mrf.mxu0 }
 0x4da   : > { %v5019_v45 = vadd.f32 %v5018_v44, %v5005_v29 }
 0x4dc   : > { %v5053_v50 = vrot.slane %v5019_v45, 6 }
 0x4e1   : > { %v5007_v47 = vpop.f32.mrf.mxu1  ;;  %v5020_v20 = vpop.f32.mrf.mxu0 }
 0x4e2   : > { %v5031_v4 = vpop.f32.mrf.mxu3  ;;  %v5044_v46 = vpop.f32.mrf.mxu2 }
 0x4e3   : > { %v5045_v12 = vadd.f32 %v5044_v46, %v5031_v4 }
 0x4e5   : > { %v5054_v15 = vrot.slane %v5045_v12, 5 }
 0x4e7   : > { %v5056_v10 = vsel %vm4181_vm15, %v5053_v50, %v5054_v15 }
 0x4e8   : > { %v5057_v18 = vsel %vm4183_vm0, %v5055_v26, %v5056_v10 }
 0x4e9   : > { %v13124_v16 = vadd.f32 %v5057_v18, %v4624_v58  ;;  %v9228_v58 = vld [vmem:[%s13237_s9 + $0xc8] sm:$0xff] }
 0x4ea   : > { %v5033_v33 = vpop.f32.mrf.mxu3  ;;  %v5046_v60 = vpop.f32.mrf.mxu2  ;;  %5814 = vmatpush.bf16.msrb.mxu3 %v9228_v58 }
 0x4ed   : > { %v5401_v37 = vpop.f32.mrf.mxu1 }
 0x4ee   : > { %5815 = vmatpush.bf16.msrb.mxu3 %v9227_v61 }
 0x4f5   : > { %v5403_v40 = vpop.f32.mrf.mxu1 }
 0x4f6   : > { %v5427_v23 = vpop.f32.mrf.mxu3 }
 0x4f9   : > { %v5388_v55 = vpop.f32.mrf.mxu0 }
 0x4fa   : > { %v5402_v31 = vadd.f32 %v5401_v37, %v5388_v55 }
 0x4fe   : > { %v5429_v24 = vpop.f32.mrf.mxu3 }
 0x501   : > { %v5390_v6 = vpop.f32.mrf.mxu0 }
 0x502   : > { %v5414_v62 = vpop.f32.mrf.mxu2 }
 0x503   : > { %v5428_v8 = vadd.f32 %v5427_v23, %v5414_v62 }
 0x505   : > { %v5487_v30 = vrot.slane %v5428_v8, 7 }
 0x507   : > { %v5490_v34 = vsel %vm4179_vm14, %v5402_v31, %v5487_v30 }
 0x50a   : > { %v5416_v14 = vpop.f32.mrf.mxu2 }
 0x50d   : > { %v5453_v7 = vpop.f32.mrf.mxu0  ;;  %v5440_v63 = vpop.f32.mrf.mxu1 }
 0x50e   : > { %v5454_v9 = vadd.f32 %v5453_v7, %v5440_v63 }
 0x510   : > { %v5488_v32 = vrot.slane %v5454_v9, 6 }
 0x514   : > { %v5479_v26 = vpop.f32.mrf.mxu2  ;;  %v5466_v48 = vpop.f32.mrf.mxu3 }
 0x515   : > { %v5455_v29 = vpop.f32.mrf.mxu0  ;;  %v5480_v44 = vadd.f32 %v5479_v26, %v5466_v48  ;;  %v5442_v5 = vpop.f32.mrf.mxu1 }
 0x517   : > { %v5489_v57 = vrot.slane %v5480_v44, 5 }
 0x519   : > { %v5491_v35 = vsel %vm4181_vm15, %v5488_v32, %v5489_v57 }
 0x51a   : > { %v5492_v45 = vsel %vm4183_vm0, %v5490_v34, %v5491_v35 }
 0x51b   : > { %v5494_v4 = vadd.f32 %v5492_v45, %v13124_v16 }
 0x51c   : > { %v5481_v46 = vpop.f32.mrf.mxu2  ;;  %v5468_v47 = vpop.f32.mrf.mxu3 }
 0x51d   : > { %v5495_v49 = vmax.f32 %v5494_v4, 0.0 }
 0x51f   : > { %v5500_v25 = vperm.slane %v5495_v49, 3  ;;  %v5497_v19 = vperm.slane %v5495_v49, 0  ;;  %v5498_v12 = vperm.slane %v5495_v49, 1  ;;  %v5499_v20 = vperm.slane %v5495_v49, 2 }
 0x521   : > { %v5505_v21 = vpack.c.bf16 %v5497_v19, %v5497_v19  ;;  %v5506_v50 = vpack.c.bf16 %v5498_v12, %v5498_v12  ;;  %v5507_v15 = vpack.c.bf16 %v5499_v20, %v5499_v20  ;;  %v5508_v27 = vpack.c.bf16 %v5500_v25, %v5500_v25 }
 0x523   : > { %5777 = vmatmul.bf16.vlgmr.msrb.gmra.mxu0 %v5505_v21  ;;  %5790 = vmatmul.bf16.vlgmr.msrb.gmra.mxu1 %v5506_v50 }
 0x524   : > { %5803 = vmatmul.bf16.vlgmr.msrb.gmra.mxu2 %v5507_v15  ;;  %8667 = vmatmul.msk.bf16.vlgmr.msrb.gmra.mxu3 %vm5762_vm1, %v5508_v27 }
 0x5a0   : > { %v5778_v52 = vpop.f32.mrf.mxu0  ;;  %v5791_v10 = vpop.f32.mrf.mxu1 }
 0x5a1   : > { %v5779_v13 = vadd.f32 %v5778_v52, %v5572_v53 }
 0x5a3   : > { %v5792_v18 = vadd.f32 %v5791_v10, %v5779_v13 }
 0x5a7   : > { %v5804_v16 = vpop.f32.mrf.mxu2  ;;  %v5817_v33 = vpop.f32.mrf.mxu3 }
 0x5a8   : > { %v5805_v60 = vadd.f32 %v5804_v16, %v5792_v18  ;;  %v5780_v17 = vpop.f32.mrf.mxu0  ;;  %v5793_v11 = vpop.f32.mrf.mxu1 }
 0x5aa   : > { %v5818_v36 = vadd.f32 %v5817_v33, %v5805_v60 }
 0x5ac   : > { %v5822_v28 = vsel %vm5821_vm2, %v5818_v36, -inf }
 0x5ad   : > { %5823 = vmax.xlane.f32.xlu0 %v5822_v28 }
 0x5af   : > { %v5806_v37 = vpop.f32.mrf.mxu2  ;;  %v5819_v38 = vpop.f32.mrf.mxu3 }
 0x620   : > { %v5824_v59 = vpop.xlane.xlu0 %5823 }
 0x621   : > { %v5825_v39 = vsub.f32 %v5818_v36, %v5824_v59 }
 0x623   : > { %v5826_v42 = vmul.f32 1.442695, %v5825_v39 }
 0x625   : > { %9274 = vpow2.f32 %v5826_v42 }
 0x62b   : > { %v9275_v22 = vpop.eup %9274 }
 0x62c   : > { %v5828_v43 = vsel %vm5821_vm2, %v9275_v22, 0.0 }
 0x62d   : > { %5829 = vadd.xlane.f32.xlu0 %v5828_v43 }
 0x6a0   : > { %v5830_v2 = vpop.xlane.xlu0 %5829 }
 0x6a1   : > { %9276 = vlog2.f32 %v5830_v2 }
 0x6a7   : > { %v9277_v23 = vpop.eup %9276 }
 0x6a8   : > { %v5832_v3 = vmul.f32 0.6931472, %v9277_v23 }
 0x6aa   : > { %v5833_v40 = vsub.f32 %v5825_v39, %v5832_v3 }
 0x6ac   : > { %5834 = vst.msk [vmem:[%s378_s16] sm:$0x1] %vm5821_vm2, %v5833_v40 }
 0x6ad   : > { %9305 = shalt.err (!%p9302_p3)
}
 0x6ae   : > { %9234 = dma.vmem_to_hbm [thread:$0]  (%p9441_p5), %s5847_s22, 16, %s5849_s24, %s5836_s29  }
 0x6af PF: > { %p9240_p4 = scmp.ge.s32.totalorder %s9340_s20, 2  ;;  %s5860_s13 = sand.u32 1, %s9328_s17  }
 0x6b0   : > { %s5861_s15 = scalar_lea.sflag [#allocation3], %s5860_s13 }
 0x6b1   : > { %p9237_p7 = pnand %p9240_p4, %p9445_p6 }
 0x6b3   : > { %p9238_p8 = pneg %p9237_p7 }
 0x6b5   : > { %9323 = dma.done.wait (%p9238_p8), %s5861_s15, 16  }
 0x6b6   : > { %9325 = vsyncadd (%p9238_p8), %s5861_s15, 4294967280  ;;  %s13249_s16 = sld [smem:[#allocation5_spill]]  ;;  %p21_p9 = scmp.ge.s32.totalorder %s9428_s23, 4  }
 0x6b7   : > { %s13250_s19 = sld [smem:[#allocation6_spill]]  ;;  %s13251_s17 = smov %s9332_s18 }
 0x6b8   : > { %s13253_s20 = smov %s9428_s23  ;;  %23 = sbr.rel (!%p21_p9) target bundleno = 3 (0x3), region = 118 }
 0x6bc   : > { %s13252_s18 = smov %s13249_s16 }
 0x6bd   :  { %5866 = vsyncpa [#allocation3], 1 }
 0x6be   :  { %5868 = vsyncpa [#allocation3 + $0x1], 1 }

</bundles_post_ra>
